<compile_context>
chip_gen: v6e
topology: v6e:2x2x1
jax: 0.10.0
libtpu: 0.0.40
codegen_flags: <defaults>
</compile_context>

<pallas_src>
import functools

import jax
import jax.numpy as jnp
from jax import lax
from jax.experimental import pallas as pl
from jax.experimental.pallas import tpu as pltpu


# ----------------------------------------------------------------------------
# Fused kernel: works on one batch element, channel-major (C, H*W) layout.
# ----------------------------------------------------------------------------
def _fused_sa_kernel(x_ref, w1_ref, b1_ref, w2_ref, b2_ref, w3_ref, b3_ref,
                     rowm_ref, colm_ref, o_ref, pcol_ref, *, H, W, C, Cpad):
    HW = H * W

    def shift_flat(v, d):
        # Cyclic shift along the flattened spatial (lane) axis such that
        # out[:, p] == v[:, (p + d) % HW].  Equivalent to jnp.roll(v, -d, 1);
        # lowers to lane slices + a lane-dim concatenate (XLU rotate class).
        k = d % HW
        if k == 0:
            return v
        return jnp.concatenate([v[:, k:], v[:, :k]], axis=1)

    def tap(v, dy, dx):
        # v shifted by (dy, dx) in image coordinates, zero outside the image.
        return (shift_flat(v, dy * W + dx)
                * rowm_ref[dy + 4] * colm_ref[dx + 4])

    x = x_ref[0]                                       # (C, HW) f32

    # -- stage 1: 3x3 conv as a single im2col MXU dot + folded BN + ReLU -----
    pcol_ref[...] = jnp.zeros_like(pcol_ref)           # zero the padded rows
    for dy in (-1, 0, 1):
        for dx in (-1, 0, 1):
            t = (dy + 1) * 3 + (dx + 1)
            # 8-sublane aligned row offset (t * Cpad), masked height C.
            pcol_ref[pl.ds(t * Cpad, C), :] = tap(x, dy, dx)
    x1 = jnp.dot(w1_ref[...], pcol_ref[...].astype(w1_ref.dtype),
                 preferred_element_type=jnp.float32)
    x1 = jnp.maximum(x1 + b1_ref[...], 0.0)            # (C, HW), stays resident

    # -- stage 2: 1x1 conv + folded BN + ReLU ---------------------------------
    o2 = jnp.dot(w2_ref[...], x1.astype(w2_ref.dtype),
                 preferred_element_type=jnp.float32)
    o2 = jnp.maximum(o2 + b2_ref[...], 0.0)

    # -- stage 3: depthwise 9x9 + folded BN + ReLU + sigmoid + residual mul ---
    acc = jnp.zeros((C, HW), jnp.float32)
    for dy in range(-4, 5):
        rshift = shift_flat(o2, dy * W)                # row shift done once
        inner = jnp.zeros((C, HW), jnp.float32)
        for dx in range(-4, 5):
            w_tap = w3_ref[(dy + 4) * 9 + (dx + 4)]    # (C, 1) per-channel tap
            inner = inner + shift_flat(rshift, dx) * colm_ref[dx + 4] * w_tap
        acc = acc + inner * rowm_ref[dy + 4]           # row mask factored out
    att = jax.nn.sigmoid(jnp.maximum(acc + b3_ref[...], 0.0))
    o_ref[0] = x1 * (1.0 + att)


# ----------------------------------------------------------------------------
# BN folding (inference semantics): scale = gamma/sqrt(var+eps),
#                                   bias  = beta + scale*(conv_bias - mean)
# ----------------------------------------------------------------------------
def _fold_bn(conv_bias, gamma, beta, mean, var, eps=1e-5):
    scale = gamma / jnp.sqrt(var + eps)
    bias = beta + scale * (conv_bias - mean)
    return scale, bias                                  # (C,), (C,)


# ----------------------------------------------------------------------------
# Wrapper: weight prep (BN-scale folding, im2col reordering), masks, pallas_call
# ----------------------------------------------------------------------------
@functools.partial(jax.jit, static_argnames=("mxu_dtype",))
def spatial_attention_pallas(x_nchw, params, *, mxu_dtype=jnp.float32):
    N, C, H, W = x_nchw.shape
    HW = H * W
    Cpad = ((C + 7) // 8) * 8                           # sublane-aligned tap block

    x = x_nchw.reshape(N, C, HW).astype(jnp.float32)    # channel-major, lane-dense

    s1, b1 = _fold_bn(params["b1"], *params["bn1"])
    s2, b2 = _fold_bn(params["b2"], *params["bn2"])
    s3, b3 = _fold_bn(params["b3"], *params["bn3"])

    # 3x3 weights HWIO -> (cout, tap, cin), zero-pad cin to Cpad, fold BN scale.
    w1 = jnp.transpose(params["w1"], (3, 0, 1, 2)).reshape(C, 9, C)
    w1 = jnp.pad(w1, ((0, 0), (0, 0), (0, Cpad - C)))
    w1f = (w1.reshape(C, 9 * Cpad) * s1[:, None]).astype(mxu_dtype)
    # 1x1 weights (cin, cout) -> (cout, cin), fold BN scale.
    w2f = (params["w2"].T * s2[:, None]).astype(mxu_dtype)
    # depthwise 9x9 weights (ky, kx, c) -> (81, C, 1), fold BN scale (VPU, f32).
    w3f = (params["w3"] * s3[None, None, :]).reshape(81, C, 1)

    b1f, b2f, b3f = b1.reshape(C, 1), b2.reshape(C, 1), b3.reshape(C, 1)

    # Boundary masks for shifts d in [-4, 4]: 1.0 where (h+d)/(w+d) stays inside
    # the image.  Shared by the 3x3 (|d|<=1) and depthwise 9x9 (|d|<=4) stages.
    idx = jnp.arange(HW, dtype=jnp.int32)
    hh, ww = (idx // W)[None, :], (idx % W)[None, :]
    rowm = jnp.stack([((hh + d >= 0) & (hh + d < H)).astype(jnp.float32)
                      for d in range(-4, 5)])           # (9, 1, HW)
    colm = jnp.stack([((ww + d >= 0) & (ww + d < W)).astype(jnp.float32)
                      for d in range(-4, 5)])           # (9, 1, HW)

    kernel = functools.partial(_fused_sa_kernel, H=H, W=W, C=C, Cpad=Cpad)
    out = pl.pallas_call(
        kernel,
        out_shape=jax.ShapeDtypeStruct((N, C, HW), jnp.float32),
        grid=(N,),
        in_specs=[
            pl.BlockSpec((1, C, HW), lambda n: (n, 0, 0)),      # x
            pl.BlockSpec((C, 9 * Cpad), lambda n: (0, 0)),      # w1 (folded)
            pl.BlockSpec((C, 1), lambda n: (0, 0)),             # b1 (folded)
            pl.BlockSpec((C, C), lambda n: (0, 0)),             # w2 (folded)
            pl.BlockSpec((C, 1), lambda n: (0, 0)),             # b2 (folded)
            pl.BlockSpec((81, C, 1), lambda n: (0, 0, 0)),      # w3 (folded)
            pl.BlockSpec((C, 1), lambda n: (0, 0)),             # b3 (folded)
            pl.BlockSpec((9, 1, HW), lambda n: (0, 0, 0)),      # row masks
            pl.BlockSpec((9, 1, HW), lambda n: (0, 0, 0)),      # col masks
        ],
        out_specs=pl.BlockSpec((1, C, HW), lambda n: (n, 0, 0)),
        scratch_shapes=[pltpu.VMEM((9 * Cpad, HW), jnp.float32)],  # im2col buf
        compiler_params=pltpu.CompilerParams(
            dimension_semantics=("parallel",),
            vmem_limit_bytes=32 * 1024 * 1024,   # fits v5e/v6e/v7x scoped VMEM
        ),
    )(x, w1f, b1f, w2f, b2f, w3f, b3f, rowm, colm)
    return out.reshape(N, C, H, W)


# ----------------------------------------------------------------------------
# Deterministic synthetic parameters (matches the PyTorch module's shapes)
# ----------------------------------------------------------------------------
def make_params(key, C):
    ks = jax.random.split(key, 12)
    p = {}
    # conv_bn_relu_sa_1 : 3x3, C->C
    p["w1"] = 0.2 * jax.random.normal(ks[0], (3, 3, C, C), jnp.float32)  # HWIO
    p["b1"] = 0.1 * jax.random.normal(ks[1], (C,), jnp.float32)
    p["bn1"] = (1.0 + 0.1 * jax.random.normal(ks[2], (C,)),              # gamma
                0.1 * jax.random.normal(ks[3], (C,)),                    # beta
                0.1 * jax.random.normal(ks[4], (C,)),                    # mean
                0.5 + jax.random.uniform(ks[5], (C,)))                   # var
    # conv_bn_relu_sa_2_1 : 1x1, C->C
    p["w2"] = 0.3 * jax.random.normal(ks[6], (C, C), jnp.float32)        # (cin, cout)
    p["b2"] = 0.1 * jax.random.normal(ks[7], (C,), jnp.float32)
    p["bn2"] = (1.0 + 0.1 * jax.random.normal(ks[8], (C,)),
                0.1 * jax.random.normal(ks[9], (C,)),
                0.05 * jax.random.normal(ks[10], (C,)),
                0.5 + jax.random.uniform(ks[11], (C,)))
    # conv_bn_relu_sa_2_2 : 9x9 depthwise, groups=C
    k2 = jax.random.split(jax.random.fold_in(key, 7), 6)
    p["w3"] = 0.05 * jax.random.normal(k2[0], (9, 9, C), jnp.float32)    # (ky, kx, c)
    p["b3"] = 0.1 * jax.random.normal(k2[1], (C,), jnp.float32)
    p["bn3"] = (1.0 + 0.1 * jax.random.normal(k2[2], (C,)),
                0.1 * jax.random.normal(k2[3], (C,)),
                0.05 * jax.random.normal(k2[4], (C,)),
                0.5 + jax.random.uniform(k2[5], (C,)))
    return p


# ----------------------------------------------------------------------------
# Pure-JAX reference (lax.conv), same folded-BN inference semantics
# ----------------------------------------------------------------------------
def spatial_attention_ref(x_nchw, params):
    x = jnp.transpose(x_nchw, (0, 2, 3, 1)).astype(jnp.float32)
    C = x.shape[-1]

    def cbr(v, w_hwio, scale, bias, pad, groups=1):
        y = lax.conv_general_dilated(
            v, w_hwio, window_strides=(1, 1),
            padding=[(pad, pad), (pad, pad)],
            dimension_numbers=("NHWC", "HWIO", "NHWC"),
            feature_group_count=groups)
        return jnp.maximum(y * scale + bias, 0.0)

    s1, b1 = _fold_bn(params["b1"], *params["bn1"])
    s2, b2 = _fold_bn(params["b2"], *params["bn2"])
    s3, b3 = _fold_bn(params["b3"], *params["bn3"])

    x1 = cbr(x, params["w1"], s1, b1, pad=1)
    o = cbr(x1, params["w2"].reshape(1, 1, C, C), s2, b2, pad=0)
    o = cbr(o, params["w3"].reshape(9, 9, 1, C), s3, b3, pad=4, groups=C)
    y = x1 * (1.0 + jax.nn.sigmoid(o))
    return jnp.transpose(y, (0, 3, 1, 2))


# ----------------------------------------------------------------------------
if __name__ == "__main__":
    N, C, H, W = 2, 4, 16, 16
    key = jax.random.PRNGKey(0)
    kx, kp = jax.random.split(key)
    x = jax.random.normal(kx, (N, C, H, W), jnp.float32)
    params = make_params(kp, C)

    out = spatial_attention_pallas(x, params)
    out = jax.block_until_ready(out)

    ref = spatial_attention_ref(x, params)
    assert out.shape == (N, C, H, W)
    max_err = float(jnp.max(jnp.abs(out - ref)))
    assert jnp.allclose(out, ref, atol=2e-4, rtol=2e-4), max_err

    print("KERNEL_OK")
</pallas_src>

<mosaic_0001>
module attributes {stable_mosaic.version = 11 : i64} {
  func.func @_fused_sa_kernel(%arg0: i32, %arg1: memref<1x4x256xf32, #tpu.memory_space<vmem>>, %arg2: memref<4x72xf32, #tpu.memory_space<vmem>>, %arg3: memref<4x1xf32, #tpu.memory_space<vmem>>, %arg4: memref<4x4xf32, #tpu.memory_space<vmem>>, %arg5: memref<4x1xf32, #tpu.memory_space<vmem>>, %arg6: memref<81x4x1xf32, #tpu.memory_space<vmem>>, %arg7: memref<4x1xf32, #tpu.memory_space<vmem>>, %arg8: memref<9x1x256xf32, #tpu.memory_space<vmem>>, %arg9: memref<9x1x256xf32, #tpu.memory_space<vmem>>, %arg10: memref<1x4x256xf32, #tpu.memory_space<vmem>>, %arg11: memref<72x256xf32, #tpu.memory_space<vmem>>) attributes {dimension_semantics = [#tpu.dimension_semantics<parallel>], iteration_bounds = array<i64: 2>, scalar_prefetch = 0 : i64, scratch_operands = 1 : i64, tpu.core_type = #tpu.core_type<tc>, window_params = [{transform_indices = @transform_0, window_bounds = array<i64: 1, 4, 256>}, {pipeline_mode = #tpu.pipeline_mode<synchronous>, transform_indices = @transform_1, window_bounds = array<i64: 4, 72>}, {pipeline_mode = #tpu.pipeline_mode<synchronous>, transform_indices = @transform_2, window_bounds = array<i64: 4, 1>}, {pipeline_mode = #tpu.pipeline_mode<synchronous>, transform_indices = @transform_3, window_bounds = array<i64: 4, 4>}, {pipeline_mode = #tpu.pipeline_mode<synchronous>, transform_indices = @transform_4, window_bounds = array<i64: 4, 1>}, {pipeline_mode = #tpu.pipeline_mode<synchronous>, transform_indices = @transform_5, window_bounds = array<i64: 81, 4, 1>}, {pipeline_mode = #tpu.pipeline_mode<synchronous>, transform_indices = @transform_6, window_bounds = array<i64: 4, 1>}, {pipeline_mode = #tpu.pipeline_mode<synchronous>, transform_indices = @transform_7, window_bounds = array<i64: 9, 1, 256>}, {pipeline_mode = #tpu.pipeline_mode<synchronous>, transform_indices = @transform_8, window_bounds = array<i64: 9, 1, 256>}, {transform_indices = @transform_9, window_bounds = array<i64: 1, 4, 256>}]} {
    %c0 = arith.constant 0 : index
    %c0_0 = arith.constant 0 : index
    %c0_1 = arith.constant 0 : index
    %0 = vector.load %arg1[%c0, %c0_0, %c0_1] : memref<1x4x256xf32, #tpu.memory_space<vmem>>, vector<1x4x256xf32>
    %1 = vector.shape_cast %0 : vector<1x4x256xf32> to vector<4x256xf32>
    %cst = arith.constant 0.000000e+00 : f32
    %2 = vector.broadcast %cst : f32 to vector<72x256xf32>
    %c0_2 = arith.constant 0 : index
    %c0_3 = arith.constant 0 : index
    %3 = vector.load %arg11[%c0_2, %c0_3] : memref<72x256xf32, #tpu.memory_space<vmem>>, vector<72x256xf32>
    tpu.vector_store %arg11[%c0_2, %c0_3], %2 {strides = array<i32>} : memref<72x256xf32, #tpu.memory_space<vmem>>, vector<72x256xf32>,
    %4 = vector.extract_strided_slice %1 {offsets = [0, 239], sizes = [4, 17], strides = [1, 1]} : vector<4x256xf32> to vector<4x17xf32>
    %5 = vector.extract_strided_slice %1 {offsets = [0, 0], sizes = [4, 239], strides = [1, 1]} : vector<4x256xf32> to vector<4x239xf32>
    %6 = tpu.concatenate %4, %5 in 1 : vector<4x17xf32>, vector<4x239xf32> -> vector<4x256xf32>
    %c3 = arith.constant 3 : index
    %c0_4 = arith.constant 0 : index
    %c0_5 = arith.constant 0 : index
    %7 = vector.load %arg8[%c3, %c0_4, %c0_5] : memref<9x1x256xf32, #tpu.memory_space<vmem>>, vector<1x1x256xf32>
    %8 = vector.shape_cast %7 : vector<1x1x256xf32> to vector<1x256xf32>
    %9 = vector.broadcast %8 : vector<1x256xf32> to vector<4x256xf32>
    %10 = arith.mulf %6, %9 : vector<4x256xf32>
    %c3_6 = arith.constant 3 : index
    %c0_7 = arith.constant 0 : index
    %c0_8 = arith.constant 0 : index
    %11 = vector.load %arg9[%c3_6, %c0_7, %c0_8] : memref<9x1x256xf32, #tpu.memory_space<vmem>>, vector<1x1x256xf32>
    %12 = vector.shape_cast %11 : vector<1x1x256xf32> to vector<1x256xf32>
    %13 = vector.broadcast %12 : vector<1x256xf32> to vector<4x256xf32>
    %14 = arith.mulf %10, %13 : vector<4x256xf32>
    %c0_9 = arith.constant 0 : index
    %c0_10 = arith.constant 0 : index
    %15 = vector.load %arg11[%c0_9, %c0_10] : memref<72x256xf32, #tpu.memory_space<vmem>>, vector<4x256xf32>
    tpu.vector_store %arg11[%c0_9, %c0_10], %14 {strides = array<i32>} : memref<72x256xf32, #tpu.memory_space<vmem>>, vector<4x256xf32>,
    %16 = vector.extract_strided_slice %1 {offsets = [0, 240], sizes = [4, 16], strides = [1, 1]} : vector<4x256xf32> to vector<4x16xf32>
    %17 = vector.extract_strided_slice %1 {offsets = [0, 0], sizes = [4, 240], strides = [1, 1]} : vector<4x256xf32> to vector<4x240xf32>
    %18 = tpu.concatenate %16, %17 in 1 : vector<4x16xf32>, vector<4x240xf32> -> vector<4x256xf32>
    %c3_11 = arith.constant 3 : index
    %c0_12 = arith.constant 0 : index
    %c0_13 = arith.constant 0 : index
    %19 = vector.load %arg8[%c3_11, %c0_12, %c0_13] : memref<9x1x256xf32, #tpu.memory_space<vmem>>, vector<1x1x256xf32>
    %20 = vector.shape_cast %19 : vector<1x1x256xf32> to vector<1x256xf32>
    %21 = vector.broadcast %20 : vector<1x256xf32> to vector<4x256xf32>
    %22 = arith.mulf %18, %21 : vector<4x256xf32>
    %c4 = arith.constant 4 : index
    %c0_14 = arith.constant 0 : index
    %c0_15 = arith.constant 0 : index
    %23 = vector.load %arg9[%c4, %c0_14, %c0_15] : memref<9x1x256xf32, #tpu.memory_space<vmem>>, vector<1x1x256xf32>
    %24 = vector.shape_cast %23 : vector<1x1x256xf32> to vector<1x256xf32>
    %25 = vector.broadcast %24 : vector<1x256xf32> to vector<4x256xf32>
    %26 = arith.mulf %22, %25 : vector<4x256xf32>
    %c8 = arith.constant 8 : index
    %c0_16 = arith.constant 0 : index
    %27 = vector.load %arg11[%c8, %c0_16] : memref<72x256xf32, #tpu.memory_space<vmem>>, vector<4x256xf32>
    tpu.vector_store %arg11[%c8, %c0_16], %26 {strides = array<i32>} : memref<72x256xf32, #tpu.memory_space<vmem>>, vector<4x256xf32>,
    %28 = vector.extract_strided_slice %1 {offsets = [0, 241], sizes = [4, 15], strides = [1, 1]} : vector<4x256xf32> to vector<4x15xf32>
    %29 = vector.extract_strided_slice %1 {offsets = [0, 0], sizes = [4, 241], strides = [1, 1]} : vector<4x256xf32> to vector<4x241xf32>
    %30 = tpu.concatenate %28, %29 in 1 : vector<4x15xf32>, vector<4x241xf32> -> vector<4x256xf32>
    %c3_17 = arith.constant 3 : index
    %c0_18 = arith.constant 0 : index
    %c0_19 = arith.constant 0 : index
    %31 = vector.load %arg8[%c3_17, %c0_18, %c0_19] : memref<9x1x256xf32, #tpu.memory_space<vmem>>, vector<1x1x256xf32>
    %32 = vector.shape_cast %31 : vector<1x1x256xf32> to vector<1x256xf32>
    %33 = vector.broadcast %32 : vector<1x256xf32> to vector<4x256xf32>
    %34 = arith.mulf %30, %33 : vector<4x256xf32>
    %c5 = arith.constant 5 : index
    %c0_20 = arith.constant 0 : index
    %c0_21 = arith.constant 0 : index
    %35 = vector.load %arg9[%c5, %c0_20, %c0_21] : memref<9x1x256xf32, #tpu.memory_space<vmem>>, vector<1x1x256xf32>
    %36 = vector.shape_cast %35 : vector<1x1x256xf32> to vector<1x256xf32>
    %37 = vector.broadcast %36 : vector<1x256xf32> to vector<4x256xf32>
    %38 = arith.mulf %34, %37 : vector<4x256xf32>
    %c16 = arith.constant 16 : index
    %c0_22 = arith.constant 0 : index
    %39 = vector.load %arg11[%c16, %c0_22] : memref<72x256xf32, #tpu.memory_space<vmem>>, vector<4x256xf32>
    tpu.vector_store %arg11[%c16, %c0_22], %38 {strides = array<i32>} : memref<72x256xf32, #tpu.memory_space<vmem>>, vector<4x256xf32>,
    %40 = vector.extract_strided_slice %1 {offsets = [0, 255], sizes = [4, 1], strides = [1, 1]} : vector<4x256xf32> to vector<4x1xf32>
    %41 = vector.extract_strided_slice %1 {offsets = [0, 0], sizes = [4, 255], strides = [1, 1]} : vector<4x256xf32> to vector<4x255xf32>
    %42 = tpu.concatenate %40, %41 in 1 : vector<4x1xf32>, vector<4x255xf32> -> vector<4x256xf32>
    %c4_23 = arith.constant 4 : index
    %c0_24 = arith.constant 0 : index
    %c0_25 = arith.constant 0 : index
    %43 = vector.load %arg8[%c4_23, %c0_24, %c0_25] : memref<9x1x256xf32, #tpu.memory_space<vmem>>, vector<1x1x256xf32>
    %44 = vector.shape_cast %43 : vector<1x1x256xf32> to vector<1x256xf32>
    %45 = vector.broadcast %44 : vector<1x256xf32> to vector<4x256xf32>
    %46 = arith.mulf %42, %45 : vector<4x256xf32>
    %c3_26 = arith.constant 3 : index
    %c0_27 = arith.constant 0 : index
    %c0_28 = arith.constant 0 : index
    %47 = vector.load %arg9[%c3_26, %c0_27, %c0_28] : memref<9x1x256xf32, #tpu.memory_space<vmem>>, vector<1x1x256xf32>
    %48 = vector.shape_cast %47 : vector<1x1x256xf32> to vector<1x256xf32>
    %49 = vector.broadcast %48 : vector<1x256xf32> to vector<4x256xf32>
    %50 = arith.mulf %46, %49 : vector<4x256xf32>
    %c24 = arith.constant 24 : index
    %c0_29 = arith.constant 0 : index
    %51 = vector.load %arg11[%c24, %c0_29] : memref<72x256xf32, #tpu.memory_space<vmem>>, vector<4x256xf32>
    tpu.vector_store %arg11[%c24, %c0_29], %50 {strides = array<i32>} : memref<72x256xf32, #tpu.memory_space<vmem>>, vector<4x256xf32>,
    %c4_30 = arith.constant 4 : index
    %c0_31 = arith.constant 0 : index
    %c0_32 = arith.constant 0 : index
    %52 = vector.load %arg8[%c4_30, %c0_31, %c0_32] : memref<9x1x256xf32, #tpu.memory_space<vmem>>, vector<1x1x256xf32>
    %53 = vector.shape_cast %52 : vector<1x1x256xf32> to vector<1x256xf32>
    %54 = vector.broadcast %53 : vector<1x256xf32> to vector<4x256xf32>
    %55 = arith.mulf %1, %54 : vector<4x256xf32>
    %c4_33 = arith.constant 4 : index
    %c0_34 = arith.constant 0 : index
    %c0_35 = arith.constant 0 : index
    %56 = vector.load %arg9[%c4_33, %c0_34, %c0_35] : memref<9x1x256xf32, #tpu.memory_space<vmem>>, vector<1x1x256xf32>
    %57 = vector.shape_cast %56 : vector<1x1x256xf32> to vector<1x256xf32>
    %58 = vector.broadcast %57 : vector<1x256xf32> to vector<4x256xf32>
    %59 = arith.mulf %55, %58 : vector<4x256xf32>
    %c32 = arith.constant 32 : index
    %c0_36 = arith.constant 0 : index
    %60 = vector.load %arg11[%c32, %c0_36] : memref<72x256xf32, #tpu.memory_space<vmem>>, vector<4x256xf32>
    tpu.vector_store %arg11[%c32, %c0_36], %59 {strides = array<i32>} : memref<72x256xf32, #tpu.memory_space<vmem>>, vector<4x256xf32>,
    %61 = vector.extract_strided_slice %1 {offsets = [0, 1], sizes = [4, 255], strides = [1, 1]} : vector<4x256xf32> to vector<4x255xf32>
    %62 = vector.extract_strided_slice %1 {offsets = [0, 0], sizes = [4, 1], strides = [1, 1]} : vector<4x256xf32> to vector<4x1xf32>
    %63 = tpu.concatenate %61, %62 in 1 : vector<4x255xf32>, vector<4x1xf32> -> vector<4x256xf32>
    %c4_37 = arith.constant 4 : index
    %c0_38 = arith.constant 0 : index
    %c0_39 = arith.constant 0 : index
    %64 = vector.load %arg8[%c4_37, %c0_38, %c0_39] : memref<9x1x256xf32, #tpu.memory_space<vmem>>, vector<1x1x256xf32>
    %65 = vector.shape_cast %64 : vector<1x1x256xf32> to vector<1x256xf32>
    %66 = vector.broadcast %65 : vector<1x256xf32> to vector<4x256xf32>
    %67 = arith.mulf %63, %66 : vector<4x256xf32>
    %c5_40 = arith.constant 5 : index
    %c0_41 = arith.constant 0 : index
    %c0_42 = arith.constant 0 : index
    %68 = vector.load %arg9[%c5_40, %c0_41, %c0_42] : memref<9x1x256xf32, #tpu.memory_space<vmem>>, vector<1x1x256xf32>
    %69 = vector.shape_cast %68 : vector<1x1x256xf32> to vector<1x256xf32>
    %70 = vector.broadcast %69 : vector<1x256xf32> to vector<4x256xf32>
    %71 = arith.mulf %67, %70 : vector<4x256xf32>
    %c40 = arith.constant 40 : index
    %c0_43 = arith.constant 0 : index
    %72 = vector.load %arg11[%c40, %c0_43] : memref<72x256xf32, #tpu.memory_space<vmem>>, vector<4x256xf32>
    tpu.vector_store %arg11[%c40, %c0_43], %71 {strides = array<i32>} : memref<72x256xf32, #tpu.memory_space<vmem>>, vector<4x256xf32>,
    %73 = vector.extract_strided_slice %1 {offsets = [0, 15], sizes = [4, 241], strides = [1, 1]} : vector<4x256xf32> to vector<4x241xf32>
    %74 = vector.extract_strided_slice %1 {offsets = [0, 0], sizes = [4, 15], strides = [1, 1]} : vector<4x256xf32> to vector<4x15xf32>
    %75 = tpu.concatenate %73, %74 in 1 : vector<4x241xf32>, vector<4x15xf32> -> vector<4x256xf32>
    %c5_44 = arith.constant 5 : index
    %c0_45 = arith.constant 0 : index
    %c0_46 = arith.constant 0 : index
    %76 = vector.load %arg8[%c5_44, %c0_45, %c0_46] : memref<9x1x256xf32, #tpu.memory_space<vmem>>, vector<1x1x256xf32>
    %77 = vector.shape_cast %76 : vector<1x1x256xf32> to vector<1x256xf32>
    %78 = vector.broadcast %77 : vector<1x256xf32> to vector<4x256xf32>
    %79 = arith.mulf %75, %78 : vector<4x256xf32>
    %c3_47 = arith.constant 3 : index
    %c0_48 = arith.constant 0 : index
    %c0_49 = arith.constant 0 : index
    %80 = vector.load %arg9[%c3_47, %c0_48, %c0_49] : memref<9x1x256xf32, #tpu.memory_space<vmem>>, vector<1x1x256xf32>
    %81 = vector.shape_cast %80 : vector<1x1x256xf32> to vector<1x256xf32>
    %82 = vector.broadcast %81 : vector<1x256xf32> to vector<4x256xf32>
    %83 = arith.mulf %79, %82 : vector<4x256xf32>
    %c48 = arith.constant 48 : index
    %c0_50 = arith.constant 0 : index
    %84 = vector.load %arg11[%c48, %c0_50] : memref<72x256xf32, #tpu.memory_space<vmem>>, vector<4x256xf32>
    tpu.vector_store %arg11[%c48, %c0_50], %83 {strides = array<i32>} : memref<72x256xf32, #tpu.memory_space<vmem>>, vector<4x256xf32>,
    %85 = vector.extract_strided_slice %1 {offsets = [0, 16], sizes = [4, 240], strides = [1, 1]} : vector<4x256xf32> to vector<4x240xf32>
    %86 = vector.extract_strided_slice %1 {offsets = [0, 0], sizes = [4, 16], strides = [1, 1]} : vector<4x256xf32> to vector<4x16xf32>
    %87 = tpu.concatenate %85, %86 in 1 : vector<4x240xf32>, vector<4x16xf32> -> vector<4x256xf32>
    %c5_51 = arith.constant 5 : index
    %c0_52 = arith.constant 0 : index
    %c0_53 = arith.constant 0 : index
    %88 = vector.load %arg8[%c5_51, %c0_52, %c0_53] : memref<9x1x256xf32, #tpu.memory_space<vmem>>, vector<1x1x256xf32>
    %89 = vector.shape_cast %88 : vector<1x1x256xf32> to vector<1x256xf32>
    %90 = vector.broadcast %89 : vector<1x256xf32> to vector<4x256xf32>
    %91 = arith.mulf %87, %90 : vector<4x256xf32>
    %c4_54 = arith.constant 4 : index
    %c0_55 = arith.constant 0 : index
    %c0_56 = arith.constant 0 : index
    %92 = vector.load %arg9[%c4_54, %c0_55, %c0_56] : memref<9x1x256xf32, #tpu.memory_space<vmem>>, vector<1x1x256xf32>
    %93 = vector.shape_cast %92 : vector<1x1x256xf32> to vector<1x256xf32>
    %94 = vector.broadcast %93 : vector<1x256xf32> to vector<4x256xf32>
    %95 = arith.mulf %91, %94 : vector<4x256xf32>
    %c56 = arith.constant 56 : index
    %c0_57 = arith.constant 0 : index
    %96 = vector.load %arg11[%c56, %c0_57] : memref<72x256xf32, #tpu.memory_space<vmem>>, vector<4x256xf32>
    tpu.vector_store %arg11[%c56, %c0_57], %95 {strides = array<i32>} : memref<72x256xf32, #tpu.memory_space<vmem>>, vector<4x256xf32>,
    %97 = vector.extract_strided_slice %1 {offsets = [0, 17], sizes = [4, 239], strides = [1, 1]} : vector<4x256xf32> to vector<4x239xf32>
    %98 = vector.extract_strided_slice %1 {offsets = [0, 0], sizes = [4, 17], strides = [1, 1]} : vector<4x256xf32> to vector<4x17xf32>
    %99 = tpu.concatenate %97, %98 in 1 : vector<4x239xf32>, vector<4x17xf32> -> vector<4x256xf32>
    %c5_58 = arith.constant 5 : index
    %c0_59 = arith.constant 0 : index
    %c0_60 = arith.constant 0 : index
    %100 = vector.load %arg8[%c5_58, %c0_59, %c0_60] : memref<9x1x256xf32, #tpu.memory_space<vmem>>, vector<1x1x256xf32>
    %101 = vector.shape_cast %100 : vector<1x1x256xf32> to vector<1x256xf32>
    %102 = vector.broadcast %101 : vector<1x256xf32> to vector<4x256xf32>
    %103 = arith.mulf %99, %102 : vector<4x256xf32>
    %c5_61 = arith.constant 5 : index
    %c0_62 = arith.constant 0 : index
    %c0_63 = arith.constant 0 : index
    %104 = vector.load %arg9[%c5_61, %c0_62, %c0_63] : memref<9x1x256xf32, #tpu.memory_space<vmem>>, vector<1x1x256xf32>
    %105 = vector.shape_cast %104 : vector<1x1x256xf32> to vector<1x256xf32>
    %106 = vector.broadcast %105 : vector<1x256xf32> to vector<4x256xf32>
    %107 = arith.mulf %103, %106 : vector<4x256xf32>
    %c64 = arith.constant 64 : index
    %c0_64 = arith.constant 0 : index
    %108 = vector.load %arg11[%c64, %c0_64] : memref<72x256xf32, #tpu.memory_space<vmem>>, vector<4x256xf32>
    tpu.vector_store %arg11[%c64, %c0_64], %107 {strides = array<i32>} : memref<72x256xf32, #tpu.memory_space<vmem>>, vector<4x256xf32>,
    %c0_65 = arith.constant 0 : index
    %c0_66 = arith.constant 0 : index
    %109 = vector.load %arg2[%c0_65, %c0_66] : memref<4x72xf32, #tpu.memory_space<vmem>>, vector<4x72xf32>
    %c0_67 = arith.constant 0 : index
    %c0_68 = arith.constant 0 : index
    %110 = vector.load %arg11[%c0_67, %c0_68] : memref<72x256xf32, #tpu.memory_space<vmem>>, vector<72x256xf32>
    %cst_69 = arith.constant dense<0.000000e+00> : vector<4x256xf32>
    %111 = tpu.matmul %109, %110, %cst_69 {dimension_numbers = #tpu.dot_dimension_numbers<[1], [0], [0], [1], [0, 0, 1, 1], [], []>} : vector<4x72xf32>, vector<72x256xf32>, vector<4x256xf32> -> vector<4x256xf32>
    %c0_70 = arith.constant 0 : index
    %c0_71 = arith.constant 0 : index
    %112 = vector.load %arg3[%c0_70, %c0_71] : memref<4x1xf32, #tpu.memory_space<vmem>>, vector<4x1xf32>
    %113 = vector.broadcast %112 : vector<4x1xf32> to vector<4x256xf32>
    %114 = arith.addf %111, %113 : vector<4x256xf32>
    %cst_72 = arith.constant 0.000000e+00 : f32
    %115 = vector.broadcast %cst_72 : f32 to vector<4x256xf32>
    %116 = arith.maximumf %114, %115 : vector<4x256xf32>
    %c0_73 = arith.constant 0 : index
    %c0_74 = arith.constant 0 : index
    %117 = vector.load %arg4[%c0_73, %c0_74] : memref<4x4xf32, #tpu.memory_space<vmem>>, vector<4x4xf32>
    %cst_75 = arith.constant dense<0.000000e+00> : vector<4x256xf32>
    %118 = tpu.matmul %117, %116, %cst_75 {dimension_numbers = #tpu.dot_dimension_numbers<[1], [0], [0], [1], [0, 0, 1, 1], [], []>} : vector<4x4xf32>, vector<4x256xf32>, vector<4x256xf32> -> vector<4x256xf32>
    %c0_76 = arith.constant 0 : index
    %c0_77 = arith.constant 0 : index
    %119 = vector.load %arg5[%c0_76, %c0_77] : memref<4x1xf32, #tpu.memory_space<vmem>>, vector<4x1xf32>
    %120 = vector.broadcast %119 : vector<4x1xf32> to vector<4x256xf32>
    %121 = arith.addf %118, %120 : vector<4x256xf32>
    %cst_78 = arith.constant 0.000000e+00 : f32
    %122 = vector.broadcast %cst_78 : f32 to vector<4x256xf32>
    %123 = arith.maximumf %121, %122 : vector<4x256xf32>
    %cst_79 = arith.constant 0.000000e+00 : f32
    %124 = vector.broadcast %cst_79 : f32 to vector<4x256xf32>
    %125 = vector.extract_strided_slice %123 {offsets = [0, 192], sizes = [4, 64], strides = [1, 1]} : vector<4x256xf32> to vector<4x64xf32>
    %126 = vector.extract_strided_slice %123 {offsets = [0, 0], sizes = [4, 192], strides = [1, 1]} : vector<4x256xf32> to vector<4x192xf32>
    %127 = tpu.concatenate %125, %126 in 1 : vector<4x64xf32>, vector<4x192xf32> -> vector<4x256xf32>
    %cst_80 = arith.constant 0.000000e+00 : f32
    %128 = vector.broadcast %cst_80 : f32 to vector<4x256xf32>
    %c0_81 = arith.constant 0 : index
    %c0_82 = arith.constant 0 : index
    %c0_83 = arith.constant 0 : index
    %129 = vector.load %arg6[%c0_81, %c0_82, %c0_83] : memref<81x4x1xf32, #tpu.memory_space<vmem>>, vector<1x4x1xf32>
    %130 = vector.shape_cast %129 : vector<1x4x1xf32> to vector<4x1xf32>
    %131 = vector.extract_strided_slice %127 {offsets = [0, 252], sizes = [4, 4], strides = [1, 1]} : vector<4x256xf32> to vector<4x4xf32>
    %132 = vector.extract_strided_slice %127 {offsets = [0, 0], sizes = [4, 252], strides = [1, 1]} : vector<4x256xf32> to vector<4x252xf32>
    %133 = tpu.concatenate %131, %132 in 1 : vector<4x4xf32>, vector<4x252xf32> -> vector<4x256xf32>
    %c0_84 = arith.constant 0 : index
    %c0_85 = arith.constant 0 : index
    %c0_86 = arith.constant 0 : index
    %134 = vector.load %arg9[%c0_84, %c0_85, %c0_86] : memref<9x1x256xf32, #tpu.memory_space<vmem>>, vector<1x1x256xf32>
    %135 = vector.shape_cast %134 : vector<1x1x256xf32> to vector<1x256xf32>
    %136 = vector.broadcast %135 : vector<1x256xf32> to vector<4x256xf32>
    %137 = arith.mulf %133, %136 : vector<4x256xf32>
    %138 = vector.broadcast %130 : vector<4x1xf32> to vector<4x256xf32>
    %139 = arith.mulf %137, %138 : vector<4x256xf32>
    %140 = arith.addf %128, %139 : vector<4x256xf32>
    %c1 = arith.constant 1 : index
    %c0_87 = arith.constant 0 : index
    %c0_88 = arith.constant 0 : index
    %141 = vector.load %arg6[%c1, %c0_87, %c0_88] : memref<81x4x1xf32, #tpu.memory_space<vmem>>, vector<1x4x1xf32>
    %142 = vector.shape_cast %141 : vector<1x4x1xf32> to vector<4x1xf32>
    %143 = vector.extract_strided_slice %127 {offsets = [0, 253], sizes = [4, 3], strides = [1, 1]} : vector<4x256xf32> to vector<4x3xf32>
    %144 = vector.extract_strided_slice %127 {offsets = [0, 0], sizes = [4, 253], strides = [1, 1]} : vector<4x256xf32> to vector<4x253xf32>
    %145 = tpu.concatenate %143, %144 in 1 : vector<4x3xf32>, vector<4x253xf32> -> vector<4x256xf32>
    %c1_89 = arith.constant 1 : index
    %c0_90 = arith.constant 0 : index
    %c0_91 = arith.constant 0 : index
    %146 = vector.load %arg9[%c1_89, %c0_90, %c0_91] : memref<9x1x256xf32, #tpu.memory_space<vmem>>, vector<1x1x256xf32>
    %147 = vector.shape_cast %146 : vector<1x1x256xf32> to vector<1x256xf32>
    %148 = vector.broadcast %147 : vector<1x256xf32> to vector<4x256xf32>
    %149 = arith.mulf %145, %148 : vector<4x256xf32>
    %150 = vector.broadcast %142 : vector<4x1xf32> to vector<4x256xf32>
    %151 = arith.mulf %149, %150 : vector<4x256xf32>
    %152 = arith.addf %140, %151 : vector<4x256xf32>
    %c2 = arith.constant 2 : index
    %c0_92 = arith.constant 0 : index
    %c0_93 = arith.constant 0 : index
    %153 = vector.load %arg6[%c2, %c0_92, %c0_93] : memref<81x4x1xf32, #tpu.memory_space<vmem>>, vector<1x4x1xf32>
    %154 = vector.shape_cast %153 : vector<1x4x1xf32> to vector<4x1xf32>
    %155 = vector.extract_strided_slice %127 {offsets = [0, 254], sizes = [4, 2], strides = [1, 1]} : vector<4x256xf32> to vector<4x2xf32>
    %156 = vector.extract_strided_slice %127 {offsets = [0, 0], sizes = [4, 254], strides = [1, 1]} : vector<4x256xf32> to vector<4x254xf32>
    %157 = tpu.concatenate %155, %156 in 1 : vector<4x2xf32>, vector<4x254xf32> -> vector<4x256xf32>
    %c2_94 = arith.constant 2 : index
    %c0_95 = arith.constant 0 : index
    %c0_96 = arith.constant 0 : index
    %158 = vector.load %arg9[%c2_94, %c0_95, %c0_96] : memref<9x1x256xf32, #tpu.memory_space<vmem>>, vector<1x1x256xf32>
    %159 = vector.shape_cast %158 : vector<1x1x256xf32> to vector<1x256xf32>
    %160 = vector.broadcast %159 : vector<1x256xf32> to vector<4x256xf32>
    %161 = arith.mulf %157, %160 : vector<4x256xf32>
    %162 = vector.broadcast %154 : vector<4x1xf32> to vector<4x256xf32>
    %163 = arith.mulf %161, %162 : vector<4x256xf32>
    %164 = arith.addf %152, %163 : vector<4x256xf32>
    %c3_97 = arith.constant 3 : index
    %c0_98 = arith.constant 0 : index
    %c0_99 = arith.constant 0 : index
    %165 = vector.load %arg6[%c3_97, %c0_98, %c0_99] : memref<81x4x1xf32, #tpu.memory_space<vmem>>, vector<1x4x1xf32>
    %166 = vector.shape_cast %165 : vector<1x4x1xf32> to vector<4x1xf32>
    %167 = vector.extract_strided_slice %127 {offsets = [0, 255], sizes = [4, 1], strides = [1, 1]} : vector<4x256xf32> to vector<4x1xf32>
    %168 = vector.extract_strided_slice %127 {offsets = [0, 0], sizes = [4, 255], strides = [1, 1]} : vector<4x256xf32> to vector<4x255xf32>
    %169 = tpu.concatenate %167, %168 in 1 : vector<4x1xf32>, vector<4x255xf32> -> vector<4x256xf32>
    %c3_100 = arith.constant 3 : index
    %c0_101 = arith.constant 0 : index
    %c0_102 = arith.constant 0 : index
    %170 = vector.load %arg9[%c3_100, %c0_101, %c0_102] : memref<9x1x256xf32, #tpu.memory_space<vmem>>, vector<1x1x256xf32>
    %171 = vector.shape_cast %170 : vector<1x1x256xf32> to vector<1x256xf32>
    %172 = vector.broadcast %171 : vector<1x256xf32> to vector<4x256xf32>
    %173 = arith.mulf %169, %172 : vector<4x256xf32>
    %174 = vector.broadcast %166 : vector<4x1xf32> to vector<4x256xf32>
    %175 = arith.mulf %173, %174 : vector<4x256xf32>
    %176 = arith.addf %164, %175 : vector<4x256xf32>
    %c4_103 = arith.constant 4 : index
    %c0_104 = arith.constant 0 : index
    %c0_105 = arith.constant 0 : index
    %177 = vector.load %arg6[%c4_103, %c0_104, %c0_105] : memref<81x4x1xf32, #tpu.memory_space<vmem>>, vector<1x4x1xf32>
    %178 = vector.shape_cast %177 : vector<1x4x1xf32> to vector<4x1xf32>
    %c4_106 = arith.constant 4 : index
    %c0_107 = arith.constant 0 : index
    %c0_108 = arith.constant 0 : index
    %179 = vector.load %arg9[%c4_106, %c0_107, %c0_108] : memref<9x1x256xf32, #tpu.memory_space<vmem>>, vector<1x1x256xf32>
    %180 = vector.shape_cast %179 : vector<1x1x256xf32> to vector<1x256xf32>
    %181 = vector.broadcast %180 : vector<1x256xf32> to vector<4x256xf32>
    %182 = arith.mulf %127, %181 : vector<4x256xf32>
    %183 = vector.broadcast %178 : vector<4x1xf32> to vector<4x256xf32>
    %184 = arith.mulf %182, %183 : vector<4x256xf32>
    %185 = arith.addf %176, %184 : vector<4x256xf32>
    %c5_109 = arith.constant 5 : index
    %c0_110 = arith.constant 0 : index
    %c0_111 = arith.constant 0 : index
    %186 = vector.load %arg6[%c5_109, %c0_110, %c0_111] : memref<81x4x1xf32, #tpu.memory_space<vmem>>, vector<1x4x1xf32>
    %187 = vector.shape_cast %186 : vector<1x4x1xf32> to vector<4x1xf32>
    %188 = vector.extract_strided_slice %127 {offsets = [0, 1], sizes = [4, 255], strides = [1, 1]} : vector<4x256xf32> to vector<4x255xf32>
    %189 = vector.extract_strided_slice %127 {offsets = [0, 0], sizes = [4, 1], strides = [1, 1]} : vector<4x256xf32> to vector<4x1xf32>
    %190 = tpu.concatenate %188, %189 in 1 : vector<4x255xf32>, vector<4x1xf32> -> vector<4x256xf32>
    %c5_112 = arith.constant 5 : index
    %c0_113 = arith.constant 0 : index
    %c0_114 = arith.constant 0 : index
    %191 = vector.load %arg9[%c5_112, %c0_113, %c0_114] : memref<9x1x256xf32, #tpu.memory_space<vmem>>, vector<1x1x256xf32>
    %192 = vector.shape_cast %191 : vector<1x1x256xf32> to vector<1x256xf32>
    %193 = vector.broadcast %192 : vector<1x256xf32> to vector<4x256xf32>
    %194 = arith.mulf %190, %193 : vector<4x256xf32>
    %195 = vector.broadcast %187 : vector<4x1xf32> to vector<4x256xf32>
    %196 = arith.mulf %194, %195 : vector<4x256xf32>
    %197 = arith.addf %185, %196 : vector<4x256xf32>
    %c6 = arith.constant 6 : index
    %c0_115 = arith.constant 0 : index
    %c0_116 = arith.constant 0 : index
    %198 = vector.load %arg6[%c6, %c0_115, %c0_116] : memref<81x4x1xf32, #tpu.memory_space<vmem>>, vector<1x4x1xf32>
    %199 = vector.shape_cast %198 : vector<1x4x1xf32> to vector<4x1xf32>
    %200 = vector.extract_strided_slice %127 {offsets = [0, 2], sizes = [4, 254], strides = [1, 1]} : vector<4x256xf32> to vector<4x254xf32>
    %201 = vector.extract_strided_slice %127 {offsets = [0, 0], sizes = [4, 2], strides = [1, 1]} : vector<4x256xf32> to vector<4x2xf32>
    %202 = tpu.concatenate %200, %201 in 1 : vector<4x254xf32>, vector<4x2xf32> -> vector<4x256xf32>
    %c6_117 = arith.constant 6 : index
    %c0_118 = arith.constant 0 : index
    %c0_119 = arith.constant 0 : index
    %203 = vector.load %arg9[%c6_117, %c0_118, %c0_119] : memref<9x1x256xf32, #tpu.memory_space<vmem>>, vector<1x1x256xf32>
    %204 = vector.shape_cast %203 : vector<1x1x256xf32> to vector<1x256xf32>
    %205 = vector.broadcast %204 : vector<1x256xf32> to vector<4x256xf32>
    %206 = arith.mulf %202, %205 : vector<4x256xf32>
    %207 = vector.broadcast %199 : vector<4x1xf32> to vector<4x256xf32>
    %208 = arith.mulf %206, %207 : vector<4x256xf32>
    %209 = arith.addf %197, %208 : vector<4x256xf32>
    %c7 = arith.constant 7 : index
    %c0_120 = arith.constant 0 : index
    %c0_121 = arith.constant 0 : index
    %210 = vector.load %arg6[%c7, %c0_120, %c0_121] : memref<81x4x1xf32, #tpu.memory_space<vmem>>, vector<1x4x1xf32>
    %211 = vector.shape_cast %210 : vector<1x4x1xf32> to vector<4x1xf32>
    %212 = vector.extract_strided_slice %127 {offsets = [0, 3], sizes = [4, 253], strides = [1, 1]} : vector<4x256xf32> to vector<4x253xf32>
    %213 = vector.extract_strided_slice %127 {offsets = [0, 0], sizes = [4, 3], strides = [1, 1]} : vector<4x256xf32> to vector<4x3xf32>
    %214 = tpu.concatenate %212, %213 in 1 : vector<4x253xf32>, vector<4x3xf32> -> vector<4x256xf32>
    %c7_122 = arith.constant 7 : index
    %c0_123 = arith.constant 0 : index
    %c0_124 = arith.constant 0 : index
    %215 = vector.load %arg9[%c7_122, %c0_123, %c0_124] : memref<9x1x256xf32, #tpu.memory_space<vmem>>, vector<1x1x256xf32>
    %216 = vector.shape_cast %215 : vector<1x1x256xf32> to vector<1x256xf32>
    %217 = vector.broadcast %216 : vector<1x256xf32> to vector<4x256xf32>
    %218 = arith.mulf %214, %217 : vector<4x256xf32>
    %219 = vector.broadcast %211 : vector<4x1xf32> to vector<4x256xf32>
    %220 = arith.mulf %218, %219 : vector<4x256xf32>
    %221 = arith.addf %209, %220 : vector<4x256xf32>
    %c8_125 = arith.constant 8 : index
    %c0_126 = arith.constant 0 : index
    %c0_127 = arith.constant 0 : index
    %222 = vector.load %arg6[%c8_125, %c0_126, %c0_127] : memref<81x4x1xf32, #tpu.memory_space<vmem>>, vector<1x4x1xf32>
    %223 = vector.shape_cast %222 : vector<1x4x1xf32> to vector<4x1xf32>
    %224 = vector.extract_strided_slice %127 {offsets = [0, 4], sizes = [4, 252], strides = [1, 1]} : vector<4x256xf32> to vector<4x252xf32>
    %225 = vector.extract_strided_slice %127 {offsets = [0, 0], sizes = [4, 4], strides = [1, 1]} : vector<4x256xf32> to vector<4x4xf32>
    %226 = tpu.concatenate %224, %225 in 1 : vector<4x252xf32>, vector<4x4xf32> -> vector<4x256xf32>
    %c8_128 = arith.constant 8 : index
    %c0_129 = arith.constant 0 : index
    %c0_130 = arith.constant 0 : index
    %227 = vector.load %arg9[%c8_128, %c0_129, %c0_130] : memref<9x1x256xf32, #tpu.memory_space<vmem>>, vector<1x1x256xf32>
    %228 = vector.shape_cast %227 : vector<1x1x256xf32> to vector<1x256xf32>
    %229 = vector.broadcast %228 : vector<1x256xf32> to vector<4x256xf32>
    %230 = arith.mulf %226, %229 : vector<4x256xf32>
    %231 = vector.broadcast %223 : vector<4x1xf32> to vector<4x256xf32>
    %232 = arith.mulf %230, %231 : vector<4x256xf32>
    %233 = arith.addf %221, %232 : vector<4x256xf32>
    %c0_131 = arith.constant 0 : index
    %c0_132 = arith.constant 0 : index
    %c0_133 = arith.constant 0 : index
    %234 = vector.load %arg8[%c0_131, %c0_132, %c0_133] : memref<9x1x256xf32, #tpu.memory_space<vmem>>, vector<1x1x256xf32>
    %235 = vector.shape_cast %234 : vector<1x1x256xf32> to vector<1x256xf32>
    %236 = vector.broadcast %235 : vector<1x256xf32> to vector<4x256xf32>
    %237 = arith.mulf %233, %236 : vector<4x256xf32>
    %238 = arith.addf %124, %237 : vector<4x256xf32>
    %239 = vector.extract_strided_slice %123 {offsets = [0, 208], sizes = [4, 48], strides = [1, 1]} : vector<4x256xf32> to vector<4x48xf32>
    %240 = vector.extract_strided_slice %123 {offsets = [0, 0], sizes = [4, 208], strides = [1, 1]} : vector<4x256xf32> to vector<4x208xf32>
    %241 = tpu.concatenate %239, %240 in 1 : vector<4x48xf32>, vector<4x208xf32> -> vector<4x256xf32>
    %cst_134 = arith.constant 0.000000e+00 : f32
    %242 = vector.broadcast %cst_134 : f32 to vector<4x256xf32>
    %c9 = arith.constant 9 : index
    %c0_135 = arith.constant 0 : index
    %c0_136 = arith.constant 0 : index
    %243 = vector.load %arg6[%c9, %c0_135, %c0_136] : memref<81x4x1xf32, #tpu.memory_space<vmem>>, vector<1x4x1xf32>
    %244 = vector.shape_cast %243 : vector<1x4x1xf32> to vector<4x1xf32>
    %245 = vector.extract_strided_slice %241 {offsets = [0, 252], sizes = [4, 4], strides = [1, 1]} : vector<4x256xf32> to vector<4x4xf32>
    %246 = vector.extract_strided_slice %241 {offsets = [0, 0], sizes = [4, 252], strides = [1, 1]} : vector<4x256xf32> to vector<4x252xf32>
    %247 = tpu.concatenate %245, %246 in 1 : vector<4x4xf32>, vector<4x252xf32> -> vector<4x256xf32>
    %c0_137 = arith.constant 0 : index
    %c0_138 = arith.constant 0 : index
    %c0_139 = arith.constant 0 : index
    %248 = vector.load %arg9[%c0_137, %c0_138, %c0_139] : memref<9x1x256xf32, #tpu.memory_space<vmem>>, vector<1x1x256xf32>
    %249 = vector.shape_cast %248 : vector<1x1x256xf32> to vector<1x256xf32>
    %250 = vector.broadcast %249 : vector<1x256xf32> to vector<4x256xf32>
    %251 = arith.mulf %247, %250 : vector<4x256xf32>
    %252 = vector.broadcast %244 : vector<4x1xf32> to vector<4x256xf32>
    %253 = arith.mulf %251, %252 : vector<4x256xf32>
    %254 = arith.addf %242, %253 : vector<4x256xf32>
    %c10 = arith.constant 10 : index
    %c0_140 = arith.constant 0 : index
    %c0_141 = arith.constant 0 : index
    %255 = vector.load %arg6[%c10, %c0_140, %c0_141] : memref<81x4x1xf32, #tpu.memory_space<vmem>>, vector<1x4x1xf32>
    %256 = vector.shape_cast %255 : vector<1x4x1xf32> to vector<4x1xf32>
    %257 = vector.extract_strided_slice %241 {offsets = [0, 253], sizes = [4, 3], strides = [1, 1]} : vector<4x256xf32> to vector<4x3xf32>
    %258 = vector.extract_strided_slice %241 {offsets = [0, 0], sizes = [4, 253], strides = [1, 1]} : vector<4x256xf32> to vector<4x253xf32>
    %259 = tpu.concatenate %257, %258 in 1 : vector<4x3xf32>, vector<4x253xf32> -> vector<4x256xf32>
    %c1_142 = arith.constant 1 : index
    %c0_143 = arith.constant 0 : index
    %c0_144 = arith.constant 0 : index
    %260 = vector.load %arg9[%c1_142, %c0_143, %c0_144] : memref<9x1x256xf32, #tpu.memory_space<vmem>>, vector<1x1x256xf32>
    %261 = vector.shape_cast %260 : vector<1x1x256xf32> to vector<1x256xf32>
    %262 = vector.broadcast %261 : vector<1x256xf32> to vector<4x256xf32>
    %263 = arith.mulf %259, %262 : vector<4x256xf32>
    %264 = vector.broadcast %256 : vector<4x1xf32> to vector<4x256xf32>
    %265 = arith.mulf %263, %264 : vector<4x256xf32>
    %266 = arith.addf %254, %265 : vector<4x256xf32>
    %c11 = arith.constant 11 : index
    %c0_145 = arith.constant 0 : index
    %c0_146 = arith.constant 0 : index
    %267 = vector.load %arg6[%c11, %c0_145, %c0_146] : memref<81x4x1xf32, #tpu.memory_space<vmem>>, vector<1x4x1xf32>
    %268 = vector.shape_cast %267 : vector<1x4x1xf32> to vector<4x1xf32>
    %269 = vector.extract_strided_slice %241 {offsets = [0, 254], sizes = [4, 2], strides = [1, 1]} : vector<4x256xf32> to vector<4x2xf32>
    %270 = vector.extract_strided_slice %241 {offsets = [0, 0], sizes = [4, 254], strides = [1, 1]} : vector<4x256xf32> to vector<4x254xf32>
    %271 = tpu.concatenate %269, %270 in 1 : vector<4x2xf32>, vector<4x254xf32> -> vector<4x256xf32>
    %c2_147 = arith.constant 2 : index
    %c0_148 = arith.constant 0 : index
    %c0_149 = arith.constant 0 : index
    %272 = vector.load %arg9[%c2_147, %c0_148, %c0_149] : memref<9x1x256xf32, #tpu.memory_space<vmem>>, vector<1x1x256xf32>
    %273 = vector.shape_cast %272 : vector<1x1x256xf32> to vector<1x256xf32>
    %274 = vector.broadcast %273 : vector<1x256xf32> to vector<4x256xf32>
    %275 = arith.mulf %271, %274 : vector<4x256xf32>
    %276 = vector.broadcast %268 : vector<4x1xf32> to vector<4x256xf32>
    %277 = arith.mulf %275, %276 : vector<4x256xf32>
    %278 = arith.addf %266, %277 : vector<4x256xf32>
    %c12 = arith.constant 12 : index
    %c0_150 = arith.constant 0 : index
    %c0_151 = arith.constant 0 : index
    %279 = vector.load %arg6[%c12, %c0_150, %c0_151] : memref<81x4x1xf32, #tpu.memory_space<vmem>>, vector<1x4x1xf32>
    %280 = vector.shape_cast %279 : vector<1x4x1xf32> to vector<4x1xf32>
    %281 = vector.extract_strided_slice %241 {offsets = [0, 255], sizes = [4, 1], strides = [1, 1]} : vector<4x256xf32> to vector<4x1xf32>
    %282 = vector.extract_strided_slice %241 {offsets = [0, 0], sizes = [4, 255], strides = [1, 1]} : vector<4x256xf32> to vector<4x255xf32>
    %283 = tpu.concatenate %281, %282 in 1 : vector<4x1xf32>, vector<4x255xf32> -> vector<4x256xf32>
    %c3_152 = arith.constant 3 : index
    %c0_153 = arith.constant 0 : index
    %c0_154 = arith.constant 0 : index
    %284 = vector.load %arg9[%c3_152, %c0_153, %c0_154] : memref<9x1x256xf32, #tpu.memory_space<vmem>>, vector<1x1x256xf32>
    %285 = vector.shape_cast %284 : vector<1x1x256xf32> to vector<1x256xf32>
    %286 = vector.broadcast %285 : vector<1x256xf32> to vector<4x256xf32>
    %287 = arith.mulf %283, %286 : vector<4x256xf32>
    %288 = vector.broadcast %280 : vector<4x1xf32> to vector<4x256xf32>
    %289 = arith.mulf %287, %288 : vector<4x256xf32>
    %290 = arith.addf %278, %289 : vector<4x256xf32>
    %c13 = arith.constant 13 : index
    %c0_155 = arith.constant 0 : index
    %c0_156 = arith.constant 0 : index
    %291 = vector.load %arg6[%c13, %c0_155, %c0_156] : memref<81x4x1xf32, #tpu.memory_space<vmem>>, vector<1x4x1xf32>
    %292 = vector.shape_cast %291 : vector<1x4x1xf32> to vector<4x1xf32>
    %c4_157 = arith.constant 4 : index
    %c0_158 = arith.constant 0 : index
    %c0_159 = arith.constant 0 : index
    %293 = vector.load %arg9[%c4_157, %c0_158, %c0_159] : memref<9x1x256xf32, #tpu.memory_space<vmem>>, vector<1x1x256xf32>
    %294 = vector.shape_cast %293 : vector<1x1x256xf32> to vector<1x256xf32>
    %295 = vector.broadcast %294 : vector<1x256xf32> to vector<4x256xf32>
    %296 = arith.mulf %241, %295 : vector<4x256xf32>
    %297 = vector.broadcast %292 : vector<4x1xf32> to vector<4x256xf32>
    %298 = arith.mulf %296, %297 : vector<4x256xf32>
    %299 = arith.addf %290, %298 : vector<4x256xf32>
    %c14 = arith.constant 14 : index
    %c0_160 = arith.constant 0 : index
    %c0_161 = arith.constant 0 : index
    %300 = vector.load %arg6[%c14, %c0_160, %c0_161] : memref<81x4x1xf32, #tpu.memory_space<vmem>>, vector<1x4x1xf32>
    %301 = vector.shape_cast %300 : vector<1x4x1xf32> to vector<4x1xf32>
    %302 = vector.extract_strided_slice %241 {offsets = [0, 1], sizes = [4, 255], strides = [1, 1]} : vector<4x256xf32> to vector<4x255xf32>
    %303 = vector.extract_strided_slice %241 {offsets = [0, 0], sizes = [4, 1], strides = [1, 1]} : vector<4x256xf32> to vector<4x1xf32>
    %304 = tpu.concatenate %302, %303 in 1 : vector<4x255xf32>, vector<4x1xf32> -> vector<4x256xf32>
    %c5_162 = arith.constant 5 : index
    %c0_163 = arith.constant 0 : index
    %c0_164 = arith.constant 0 : index
    %305 = vector.load %arg9[%c5_162, %c0_163, %c0_164] : memref<9x1x256xf32, #tpu.memory_space<vmem>>, vector<1x1x256xf32>
    %306 = vector.shape_cast %305 : vector<1x1x256xf32> to vector<1x256xf32>
    %307 = vector.broadcast %306 : vector<1x256xf32> to vector<4x256xf32>
    %308 = arith.mulf %304, %307 : vector<4x256xf32>
    %309 = vector.broadcast %301 : vector<4x1xf32> to vector<4x256xf32>
    %310 = arith.mulf %308, %309 : vector<4x256xf32>
    %311 = arith.addf %299, %310 : vector<4x256xf32>
    %c15 = arith.constant 15 : index
    %c0_165 = arith.constant 0 : index
    %c0_166 = arith.constant 0 : index
    %312 = vector.load %arg6[%c15, %c0_165, %c0_166] : memref<81x4x1xf32, #tpu.memory_space<vmem>>, vector<1x4x1xf32>
    %313 = vector.shape_cast %312 : vector<1x4x1xf32> to vector<4x1xf32>
    %314 = vector.extract_strided_slice %241 {offsets = [0, 2], sizes = [4, 254], strides = [1, 1]} : vector<4x256xf32> to vector<4x254xf32>
    %315 = vector.extract_strided_slice %241 {offsets = [0, 0], sizes = [4, 2], strides = [1, 1]} : vector<4x256xf32> to vector<4x2xf32>
    %316 = tpu.concatenate %314, %315 in 1 : vector<4x254xf32>, vector<4x2xf32> -> vector<4x256xf32>
    %c6_167 = arith.constant 6 : index
    %c0_168 = arith.constant 0 : index
    %c0_169 = arith.constant 0 : index
    %317 = vector.load %arg9[%c6_167, %c0_168, %c0_169] : memref<9x1x256xf32, #tpu.memory_space<vmem>>, vector<1x1x256xf32>
    %318 = vector.shape_cast %317 : vector<1x1x256xf32> to vector<1x256xf32>
    %319 = vector.broadcast %318 : vector<1x256xf32> to vector<4x256xf32>
    %320 = arith.mulf %316, %319 : vector<4x256xf32>
    %321 = vector.broadcast %313 : vector<4x1xf32> to vector<4x256xf32>
    %322 = arith.mulf %320, %321 : vector<4x256xf32>
    %323 = arith.addf %311, %322 : vector<4x256xf32>
    %c16_170 = arith.constant 16 : index
    %c0_171 = arith.constant 0 : index
    %c0_172 = arith.constant 0 : index
    %324 = vector.load %arg6[%c16_170, %c0_171, %c0_172] : memref<81x4x1xf32, #tpu.memory_space<vmem>>, vector<1x4x1xf32>
    %325 = vector.shape_cast %324 : vector<1x4x1xf32> to vector<4x1xf32>
    %326 = vector.extract_strided_slice %241 {offsets = [0, 3], sizes = [4, 253], strides = [1, 1]} : vector<4x256xf32> to vector<4x253xf32>
    %327 = vector.extract_strided_slice %241 {offsets = [0, 0], sizes = [4, 3], strides = [1, 1]} : vector<4x256xf32> to vector<4x3xf32>
    %328 = tpu.concatenate %326, %327 in 1 : vector<4x253xf32>, vector<4x3xf32> -> vector<4x256xf32>
    %c7_173 = arith.constant 7 : index
    %c0_174 = arith.constant 0 : index
    %c0_175 = arith.constant 0 : index
    %329 = vector.load %arg9[%c7_173, %c0_174, %c0_175] : memref<9x1x256xf32, #tpu.memory_space<vmem>>, vector<1x1x256xf32>
    %330 = vector.shape_cast %329 : vector<1x1x256xf32> to vector<1x256xf32>
    %331 = vector.broadcast %330 : vector<1x256xf32> to vector<4x256xf32>
    %332 = arith.mulf %328, %331 : vector<4x256xf32>
    %333 = vector.broadcast %325 : vector<4x1xf32> to vector<4x256xf32>
    %334 = arith.mulf %332, %333 : vector<4x256xf32>
    %335 = arith.addf %323, %334 : vector<4x256xf32>
    %c17 = arith.constant 17 : index
    %c0_176 = arith.constant 0 : index
    %c0_177 = arith.constant 0 : index
    %336 = vector.load %arg6[%c17, %c0_176, %c0_177] : memref<81x4x1xf32, #tpu.memory_space<vmem>>, vector<1x4x1xf32>
    %337 = vector.shape_cast %336 : vector<1x4x1xf32> to vector<4x1xf32>
    %338 = vector.extract_strided_slice %241 {offsets = [0, 4], sizes = [4, 252], strides = [1, 1]} : vector<4x256xf32> to vector<4x252xf32>
    %339 = vector.extract_strided_slice %241 {offsets = [0, 0], sizes = [4, 4], strides = [1, 1]} : vector<4x256xf32> to vector<4x4xf32>
    %340 = tpu.concatenate %338, %339 in 1 : vector<4x252xf32>, vector<4x4xf32> -> vector<4x256xf32>
    %c8_178 = arith.constant 8 : index
    %c0_179 = arith.constant 0 : index
    %c0_180 = arith.constant 0 : index
    %341 = vector.load %arg9[%c8_178, %c0_179, %c0_180] : memref<9x1x256xf32, #tpu.memory_space<vmem>>, vector<1x1x256xf32>
    %342 = vector.shape_cast %341 : vector<1x1x256xf32> to vector<1x256xf32>
    %343 = vector.broadcast %342 : vector<1x256xf32> to vector<4x256xf32>
    %344 = arith.mulf %340, %343 : vector<4x256xf32>
    %345 = vector.broadcast %337 : vector<4x1xf32> to vector<4x256xf32>
    %346 = arith.mulf %344, %345 : vector<4x256xf32>
    %347 = arith.addf %335, %346 : vector<4x256xf32>
    %c1_181 = arith.constant 1 : index
    %c0_182 = arith.constant 0 : index
    %c0_183 = arith.constant 0 : index
    %348 = vector.load %arg8[%c1_181, %c0_182, %c0_183] : memref<9x1x256xf32, #tpu.memory_space<vmem>>, vector<1x1x256xf32>
    %349 = vector.shape_cast %348 : vector<1x1x256xf32> to vector<1x256xf32>
    %350 = vector.broadcast %349 : vector<1x256xf32> to vector<4x256xf32>
    %351 = arith.mulf %347, %350 : vector<4x256xf32>
    %352 = arith.addf %238, %351 : vector<4x256xf32>
    %353 = vector.extract_strided_slice %123 {offsets = [0, 224], sizes = [4, 32], strides = [1, 1]} : vector<4x256xf32> to vector<4x32xf32>
    %354 = vector.extract_strided_slice %123 {offsets = [0, 0], sizes = [4, 224], strides = [1, 1]} : vector<4x256xf32> to vector<4x224xf32>
    %355 = tpu.concatenate %353, %354 in 1 : vector<4x32xf32>, vector<4x224xf32> -> vector<4x256xf32>
    %cst_184 = arith.constant 0.000000e+00 : f32
    %356 = vector.broadcast %cst_184 : f32 to vector<4x256xf32>
    %c18 = arith.constant 18 : index
    %c0_185 = arith.constant 0 : index
    %c0_186 = arith.constant 0 : index
    %357 = vector.load %arg6[%c18, %c0_185, %c0_186] : memref<81x4x1xf32, #tpu.memory_space<vmem>>, vector<1x4x1xf32>
    %358 = vector.shape_cast %357 : vector<1x4x1xf32> to vector<4x1xf32>
    %359 = vector.extract_strided_slice %355 {offsets = [0, 252], sizes = [4, 4], strides = [1, 1]} : vector<4x256xf32> to vector<4x4xf32>
    %360 = vector.extract_strided_slice %355 {offsets = [0, 0], sizes = [4, 252], strides = [1, 1]} : vector<4x256xf32> to vector<4x252xf32>
    %361 = tpu.concatenate %359, %360 in 1 : vector<4x4xf32>, vector<4x252xf32> -> vector<4x256xf32>
    %c0_187 = arith.constant 0 : index
    %c0_188 = arith.constant 0 : index
    %c0_189 = arith.constant 0 : index
    %362 = vector.load %arg9[%c0_187, %c0_188, %c0_189] : memref<9x1x256xf32, #tpu.memory_space<vmem>>, vector<1x1x256xf32>
    %363 = vector.shape_cast %362 : vector<1x1x256xf32> to vector<1x256xf32>
    %364 = vector.broadcast %363 : vector<1x256xf32> to vector<4x256xf32>
    %365 = arith.mulf %361, %364 : vector<4x256xf32>
    %366 = vector.broadcast %358 : vector<4x1xf32> to vector<4x256xf32>
    %367 = arith.mulf %365, %366 : vector<4x256xf32>
    %368 = arith.addf %356, %367 : vector<4x256xf32>
    %c19 = arith.constant 19 : index
    %c0_190 = arith.constant 0 : index
    %c0_191 = arith.constant 0 : index
    %369 = vector.load %arg6[%c19, %c0_190, %c0_191] : memref<81x4x1xf32, #tpu.memory_space<vmem>>, vector<1x4x1xf32>
    %370 = vector.shape_cast %369 : vector<1x4x1xf32> to vector<4x1xf32>
    %371 = vector.extract_strided_slice %355 {offsets = [0, 253], sizes = [4, 3], strides = [1, 1]} : vector<4x256xf32> to vector<4x3xf32>
    %372 = vector.extract_strided_slice %355 {offsets = [0, 0], sizes = [4, 253], strides = [1, 1]} : vector<4x256xf32> to vector<4x253xf32>
    %373 = tpu.concatenate %371, %372 in 1 : vector<4x3xf32>, vector<4x253xf32> -> vector<4x256xf32>
    %c1_192 = arith.constant 1 : index
    %c0_193 = arith.constant 0 : index
    %c0_194 = arith.constant 0 : index
    %374 = vector.load %arg9[%c1_192, %c0_193, %c0_194] : memref<9x1x256xf32, #tpu.memory_space<vmem>>, vector<1x1x256xf32>
    %375 = vector.shape_cast %374 : vector<1x1x256xf32> to vector<1x256xf32>
    %376 = vector.broadcast %375 : vector<1x256xf32> to vector<4x256xf32>
    %377 = arith.mulf %373, %376 : vector<4x256xf32>
    %378 = vector.broadcast %370 : vector<4x1xf32> to vector<4x256xf32>
    %379 = arith.mulf %377, %378 : vector<4x256xf32>
    %380 = arith.addf %368, %379 : vector<4x256xf32>
    %c20 = arith.constant 20 : index
    %c0_195 = arith.constant 0 : index
    %c0_196 = arith.constant 0 : index
    %381 = vector.load %arg6[%c20, %c0_195, %c0_196] : memref<81x4x1xf32, #tpu.memory_space<vmem>>, vector<1x4x1xf32>
    %382 = vector.shape_cast %381 : vector<1x4x1xf32> to vector<4x1xf32>
    %383 = vector.extract_strided_slice %355 {offsets = [0, 254], sizes = [4, 2], strides = [1, 1]} : vector<4x256xf32> to vector<4x2xf32>
    %384 = vector.extract_strided_slice %355 {offsets = [0, 0], sizes = [4, 254], strides = [1, 1]} : vector<4x256xf32> to vector<4x254xf32>
    %385 = tpu.concatenate %383, %384 in 1 : vector<4x2xf32>, vector<4x254xf32> -> vector<4x256xf32>
    %c2_197 = arith.constant 2 : index
    %c0_198 = arith.constant 0 : index
    %c0_199 = arith.constant 0 : index
    %386 = vector.load %arg9[%c2_197, %c0_198, %c0_199] : memref<9x1x256xf32, #tpu.memory_space<vmem>>, vector<1x1x256xf32>
    %387 = vector.shape_cast %386 : vector<1x1x256xf32> to vector<1x256xf32>
    %388 = vector.broadcast %387 : vector<1x256xf32> to vector<4x256xf32>
    %389 = arith.mulf %385, %388 : vector<4x256xf32>
    %390 = vector.broadcast %382 : vector<4x1xf32> to vector<4x256xf32>
    %391 = arith.mulf %389, %390 : vector<4x256xf32>
    %392 = arith.addf %380, %391 : vector<4x256xf32>
    %c21 = arith.constant 21 : index
    %c0_200 = arith.constant 0 : index
    %c0_201 = arith.constant 0 : index
    %393 = vector.load %arg6[%c21, %c0_200, %c0_201] : memref<81x4x1xf32, #tpu.memory_space<vmem>>, vector<1x4x1xf32>
    %394 = vector.shape_cast %393 : vector<1x4x1xf32> to vector<4x1xf32>
    %395 = vector.extract_strided_slice %355 {offsets = [0, 255], sizes = [4, 1], strides = [1, 1]} : vector<4x256xf32> to vector<4x1xf32>
    %396 = vector.extract_strided_slice %355 {offsets = [0, 0], sizes = [4, 255], strides = [1, 1]} : vector<4x256xf32> to vector<4x255xf32>
    %397 = tpu.concatenate %395, %396 in 1 : vector<4x1xf32>, vector<4x255xf32> -> vector<4x256xf32>
    %c3_202 = arith.constant 3 : index
    %c0_203 = arith.constant 0 : index
    %c0_204 = arith.constant 0 : index
    %398 = vector.load %arg9[%c3_202, %c0_203, %c0_204] : memref<9x1x256xf32, #tpu.memory_space<vmem>>, vector<1x1x256xf32>
    %399 = vector.shape_cast %398 : vector<1x1x256xf32> to vector<1x256xf32>
    %400 = vector.broadcast %399 : vector<1x256xf32> to vector<4x256xf32>
    %401 = arith.mulf %397, %400 : vector<4x256xf32>
    %402 = vector.broadcast %394 : vector<4x1xf32> to vector<4x256xf32>
    %403 = arith.mulf %401, %402 : vector<4x256xf32>
    %404 = arith.addf %392, %403 : vector<4x256xf32>
    %c22 = arith.constant 22 : index
    %c0_205 = arith.constant 0 : index
    %c0_206 = arith.constant 0 : index
    %405 = vector.load %arg6[%c22, %c0_205, %c0_206] : memref<81x4x1xf32, #tpu.memory_space<vmem>>, vector<1x4x1xf32>
    %406 = vector.shape_cast %405 : vector<1x4x1xf32> to vector<4x1xf32>
    %c4_207 = arith.constant 4 : index
    %c0_208 = arith.constant 0 : index
    %c0_209 = arith.constant 0 : index
    %407 = vector.load %arg9[%c4_207, %c0_208, %c0_209] : memref<9x1x256xf32, #tpu.memory_space<vmem>>, vector<1x1x256xf32>
    %408 = vector.shape_cast %407 : vector<1x1x256xf32> to vector<1x256xf32>
    %409 = vector.broadcast %408 : vector<1x256xf32> to vector<4x256xf32>
    %410 = arith.mulf %355, %409 : vector<4x256xf32>
    %411 = vector.broadcast %406 : vector<4x1xf32> to vector<4x256xf32>
    %412 = arith.mulf %410, %411 : vector<4x256xf32>
    %413 = arith.addf %404, %412 : vector<4x256xf32>
    %c23 = arith.constant 23 : index
    %c0_210 = arith.constant 0 : index
    %c0_211 = arith.constant 0 : index
    %414 = vector.load %arg6[%c23, %c0_210, %c0_211] : memref<81x4x1xf32, #tpu.memory_space<vmem>>, vector<1x4x1xf32>
    %415 = vector.shape_cast %414 : vector<1x4x1xf32> to vector<4x1xf32>
    %416 = vector.extract_strided_slice %355 {offsets = [0, 1], sizes = [4, 255], strides = [1, 1]} : vector<4x256xf32> to vector<4x255xf32>
    %417 = vector.extract_strided_slice %355 {offsets = [0, 0], sizes = [4, 1], strides = [1, 1]} : vector<4x256xf32> to vector<4x1xf32>
    %418 = tpu.concatenate %416, %417 in 1 : vector<4x255xf32>, vector<4x1xf32> -> vector<4x256xf32>
    %c5_212 = arith.constant 5 : index
    %c0_213 = arith.constant 0 : index
    %c0_214 = arith.constant 0 : index
    %419 = vector.load %arg9[%c5_212, %c0_213, %c0_214] : memref<9x1x256xf32, #tpu.memory_space<vmem>>, vector<1x1x256xf32>
    %420 = vector.shape_cast %419 : vector<1x1x256xf32> to vector<1x256xf32>
    %421 = vector.broadcast %420 : vector<1x256xf32> to vector<4x256xf32>
    %422 = arith.mulf %418, %421 : vector<4x256xf32>
    %423 = vector.broadcast %415 : vector<4x1xf32> to vector<4x256xf32>
    %424 = arith.mulf %422, %423 : vector<4x256xf32>
    %425 = arith.addf %413, %424 : vector<4x256xf32>
    %c24_215 = arith.constant 24 : index
    %c0_216 = arith.constant 0 : index
    %c0_217 = arith.constant 0 : index
    %426 = vector.load %arg6[%c24_215, %c0_216, %c0_217] : memref<81x4x1xf32, #tpu.memory_space<vmem>>, vector<1x4x1xf32>
    %427 = vector.shape_cast %426 : vector<1x4x1xf32> to vector<4x1xf32>
    %428 = vector.extract_strided_slice %355 {offsets = [0, 2], sizes = [4, 254], strides = [1, 1]} : vector<4x256xf32> to vector<4x254xf32>
    %429 = vector.extract_strided_slice %355 {offsets = [0, 0], sizes = [4, 2], strides = [1, 1]} : vector<4x256xf32> to vector<4x2xf32>
    %430 = tpu.concatenate %428, %429 in 1 : vector<4x254xf32>, vector<4x2xf32> -> vector<4x256xf32>
    %c6_218 = arith.constant 6 : index
    %c0_219 = arith.constant 0 : index
    %c0_220 = arith.constant 0 : index
    %431 = vector.load %arg9[%c6_218, %c0_219, %c0_220] : memref<9x1x256xf32, #tpu.memory_space<vmem>>, vector<1x1x256xf32>
    %432 = vector.shape_cast %431 : vector<1x1x256xf32> to vector<1x256xf32>
    %433 = vector.broadcast %432 : vector<1x256xf32> to vector<4x256xf32>
    %434 = arith.mulf %430, %433 : vector<4x256xf32>
    %435 = vector.broadcast %427 : vector<4x1xf32> to vector<4x256xf32>
    %436 = arith.mulf %434, %435 : vector<4x256xf32>
    %437 = arith.addf %425, %436 : vector<4x256xf32>
    %c25 = arith.constant 25 : index
    %c0_221 = arith.constant 0 : index
    %c0_222 = arith.constant 0 : index
    %438 = vector.load %arg6[%c25, %c0_221, %c0_222] : memref<81x4x1xf32, #tpu.memory_space<vmem>>, vector<1x4x1xf32>
    %439 = vector.shape_cast %438 : vector<1x4x1xf32> to vector<4x1xf32>
    %440 = vector.extract_strided_slice %355 {offsets = [0, 3], sizes = [4, 253], strides = [1, 1]} : vector<4x256xf32> to vector<4x253xf32>
    %441 = vector.extract_strided_slice %355 {offsets = [0, 0], sizes = [4, 3], strides = [1, 1]} : vector<4x256xf32> to vector<4x3xf32>
    %442 = tpu.concatenate %440, %441 in 1 : vector<4x253xf32>, vector<4x3xf32> -> vector<4x256xf32>
    %c7_223 = arith.constant 7 : index
    %c0_224 = arith.constant 0 : index
    %c0_225 = arith.constant 0 : index
    %443 = vector.load %arg9[%c7_223, %c0_224, %c0_225] : memref<9x1x256xf32, #tpu.memory_space<vmem>>, vector<1x1x256xf32>
    %444 = vector.shape_cast %443 : vector<1x1x256xf32> to vector<1x256xf32>
    %445 = vector.broadcast %444 : vector<1x256xf32> to vector<4x256xf32>
    %446 = arith.mulf %442, %445 : vector<4x256xf32>
    %447 = vector.broadcast %439 : vector<4x1xf32> to vector<4x256xf32>
    %448 = arith.mulf %446, %447 : vector<4x256xf32>
    %449 = arith.addf %437, %448 : vector<4x256xf32>
    %c26 = arith.constant 26 : index
    %c0_226 = arith.constant 0 : index
    %c0_227 = arith.constant 0 : index
    %450 = vector.load %arg6[%c26, %c0_226, %c0_227] : memref<81x4x1xf32, #tpu.memory_space<vmem>>, vector<1x4x1xf32>
    %451 = vector.shape_cast %450 : vector<1x4x1xf32> to vector<4x1xf32>
    %452 = vector.extract_strided_slice %355 {offsets = [0, 4], sizes = [4, 252], strides = [1, 1]} : vector<4x256xf32> to vector<4x252xf32>
    %453 = vector.extract_strided_slice %355 {offsets = [0, 0], sizes = [4, 4], strides = [1, 1]} : vector<4x256xf32> to vector<4x4xf32>
    %454 = tpu.concatenate %452, %453 in 1 : vector<4x252xf32>, vector<4x4xf32> -> vector<4x256xf32>
    %c8_228 = arith.constant 8 : index
    %c0_229 = arith.constant 0 : index
    %c0_230 = arith.constant 0 : index
    %455 = vector.load %arg9[%c8_228, %c0_229, %c0_230] : memref<9x1x256xf32, #tpu.memory_space<vmem>>, vector<1x1x256xf32>
    %456 = vector.shape_cast %455 : vector<1x1x256xf32> to vector<1x256xf32>
    %457 = vector.broadcast %456 : vector<1x256xf32> to vector<4x256xf32>
    %458 = arith.mulf %454, %457 : vector<4x256xf32>
    %459 = vector.broadcast %451 : vector<4x1xf32> to vector<4x256xf32>
    %460 = arith.mulf %458, %459 : vector<4x256xf32>
    %461 = arith.addf %449, %460 : vector<4x256xf32>
    %c2_231 = arith.constant 2 : index
    %c0_232 = arith.constant 0 : index
    %c0_233 = arith.constant 0 : index
    %462 = vector.load %arg8[%c2_231, %c0_232, %c0_233] : memref<9x1x256xf32, #tpu.memory_space<vmem>>, vector<1x1x256xf32>
    %463 = vector.shape_cast %462 : vector<1x1x256xf32> to vector<1x256xf32>
    %464 = vector.broadcast %463 : vector<1x256xf32> to vector<4x256xf32>
    %465 = arith.mulf %461, %464 : vector<4x256xf32>
    %466 = arith.addf %352, %465 : vector<4x256xf32>
    %467 = vector.extract_strided_slice %123 {offsets = [0, 240], sizes = [4, 16], strides = [1, 1]} : vector<4x256xf32> to vector<4x16xf32>
    %468 = vector.extract_strided_slice %123 {offsets = [0, 0], sizes = [4, 240], strides = [1, 1]} : vector<4x256xf32> to vector<4x240xf32>
    %469 = tpu.concatenate %467, %468 in 1 : vector<4x16xf32>, vector<4x240xf32> -> vector<4x256xf32>
    %cst_234 = arith.constant 0.000000e+00 : f32
    %470 = vector.broadcast %cst_234 : f32 to vector<4x256xf32>
    %c27 = arith.constant 27 : index
    %c0_235 = arith.constant 0 : index
    %c0_236 = arith.constant 0 : index
    %471 = vector.load %arg6[%c27, %c0_235, %c0_236] : memref<81x4x1xf32, #tpu.memory_space<vmem>>, vector<1x4x1xf32>
    %472 = vector.shape_cast %471 : vector<1x4x1xf32> to vector<4x1xf32>
    %473 = vector.extract_strided_slice %469 {offsets = [0, 252], sizes = [4, 4], strides = [1, 1]} : vector<4x256xf32> to vector<4x4xf32>
    %474 = vector.extract_strided_slice %469 {offsets = [0, 0], sizes = [4, 252], strides = [1, 1]} : vector<4x256xf32> to vector<4x252xf32>
    %475 = tpu.concatenate %473, %474 in 1 : vector<4x4xf32>, vector<4x252xf32> -> vector<4x256xf32>
    %c0_237 = arith.constant 0 : index
    %c0_238 = arith.constant 0 : index
    %c0_239 = arith.constant 0 : index
    %476 = vector.load %arg9[%c0_237, %c0_238, %c0_239] : memref<9x1x256xf32, #tpu.memory_space<vmem>>, vector<1x1x256xf32>
    %477 = vector.shape_cast %476 : vector<1x1x256xf32> to vector<1x256xf32>
    %478 = vector.broadcast %477 : vector<1x256xf32> to vector<4x256xf32>
    %479 = arith.mulf %475, %478 : vector<4x256xf32>
    %480 = vector.broadcast %472 : vector<4x1xf32> to vector<4x256xf32>
    %481 = arith.mulf %479, %480 : vector<4x256xf32>
    %482 = arith.addf %470, %481 : vector<4x256xf32>
    %c28 = arith.constant 28 : index
    %c0_240 = arith.constant 0 : index
    %c0_241 = arith.constant 0 : index
    %483 = vector.load %arg6[%c28, %c0_240, %c0_241] : memref<81x4x1xf32, #tpu.memory_space<vmem>>, vector<1x4x1xf32>
    %484 = vector.shape_cast %483 : vector<1x4x1xf32> to vector<4x1xf32>
    %485 = vector.extract_strided_slice %469 {offsets = [0, 253], sizes = [4, 3], strides = [1, 1]} : vector<4x256xf32> to vector<4x3xf32>
    %486 = vector.extract_strided_slice %469 {offsets = [0, 0], sizes = [4, 253], strides = [1, 1]} : vector<4x256xf32> to vector<4x253xf32>
    %487 = tpu.concatenate %485, %486 in 1 : vector<4x3xf32>, vector<4x253xf32> -> vector<4x256xf32>
    %c1_242 = arith.constant 1 : index
    %c0_243 = arith.constant 0 : index
    %c0_244 = arith.constant 0 : index
    %488 = vector.load %arg9[%c1_242, %c0_243, %c0_244] : memref<9x1x256xf32, #tpu.memory_space<vmem>>, vector<1x1x256xf32>
    %489 = vector.shape_cast %488 : vector<1x1x256xf32> to vector<1x256xf32>
    %490 = vector.broadcast %489 : vector<1x256xf32> to vector<4x256xf32>
    %491 = arith.mulf %487, %490 : vector<4x256xf32>
    %492 = vector.broadcast %484 : vector<4x1xf32> to vector<4x256xf32>
    %493 = arith.mulf %491, %492 : vector<4x256xf32>
    %494 = arith.addf %482, %493 : vector<4x256xf32>
    %c29 = arith.constant 29 : index
    %c0_245 = arith.constant 0 : index
    %c0_246 = arith.constant 0 : index
    %495 = vector.load %arg6[%c29, %c0_245, %c0_246] : memref<81x4x1xf32, #tpu.memory_space<vmem>>, vector<1x4x1xf32>
    %496 = vector.shape_cast %495 : vector<1x4x1xf32> to vector<4x1xf32>
    %497 = vector.extract_strided_slice %469 {offsets = [0, 254], sizes = [4, 2], strides = [1, 1]} : vector<4x256xf32> to vector<4x2xf32>
    %498 = vector.extract_strided_slice %469 {offsets = [0, 0], sizes = [4, 254], strides = [1, 1]} : vector<4x256xf32> to vector<4x254xf32>
    %499 = tpu.concatenate %497, %498 in 1 : vector<4x2xf32>, vector<4x254xf32> -> vector<4x256xf32>
    %c2_247 = arith.constant 2 : index
    %c0_248 = arith.constant 0 : index
    %c0_249 = arith.constant 0 : index
    %500 = vector.load %arg9[%c2_247, %c0_248, %c0_249] : memref<9x1x256xf32, #tpu.memory_space<vmem>>, vector<1x1x256xf32>
    %501 = vector.shape_cast %500 : vector<1x1x256xf32> to vector<1x256xf32>
    %502 = vector.broadcast %501 : vector<1x256xf32> to vector<4x256xf32>
    %503 = arith.mulf %499, %502 : vector<4x256xf32>
    %504 = vector.broadcast %496 : vector<4x1xf32> to vector<4x256xf32>
    %505 = arith.mulf %503, %504 : vector<4x256xf32>
    %506 = arith.addf %494, %505 : vector<4x256xf32>
    %c30 = arith.constant 30 : index
    %c0_250 = arith.constant 0 : index
    %c0_251 = arith.constant 0 : index
    %507 = vector.load %arg6[%c30, %c0_250, %c0_251] : memref<81x4x1xf32, #tpu.memory_space<vmem>>, vector<1x4x1xf32>
    %508 = vector.shape_cast %507 : vector<1x4x1xf32> to vector<4x1xf32>
    %509 = vector.extract_strided_slice %469 {offsets = [0, 255], sizes = [4, 1], strides = [1, 1]} : vector<4x256xf32> to vector<4x1xf32>
    %510 = vector.extract_strided_slice %469 {offsets = [0, 0], sizes = [4, 255], strides = [1, 1]} : vector<4x256xf32> to vector<4x255xf32>
    %511 = tpu.concatenate %509, %510 in 1 : vector<4x1xf32>, vector<4x255xf32> -> vector<4x256xf32>
    %c3_252 = arith.constant 3 : index
    %c0_253 = arith.constant 0 : index
    %c0_254 = arith.constant 0 : index
    %512 = vector.load %arg9[%c3_252, %c0_253, %c0_254] : memref<9x1x256xf32, #tpu.memory_space<vmem>>, vector<1x1x256xf32>
    %513 = vector.shape_cast %512 : vector<1x1x256xf32> to vector<1x256xf32>
    %514 = vector.broadcast %513 : vector<1x256xf32> to vector<4x256xf32>
    %515 = arith.mulf %511, %514 : vector<4x256xf32>
    %516 = vector.broadcast %508 : vector<4x1xf32> to vector<4x256xf32>
    %517 = arith.mulf %515, %516 : vector<4x256xf32>
    %518 = arith.addf %506, %517 : vector<4x256xf32>
    %c31 = arith.constant 31 : index
    %c0_255 = arith.constant 0 : index
    %c0_256 = arith.constant 0 : index
    %519 = vector.load %arg6[%c31, %c0_255, %c0_256] : memref<81x4x1xf32, #tpu.memory_space<vmem>>, vector<1x4x1xf32>
    %520 = vector.shape_cast %519 : vector<1x4x1xf32> to vector<4x1xf32>
    %c4_257 = arith.constant 4 : index
    %c0_258 = arith.constant 0 : index
    %c0_259 = arith.constant 0 : index
    %521 = vector.load %arg9[%c4_257, %c0_258, %c0_259] : memref<9x1x256xf32, #tpu.memory_space<vmem>>, vector<1x1x256xf32>
    %522 = vector.shape_cast %521 : vector<1x1x256xf32> to vector<1x256xf32>
    %523 = vector.broadcast %522 : vector<1x256xf32> to vector<4x256xf32>
    %524 = arith.mulf %469, %523 : vector<4x256xf32>
    %525 = vector.broadcast %520 : vector<4x1xf32> to vector<4x256xf32>
    %526 = arith.mulf %524, %525 : vector<4x256xf32>
    %527 = arith.addf %518, %526 : vector<4x256xf32>
    %c32_260 = arith.constant 32 : index
    %c0_261 = arith.constant 0 : index
    %c0_262 = arith.constant 0 : index
    %528 = vector.load %arg6[%c32_260, %c0_261, %c0_262] : memref<81x4x1xf32, #tpu.memory_space<vmem>>, vector<1x4x1xf32>
    %529 = vector.shape_cast %528 : vector<1x4x1xf32> to vector<4x1xf32>
    %530 = vector.extract_strided_slice %469 {offsets = [0, 1], sizes = [4, 255], strides = [1, 1]} : vector<4x256xf32> to vector<4x255xf32>
    %531 = vector.extract_strided_slice %469 {offsets = [0, 0], sizes = [4, 1], strides = [1, 1]} : vector<4x256xf32> to vector<4x1xf32>
    %532 = tpu.concatenate %530, %531 in 1 : vector<4x255xf32>, vector<4x1xf32> -> vector<4x256xf32>
    %c5_263 = arith.constant 5 : index
    %c0_264 = arith.constant 0 : index
    %c0_265 = arith.constant 0 : index
    %533 = vector.load %arg9[%c5_263, %c0_264, %c0_265] : memref<9x1x256xf32, #tpu.memory_space<vmem>>, vector<1x1x256xf32>
    %534 = vector.shape_cast %533 : vector<1x1x256xf32> to vector<1x256xf32>
    %535 = vector.broadcast %534 : vector<1x256xf32> to vector<4x256xf32>
    %536 = arith.mulf %532, %535 : vector<4x256xf32>
    %537 = vector.broadcast %529 : vector<4x1xf32> to vector<4x256xf32>
    %538 = arith.mulf %536, %537 : vector<4x256xf32>
    %539 = arith.addf %527, %538 : vector<4x256xf32>
    %c33 = arith.constant 33 : index
    %c0_266 = arith.constant 0 : index
    %c0_267 = arith.constant 0 : index
    %540 = vector.load %arg6[%c33, %c0_266, %c0_267] : memref<81x4x1xf32, #tpu.memory_space<vmem>>, vector<1x4x1xf32>
    %541 = vector.shape_cast %540 : vector<1x4x1xf32> to vector<4x1xf32>
    %542 = vector.extract_strided_slice %469 {offsets = [0, 2], sizes = [4, 254], strides = [1, 1]} : vector<4x256xf32> to vector<4x254xf32>
    %543 = vector.extract_strided_slice %469 {offsets = [0, 0], sizes = [4, 2], strides = [1, 1]} : vector<4x256xf32> to vector<4x2xf32>
    %544 = tpu.concatenate %542, %543 in 1 : vector<4x254xf32>, vector<4x2xf32> -> vector<4x256xf32>
    %c6_268 = arith.constant 6 : index
    %c0_269 = arith.constant 0 : index
    %c0_270 = arith.constant 0 : index
    %545 = vector.load %arg9[%c6_268, %c0_269, %c0_270] : memref<9x1x256xf32, #tpu.memory_space<vmem>>, vector<1x1x256xf32>
    %546 = vector.shape_cast %545 : vector<1x1x256xf32> to vector<1x256xf32>
    %547 = vector.broadcast %546 : vector<1x256xf32> to vector<4x256xf32>
    %548 = arith.mulf %544, %547 : vector<4x256xf32>
    %549 = vector.broadcast %541 : vector<4x1xf32> to vector<4x256xf32>
    %550 = arith.mulf %548, %549 : vector<4x256xf32>
    %551 = arith.addf %539, %550 : vector<4x256xf32>
    %c34 = arith.constant 34 : index
    %c0_271 = arith.constant 0 : index
    %c0_272 = arith.constant 0 : index
    %552 = vector.load %arg6[%c34, %c0_271, %c0_272] : memref<81x4x1xf32, #tpu.memory_space<vmem>>, vector<1x4x1xf32>
    %553 = vector.shape_cast %552 : vector<1x4x1xf32> to vector<4x1xf32>
    %554 = vector.extract_strided_slice %469 {offsets = [0, 3], sizes = [4, 253], strides = [1, 1]} : vector<4x256xf32> to vector<4x253xf32>
    %555 = vector.extract_strided_slice %469 {offsets = [0, 0], sizes = [4, 3], strides = [1, 1]} : vector<4x256xf32> to vector<4x3xf32>
    %556 = tpu.concatenate %554, %555 in 1 : vector<4x253xf32>, vector<4x3xf32> -> vector<4x256xf32>
    %c7_273 = arith.constant 7 : index
    %c0_274 = arith.constant 0 : index
    %c0_275 = arith.constant 0 : index
    %557 = vector.load %arg9[%c7_273, %c0_274, %c0_275] : memref<9x1x256xf32, #tpu.memory_space<vmem>>, vector<1x1x256xf32>
    %558 = vector.shape_cast %557 : vector<1x1x256xf32> to vector<1x256xf32>
    %559 = vector.broadcast %558 : vector<1x256xf32> to vector<4x256xf32>
    %560 = arith.mulf %556, %559 : vector<4x256xf32>
    %561 = vector.broadcast %553 : vector<4x1xf32> to vector<4x256xf32>
    %562 = arith.mulf %560, %561 : vector<4x256xf32>
    %563 = arith.addf %551, %562 : vector<4x256xf32>
    %c35 = arith.constant 35 : index
    %c0_276 = arith.constant 0 : index
    %c0_277 = arith.constant 0 : index
    %564 = vector.load %arg6[%c35, %c0_276, %c0_277] : memref<81x4x1xf32, #tpu.memory_space<vmem>>, vector<1x4x1xf32>
    %565 = vector.shape_cast %564 : vector<1x4x1xf32> to vector<4x1xf32>
    %566 = vector.extract_strided_slice %469 {offsets = [0, 4], sizes = [4, 252], strides = [1, 1]} : vector<4x256xf32> to vector<4x252xf32>
    %567 = vector.extract_strided_slice %469 {offsets = [0, 0], sizes = [4, 4], strides = [1, 1]} : vector<4x256xf32> to vector<4x4xf32>
    %568 = tpu.concatenate %566, %567 in 1 : vector<4x252xf32>, vector<4x4xf32> -> vector<4x256xf32>
    %c8_278 = arith.constant 8 : index
    %c0_279 = arith.constant 0 : index
    %c0_280 = arith.constant 0 : index
    %569 = vector.load %arg9[%c8_278, %c0_279, %c0_280] : memref<9x1x256xf32, #tpu.memory_space<vmem>>, vector<1x1x256xf32>
    %570 = vector.shape_cast %569 : vector<1x1x256xf32> to vector<1x256xf32>
    %571 = vector.broadcast %570 : vector<1x256xf32> to vector<4x256xf32>
    %572 = arith.mulf %568, %571 : vector<4x256xf32>
    %573 = vector.broadcast %565 : vector<4x1xf32> to vector<4x256xf32>
    %574 = arith.mulf %572, %573 : vector<4x256xf32>
    %575 = arith.addf %563, %574 : vector<4x256xf32>
    %c3_281 = arith.constant 3 : index
    %c0_282 = arith.constant 0 : index
    %c0_283 = arith.constant 0 : index
    %576 = vector.load %arg8[%c3_281, %c0_282, %c0_283] : memref<9x1x256xf32, #tpu.memory_space<vmem>>, vector<1x1x256xf32>
    %577 = vector.shape_cast %576 : vector<1x1x256xf32> to vector<1x256xf32>
    %578 = vector.broadcast %577 : vector<1x256xf32> to vector<4x256xf32>
    %579 = arith.mulf %575, %578 : vector<4x256xf32>
    %580 = arith.addf %466, %579 : vector<4x256xf32>
    %cst_284 = arith.constant 0.000000e+00 : f32
    %581 = vector.broadcast %cst_284 : f32 to vector<4x256xf32>
    %c36 = arith.constant 36 : index
    %c0_285 = arith.constant 0 : index
    %c0_286 = arith.constant 0 : index
    %582 = vector.load %arg6[%c36, %c0_285, %c0_286] : memref<81x4x1xf32, #tpu.memory_space<vmem>>, vector<1x4x1xf32>
    %583 = vector.shape_cast %582 : vector<1x4x1xf32> to vector<4x1xf32>
    %584 = vector.extract_strided_slice %123 {offsets = [0, 252], sizes = [4, 4], strides = [1, 1]} : vector<4x256xf32> to vector<4x4xf32>
    %585 = vector.extract_strided_slice %123 {offsets = [0, 0], sizes = [4, 252], strides = [1, 1]} : vector<4x256xf32> to vector<4x252xf32>
    %586 = tpu.concatenate %584, %585 in 1 : vector<4x4xf32>, vector<4x252xf32> -> vector<4x256xf32>
    %c0_287 = arith.constant 0 : index
    %c0_288 = arith.constant 0 : index
    %c0_289 = arith.constant 0 : index
    %587 = vector.load %arg9[%c0_287, %c0_288, %c0_289] : memref<9x1x256xf32, #tpu.memory_space<vmem>>, vector<1x1x256xf32>
    %588 = vector.shape_cast %587 : vector<1x1x256xf32> to vector<1x256xf32>
    %589 = vector.broadcast %588 : vector<1x256xf32> to vector<4x256xf32>
    %590 = arith.mulf %586, %589 : vector<4x256xf32>
    %591 = vector.broadcast %583 : vector<4x1xf32> to vector<4x256xf32>
    %592 = arith.mulf %590, %591 : vector<4x256xf32>
    %593 = arith.addf %581, %592 : vector<4x256xf32>
    %c37 = arith.constant 37 : index
    %c0_290 = arith.constant 0 : index
    %c0_291 = arith.constant 0 : index
    %594 = vector.load %arg6[%c37, %c0_290, %c0_291] : memref<81x4x1xf32, #tpu.memory_space<vmem>>, vector<1x4x1xf32>
    %595 = vector.shape_cast %594 : vector<1x4x1xf32> to vector<4x1xf32>
    %596 = vector.extract_strided_slice %123 {offsets = [0, 253], sizes = [4, 3], strides = [1, 1]} : vector<4x256xf32> to vector<4x3xf32>
    %597 = vector.extract_strided_slice %123 {offsets = [0, 0], sizes = [4, 253], strides = [1, 1]} : vector<4x256xf32> to vector<4x253xf32>
    %598 = tpu.concatenate %596, %597 in 1 : vector<4x3xf32>, vector<4x253xf32> -> vector<4x256xf32>
    %c1_292 = arith.constant 1 : index
    %c0_293 = arith.constant 0 : index
    %c0_294 = arith.constant 0 : index
    %599 = vector.load %arg9[%c1_292, %c0_293, %c0_294] : memref<9x1x256xf32, #tpu.memory_space<vmem>>, vector<1x1x256xf32>
    %600 = vector.shape_cast %599 : vector<1x1x256xf32> to vector<1x256xf32>
    %601 = vector.broadcast %600 : vector<1x256xf32> to vector<4x256xf32>
    %602 = arith.mulf %598, %601 : vector<4x256xf32>
    %603 = vector.broadcast %595 : vector<4x1xf32> to vector<4x256xf32>
    %604 = arith.mulf %602, %603 : vector<4x256xf32>
    %605 = arith.addf %593, %604 : vector<4x256xf32>
    %c38 = arith.constant 38 : index
    %c0_295 = arith.constant 0 : index
    %c0_296 = arith.constant 0 : index
    %606 = vector.load %arg6[%c38, %c0_295, %c0_296] : memref<81x4x1xf32, #tpu.memory_space<vmem>>, vector<1x4x1xf32>
    %607 = vector.shape_cast %606 : vector<1x4x1xf32> to vector<4x1xf32>
    %608 = vector.extract_strided_slice %123 {offsets = [0, 254], sizes = [4, 2], strides = [1, 1]} : vector<4x256xf32> to vector<4x2xf32>
    %609 = vector.extract_strided_slice %123 {offsets = [0, 0], sizes = [4, 254], strides = [1, 1]} : vector<4x256xf32> to vector<4x254xf32>
    %610 = tpu.concatenate %608, %609 in 1 : vector<4x2xf32>, vector<4x254xf32> -> vector<4x256xf32>
    %c2_297 = arith.constant 2 : index
    %c0_298 = arith.constant 0 : index
    %c0_299 = arith.constant 0 : index
    %611 = vector.load %arg9[%c2_297, %c0_298, %c0_299] : memref<9x1x256xf32, #tpu.memory_space<vmem>>, vector<1x1x256xf32>
    %612 = vector.shape_cast %611 : vector<1x1x256xf32> to vector<1x256xf32>
    %613 = vector.broadcast %612 : vector<1x256xf32> to vector<4x256xf32>
    %614 = arith.mulf %610, %613 : vector<4x256xf32>
    %615 = vector.broadcast %607 : vector<4x1xf32> to vector<4x256xf32>
    %616 = arith.mulf %614, %615 : vector<4x256xf32>
    %617 = arith.addf %605, %616 : vector<4x256xf32>
    %c39 = arith.constant 39 : index
    %c0_300 = arith.constant 0 : index
    %c0_301 = arith.constant 0 : index
    %618 = vector.load %arg6[%c39, %c0_300, %c0_301] : memref<81x4x1xf32, #tpu.memory_space<vmem>>, vector<1x4x1xf32>
    %619 = vector.shape_cast %618 : vector<1x4x1xf32> to vector<4x1xf32>
    %620 = vector.extract_strided_slice %123 {offsets = [0, 255], sizes = [4, 1], strides = [1, 1]} : vector<4x256xf32> to vector<4x1xf32>
    %621 = vector.extract_strided_slice %123 {offsets = [0, 0], sizes = [4, 255], strides = [1, 1]} : vector<4x256xf32> to vector<4x255xf32>
    %622 = tpu.concatenate %620, %621 in 1 : vector<4x1xf32>, vector<4x255xf32> -> vector<4x256xf32>
    %c3_302 = arith.constant 3 : index
    %c0_303 = arith.constant 0 : index
    %c0_304 = arith.constant 0 : index
    %623 = vector.load %arg9[%c3_302, %c0_303, %c0_304] : memref<9x1x256xf32, #tpu.memory_space<vmem>>, vector<1x1x256xf32>
    %624 = vector.shape_cast %623 : vector<1x1x256xf32> to vector<1x256xf32>
    %625 = vector.broadcast %624 : vector<1x256xf32> to vector<4x256xf32>
    %626 = arith.mulf %622, %625 : vector<4x256xf32>
    %627 = vector.broadcast %619 : vector<4x1xf32> to vector<4x256xf32>
    %628 = arith.mulf %626, %627 : vector<4x256xf32>
    %629 = arith.addf %617, %628 : vector<4x256xf32>
    %c40_305 = arith.constant 40 : index
    %c0_306 = arith.constant 0 : index
    %c0_307 = arith.constant 0 : index
    %630 = vector.load %arg6[%c40_305, %c0_306, %c0_307] : memref<81x4x1xf32, #tpu.memory_space<vmem>>, vector<1x4x1xf32>
    %631 = vector.shape_cast %630 : vector<1x4x1xf32> to vector<4x1xf32>
    %c4_308 = arith.constant 4 : index
    %c0_309 = arith.constant 0 : index
    %c0_310 = arith.constant 0 : index
    %632 = vector.load %arg9[%c4_308, %c0_309, %c0_310] : memref<9x1x256xf32, #tpu.memory_space<vmem>>, vector<1x1x256xf32>
    %633 = vector.shape_cast %632 : vector<1x1x256xf32> to vector<1x256xf32>
    %634 = vector.broadcast %633 : vector<1x256xf32> to vector<4x256xf32>
    %635 = arith.mulf %123, %634 : vector<4x256xf32>
    %636 = vector.broadcast %631 : vector<4x1xf32> to vector<4x256xf32>
    %637 = arith.mulf %635, %636 : vector<4x256xf32>
    %638 = arith.addf %629, %637 : vector<4x256xf32>
    %c41 = arith.constant 41 : index
    %c0_311 = arith.constant 0 : index
    %c0_312 = arith.constant 0 : index
    %639 = vector.load %arg6[%c41, %c0_311, %c0_312] : memref<81x4x1xf32, #tpu.memory_space<vmem>>, vector<1x4x1xf32>
    %640 = vector.shape_cast %639 : vector<1x4x1xf32> to vector<4x1xf32>
    %641 = vector.extract_strided_slice %123 {offsets = [0, 1], sizes = [4, 255], strides = [1, 1]} : vector<4x256xf32> to vector<4x255xf32>
    %642 = vector.extract_strided_slice %123 {offsets = [0, 0], sizes = [4, 1], strides = [1, 1]} : vector<4x256xf32> to vector<4x1xf32>
    %643 = tpu.concatenate %641, %642 in 1 : vector<4x255xf32>, vector<4x1xf32> -> vector<4x256xf32>
    %c5_313 = arith.constant 5 : index
    %c0_314 = arith.constant 0 : index
    %c0_315 = arith.constant 0 : index
    %644 = vector.load %arg9[%c5_313, %c0_314, %c0_315] : memref<9x1x256xf32, #tpu.memory_space<vmem>>, vector<1x1x256xf32>
    %645 = vector.shape_cast %644 : vector<1x1x256xf32> to vector<1x256xf32>
    %646 = vector.broadcast %645 : vector<1x256xf32> to vector<4x256xf32>
    %647 = arith.mulf %643, %646 : vector<4x256xf32>
    %648 = vector.broadcast %640 : vector<4x1xf32> to vector<4x256xf32>
    %649 = arith.mulf %647, %648 : vector<4x256xf32>
    %650 = arith.addf %638, %649 : vector<4x256xf32>
    %c42 = arith.constant 42 : index
    %c0_316 = arith.constant 0 : index
    %c0_317 = arith.constant 0 : index
    %651 = vector.load %arg6[%c42, %c0_316, %c0_317] : memref<81x4x1xf32, #tpu.memory_space<vmem>>, vector<1x4x1xf32>
    %652 = vector.shape_cast %651 : vector<1x4x1xf32> to vector<4x1xf32>
    %653 = vector.extract_strided_slice %123 {offsets = [0, 2], sizes = [4, 254], strides = [1, 1]} : vector<4x256xf32> to vector<4x254xf32>
    %654 = vector.extract_strided_slice %123 {offsets = [0, 0], sizes = [4, 2], strides = [1, 1]} : vector<4x256xf32> to vector<4x2xf32>
    %655 = tpu.concatenate %653, %654 in 1 : vector<4x254xf32>, vector<4x2xf32> -> vector<4x256xf32>
    %c6_318 = arith.constant 6 : index
    %c0_319 = arith.constant 0 : index
    %c0_320 = arith.constant 0 : index
    %656 = vector.load %arg9[%c6_318, %c0_319, %c0_320] : memref<9x1x256xf32, #tpu.memory_space<vmem>>, vector<1x1x256xf32>
    %657 = vector.shape_cast %656 : vector<1x1x256xf32> to vector<1x256xf32>
    %658 = vector.broadcast %657 : vector<1x256xf32> to vector<4x256xf32>
    %659 = arith.mulf %655, %658 : vector<4x256xf32>
    %660 = vector.broadcast %652 : vector<4x1xf32> to vector<4x256xf32>
    %661 = arith.mulf %659, %660 : vector<4x256xf32>
    %662 = arith.addf %650, %661 : vector<4x256xf32>
    %c43 = arith.constant 43 : index
    %c0_321 = arith.constant 0 : index
    %c0_322 = arith.constant 0 : index
    %663 = vector.load %arg6[%c43, %c0_321, %c0_322] : memref<81x4x1xf32, #tpu.memory_space<vmem>>, vector<1x4x1xf32>
    %664 = vector.shape_cast %663 : vector<1x4x1xf32> to vector<4x1xf32>
    %665 = vector.extract_strided_slice %123 {offsets = [0, 3], sizes = [4, 253], strides = [1, 1]} : vector<4x256xf32> to vector<4x253xf32>
    %666 = vector.extract_strided_slice %123 {offsets = [0, 0], sizes = [4, 3], strides = [1, 1]} : vector<4x256xf32> to vector<4x3xf32>
    %667 = tpu.concatenate %665, %666 in 1 : vector<4x253xf32>, vector<4x3xf32> -> vector<4x256xf32>
    %c7_323 = arith.constant 7 : index
    %c0_324 = arith.constant 0 : index
    %c0_325 = arith.constant 0 : index
    %668 = vector.load %arg9[%c7_323, %c0_324, %c0_325] : memref<9x1x256xf32, #tpu.memory_space<vmem>>, vector<1x1x256xf32>
    %669 = vector.shape_cast %668 : vector<1x1x256xf32> to vector<1x256xf32>
    %670 = vector.broadcast %669 : vector<1x256xf32> to vector<4x256xf32>
    %671 = arith.mulf %667, %670 : vector<4x256xf32>
    %672 = vector.broadcast %664 : vector<4x1xf32> to vector<4x256xf32>
    %673 = arith.mulf %671, %672 : vector<4x256xf32>
    %674 = arith.addf %662, %673 : vector<4x256xf32>
    %c44 = arith.constant 44 : index
    %c0_326 = arith.constant 0 : index
    %c0_327 = arith.constant 0 : index
    %675 = vector.load %arg6[%c44, %c0_326, %c0_327] : memref<81x4x1xf32, #tpu.memory_space<vmem>>, vector<1x4x1xf32>
    %676 = vector.shape_cast %675 : vector<1x4x1xf32> to vector<4x1xf32>
    %677 = vector.extract_strided_slice %123 {offsets = [0, 4], sizes = [4, 252], strides = [1, 1]} : vector<4x256xf32> to vector<4x252xf32>
    %678 = vector.extract_strided_slice %123 {offsets = [0, 0], sizes = [4, 4], strides = [1, 1]} : vector<4x256xf32> to vector<4x4xf32>
    %679 = tpu.concatenate %677, %678 in 1 : vector<4x252xf32>, vector<4x4xf32> -> vector<4x256xf32>
    %c8_328 = arith.constant 8 : index
    %c0_329 = arith.constant 0 : index
    %c0_330 = arith.constant 0 : index
    %680 = vector.load %arg9[%c8_328, %c0_329, %c0_330] : memref<9x1x256xf32, #tpu.memory_space<vmem>>, vector<1x1x256xf32>
    %681 = vector.shape_cast %680 : vector<1x1x256xf32> to vector<1x256xf32>
    %682 = vector.broadcast %681 : vector<1x256xf32> to vector<4x256xf32>
    %683 = arith.mulf %679, %682 : vector<4x256xf32>
    %684 = vector.broadcast %676 : vector<4x1xf32> to vector<4x256xf32>
    %685 = arith.mulf %683, %684 : vector<4x256xf32>
    %686 = arith.addf %674, %685 : vector<4x256xf32>
    %c4_331 = arith.constant 4 : index
    %c0_332 = arith.constant 0 : index
    %c0_333 = arith.constant 0 : index
    %687 = vector.load %arg8[%c4_331, %c0_332, %c0_333] : memref<9x1x256xf32, #tpu.memory_space<vmem>>, vector<1x1x256xf32>
    %688 = vector.shape_cast %687 : vector<1x1x256xf32> to vector<1x256xf32>
    %689 = vector.broadcast %688 : vector<1x256xf32> to vector<4x256xf32>
    %690 = arith.mulf %686, %689 : vector<4x256xf32>
    %691 = arith.addf %580, %690 : vector<4x256xf32>
    %692 = vector.extract_strided_slice %123 {offsets = [0, 16], sizes = [4, 240], strides = [1, 1]} : vector<4x256xf32> to vector<4x240xf32>
    %693 = vector.extract_strided_slice %123 {offsets = [0, 0], sizes = [4, 16], strides = [1, 1]} : vector<4x256xf32> to vector<4x16xf32>
    %694 = tpu.concatenate %692, %693 in 1 : vector<4x240xf32>, vector<4x16xf32> -> vector<4x256xf32>
    %cst_334 = arith.constant 0.000000e+00 : f32
    %695 = vector.broadcast %cst_334 : f32 to vector<4x256xf32>
    %c45 = arith.constant 45 : index
    %c0_335 = arith.constant 0 : index
    %c0_336 = arith.constant 0 : index
    %696 = vector.load %arg6[%c45, %c0_335, %c0_336] : memref<81x4x1xf32, #tpu.memory_space<vmem>>, vector<1x4x1xf32>
    %697 = vector.shape_cast %696 : vector<1x4x1xf32> to vector<4x1xf32>
    %698 = vector.extract_strided_slice %694 {offsets = [0, 252], sizes = [4, 4], strides = [1, 1]} : vector<4x256xf32> to vector<4x4xf32>
    %699 = vector.extract_strided_slice %694 {offsets = [0, 0], sizes = [4, 252], strides = [1, 1]} : vector<4x256xf32> to vector<4x252xf32>
    %700 = tpu.concatenate %698, %699 in 1 : vector<4x4xf32>, vector<4x252xf32> -> vector<4x256xf32>
    %c0_337 = arith.constant 0 : index
    %c0_338 = arith.constant 0 : index
    %c0_339 = arith.constant 0 : index
    %701 = vector.load %arg9[%c0_337, %c0_338, %c0_339] : memref<9x1x256xf32, #tpu.memory_space<vmem>>, vector<1x1x256xf32>
    %702 = vector.shape_cast %701 : vector<1x1x256xf32> to vector<1x256xf32>
    %703 = vector.broadcast %702 : vector<1x256xf32> to vector<4x256xf32>
    %704 = arith.mulf %700, %703 : vector<4x256xf32>
    %705 = vector.broadcast %697 : vector<4x1xf32> to vector<4x256xf32>
    %706 = arith.mulf %704, %705 : vector<4x256xf32>
    %707 = arith.addf %695, %706 : vector<4x256xf32>
    %c46 = arith.constant 46 : index
    %c0_340 = arith.constant 0 : index
    %c0_341 = arith.constant 0 : index
    %708 = vector.load %arg6[%c46, %c0_340, %c0_341] : memref<81x4x1xf32, #tpu.memory_space<vmem>>, vector<1x4x1xf32>
    %709 = vector.shape_cast %708 : vector<1x4x1xf32> to vector<4x1xf32>
    %710 = vector.extract_strided_slice %694 {offsets = [0, 253], sizes = [4, 3], strides = [1, 1]} : vector<4x256xf32> to vector<4x3xf32>
    %711 = vector.extract_strided_slice %694 {offsets = [0, 0], sizes = [4, 253], strides = [1, 1]} : vector<4x256xf32> to vector<4x253xf32>
    %712 = tpu.concatenate %710, %711 in 1 : vector<4x3xf32>, vector<4x253xf32> -> vector<4x256xf32>
    %c1_342 = arith.constant 1 : index
    %c0_343 = arith.constant 0 : index
    %c0_344 = arith.constant 0 : index
    %713 = vector.load %arg9[%c1_342, %c0_343, %c0_344] : memref<9x1x256xf32, #tpu.memory_space<vmem>>, vector<1x1x256xf32>
    %714 = vector.shape_cast %713 : vector<1x1x256xf32> to vector<1x256xf32>
    %715 = vector.broadcast %714 : vector<1x256xf32> to vector<4x256xf32>
    %716 = arith.mulf %712, %715 : vector<4x256xf32>
    %717 = vector.broadcast %709 : vector<4x1xf32> to vector<4x256xf32>
    %718 = arith.mulf %716, %717 : vector<4x256xf32>
    %719 = arith.addf %707, %718 : vector<4x256xf32>
    %c47 = arith.constant 47 : index
    %c0_345 = arith.constant 0 : index
    %c0_346 = arith.constant 0 : index
    %720 = vector.load %arg6[%c47, %c0_345, %c0_346] : memref<81x4x1xf32, #tpu.memory_space<vmem>>, vector<1x4x1xf32>
    %721 = vector.shape_cast %720 : vector<1x4x1xf32> to vector<4x1xf32>
    %722 = vector.extract_strided_slice %694 {offsets = [0, 254], sizes = [4, 2], strides = [1, 1]} : vector<4x256xf32> to vector<4x2xf32>
    %723 = vector.extract_strided_slice %694 {offsets = [0, 0], sizes = [4, 254], strides = [1, 1]} : vector<4x256xf32> to vector<4x254xf32>
    %724 = tpu.concatenate %722, %723 in 1 : vector<4x2xf32>, vector<4x254xf32> -> vector<4x256xf32>
    %c2_347 = arith.constant 2 : index
    %c0_348 = arith.constant 0 : index
    %c0_349 = arith.constant 0 : index
    %725 = vector.load %arg9[%c2_347, %c0_348, %c0_349] : memref<9x1x256xf32, #tpu.memory_space<vmem>>, vector<1x1x256xf32>
    %726 = vector.shape_cast %725 : vector<1x1x256xf32> to vector<1x256xf32>
    %727 = vector.broadcast %726 : vector<1x256xf32> to vector<4x256xf32>
    %728 = arith.mulf %724, %727 : vector<4x256xf32>
    %729 = vector.broadcast %721 : vector<4x1xf32> to vector<4x256xf32>
    %730 = arith.mulf %728, %729 : vector<4x256xf32>
    %731 = arith.addf %719, %730 : vector<4x256xf32>
    %c48_350 = arith.constant 48 : index
    %c0_351 = arith.constant 0 : index
    %c0_352 = arith.constant 0 : index
    %732 = vector.load %arg6[%c48_350, %c0_351, %c0_352] : memref<81x4x1xf32, #tpu.memory_space<vmem>>, vector<1x4x1xf32>
    %733 = vector.shape_cast %732 : vector<1x4x1xf32> to vector<4x1xf32>
    %734 = vector.extract_strided_slice %694 {offsets = [0, 255], sizes = [4, 1], strides = [1, 1]} : vector<4x256xf32> to vector<4x1xf32>
    %735 = vector.extract_strided_slice %694 {offsets = [0, 0], sizes = [4, 255], strides = [1, 1]} : vector<4x256xf32> to vector<4x255xf32>
    %736 = tpu.concatenate %734, %735 in 1 : vector<4x1xf32>, vector<4x255xf32> -> vector<4x256xf32>
    %c3_353 = arith.constant 3 : index
    %c0_354 = arith.constant 0 : index
    %c0_355 = arith.constant 0 : index
    %737 = vector.load %arg9[%c3_353, %c0_354, %c0_355] : memref<9x1x256xf32, #tpu.memory_space<vmem>>, vector<1x1x256xf32>
    %738 = vector.shape_cast %737 : vector<1x1x256xf32> to vector<1x256xf32>
    %739 = vector.broadcast %738 : vector<1x256xf32> to vector<4x256xf32>
    %740 = arith.mulf %736, %739 : vector<4x256xf32>
    %741 = vector.broadcast %733 : vector<4x1xf32> to vector<4x256xf32>
    %742 = arith.mulf %740, %741 : vector<4x256xf32>
    %743 = arith.addf %731, %742 : vector<4x256xf32>
    %c49 = arith.constant 49 : index
    %c0_356 = arith.constant 0 : index
    %c0_357 = arith.constant 0 : index
    %744 = vector.load %arg6[%c49, %c0_356, %c0_357] : memref<81x4x1xf32, #tpu.memory_space<vmem>>, vector<1x4x1xf32>
    %745 = vector.shape_cast %744 : vector<1x4x1xf32> to vector<4x1xf32>
    %c4_358 = arith.constant 4 : index
    %c0_359 = arith.constant 0 : index
    %c0_360 = arith.constant 0 : index
    %746 = vector.load %arg9[%c4_358, %c0_359, %c0_360] : memref<9x1x256xf32, #tpu.memory_space<vmem>>, vector<1x1x256xf32>
    %747 = vector.shape_cast %746 : vector<1x1x256xf32> to vector<1x256xf32>
    %748 = vector.broadcast %747 : vector<1x256xf32> to vector<4x256xf32>
    %749 = arith.mulf %694, %748 : vector<4x256xf32>
    %750 = vector.broadcast %745 : vector<4x1xf32> to vector<4x256xf32>
    %751 = arith.mulf %749, %750 : vector<4x256xf32>
    %752 = arith.addf %743, %751 : vector<4x256xf32>
    %c50 = arith.constant 50 : index
    %c0_361 = arith.constant 0 : index
    %c0_362 = arith.constant 0 : index
    %753 = vector.load %arg6[%c50, %c0_361, %c0_362] : memref<81x4x1xf32, #tpu.memory_space<vmem>>, vector<1x4x1xf32>
    %754 = vector.shape_cast %753 : vector<1x4x1xf32> to vector<4x1xf32>
    %755 = vector.extract_strided_slice %694 {offsets = [0, 1], sizes = [4, 255], strides = [1, 1]} : vector<4x256xf32> to vector<4x255xf32>
    %756 = vector.extract_strided_slice %694 {offsets = [0, 0], sizes = [4, 1], strides = [1, 1]} : vector<4x256xf32> to vector<4x1xf32>
    %757 = tpu.concatenate %755, %756 in 1 : vector<4x255xf32>, vector<4x1xf32> -> vector<4x256xf32>
    %c5_363 = arith.constant 5 : index
    %c0_364 = arith.constant 0 : index
    %c0_365 = arith.constant 0 : index
    %758 = vector.load %arg9[%c5_363, %c0_364, %c0_365] : memref<9x1x256xf32, #tpu.memory_space<vmem>>, vector<1x1x256xf32>
    %759 = vector.shape_cast %758 : vector<1x1x256xf32> to vector<1x256xf32>
    %760 = vector.broadcast %759 : vector<1x256xf32> to vector<4x256xf32>
    %761 = arith.mulf %757, %760 : vector<4x256xf32>
    %762 = vector.broadcast %754 : vector<4x1xf32> to vector<4x256xf32>
    %763 = arith.mulf %761, %762 : vector<4x256xf32>
    %764 = arith.addf %752, %763 : vector<4x256xf32>
    %c51 = arith.constant 51 : index
    %c0_366 = arith.constant 0 : index
    %c0_367 = arith.constant 0 : index
    %765 = vector.load %arg6[%c51, %c0_366, %c0_367] : memref<81x4x1xf32, #tpu.memory_space<vmem>>, vector<1x4x1xf32>
    %766 = vector.shape_cast %765 : vector<1x4x1xf32> to vector<4x1xf32>
    %767 = vector.extract_strided_slice %694 {offsets = [0, 2], sizes = [4, 254], strides = [1, 1]} : vector<4x256xf32> to vector<4x254xf32>
    %768 = vector.extract_strided_slice %694 {offsets = [0, 0], sizes = [4, 2], strides = [1, 1]} : vector<4x256xf32> to vector<4x2xf32>
    %769 = tpu.concatenate %767, %768 in 1 : vector<4x254xf32>, vector<4x2xf32> -> vector<4x256xf32>
    %c6_368 = arith.constant 6 : index
    %c0_369 = arith.constant 0 : index
    %c0_370 = arith.constant 0 : index
    %770 = vector.load %arg9[%c6_368, %c0_369, %c0_370] : memref<9x1x256xf32, #tpu.memory_space<vmem>>, vector<1x1x256xf32>
    %771 = vector.shape_cast %770 : vector<1x1x256xf32> to vector<1x256xf32>
    %772 = vector.broadcast %771 : vector<1x256xf32> to vector<4x256xf32>
    %773 = arith.mulf %769, %772 : vector<4x256xf32>
    %774 = vector.broadcast %766 : vector<4x1xf32> to vector<4x256xf32>
    %775 = arith.mulf %773, %774 : vector<4x256xf32>
    %776 = arith.addf %764, %775 : vector<4x256xf32>
    %c52 = arith.constant 52 : index
    %c0_371 = arith.constant 0 : index
    %c0_372 = arith.constant 0 : index
    %777 = vector.load %arg6[%c52, %c0_371, %c0_372] : memref<81x4x1xf32, #tpu.memory_space<vmem>>, vector<1x4x1xf32>
    %778 = vector.shape_cast %777 : vector<1x4x1xf32> to vector<4x1xf32>
    %779 = vector.extract_strided_slice %694 {offsets = [0, 3], sizes = [4, 253], strides = [1, 1]} : vector<4x256xf32> to vector<4x253xf32>
    %780 = vector.extract_strided_slice %694 {offsets = [0, 0], sizes = [4, 3], strides = [1, 1]} : vector<4x256xf32> to vector<4x3xf32>
    %781 = tpu.concatenate %779, %780 in 1 : vector<4x253xf32>, vector<4x3xf32> -> vector<4x256xf32>
    %c7_373 = arith.constant 7 : index
    %c0_374 = arith.constant 0 : index
    %c0_375 = arith.constant 0 : index
    %782 = vector.load %arg9[%c7_373, %c0_374, %c0_375] : memref<9x1x256xf32, #tpu.memory_space<vmem>>, vector<1x1x256xf32>
    %783 = vector.shape_cast %782 : vector<1x1x256xf32> to vector<1x256xf32>
    %784 = vector.broadcast %783 : vector<1x256xf32> to vector<4x256xf32>
    %785 = arith.mulf %781, %784 : vector<4x256xf32>
    %786 = vector.broadcast %778 : vector<4x1xf32> to vector<4x256xf32>
    %787 = arith.mulf %785, %786 : vector<4x256xf32>
    %788 = arith.addf %776, %787 : vector<4x256xf32>
    %c53 = arith.constant 53 : index
    %c0_376 = arith.constant 0 : index
    %c0_377 = arith.constant 0 : index
    %789 = vector.load %arg6[%c53, %c0_376, %c0_377] : memref<81x4x1xf32, #tpu.memory_space<vmem>>, vector<1x4x1xf32>
    %790 = vector.shape_cast %789 : vector<1x4x1xf32> to vector<4x1xf32>
    %791 = vector.extract_strided_slice %694 {offsets = [0, 4], sizes = [4, 252], strides = [1, 1]} : vector<4x256xf32> to vector<4x252xf32>
    %792 = vector.extract_strided_slice %694 {offsets = [0, 0], sizes = [4, 4], strides = [1, 1]} : vector<4x256xf32> to vector<4x4xf32>
    %793 = tpu.concatenate %791, %792 in 1 : vector<4x252xf32>, vector<4x4xf32> -> vector<4x256xf32>
    %c8_378 = arith.constant 8 : index
    %c0_379 = arith.constant 0 : index
    %c0_380 = arith.constant 0 : index
    %794 = vector.load %arg9[%c8_378, %c0_379, %c0_380] : memref<9x1x256xf32, #tpu.memory_space<vmem>>, vector<1x1x256xf32>
    %795 = vector.shape_cast %794 : vector<1x1x256xf32> to vector<1x256xf32>
    %796 = vector.broadcast %795 : vector<1x256xf32> to vector<4x256xf32>
    %797 = arith.mulf %793, %796 : vector<4x256xf32>
    %798 = vector.broadcast %790 : vector<4x1xf32> to vector<4x256xf32>
    %799 = arith.mulf %797, %798 : vector<4x256xf32>
    %800 = arith.addf %788, %799 : vector<4x256xf32>
    %c5_381 = arith.constant 5 : index
    %c0_382 = arith.constant 0 : index
    %c0_383 = arith.constant 0 : index
    %801 = vector.load %arg8[%c5_381, %c0_382, %c0_383] : memref<9x1x256xf32, #tpu.memory_space<vmem>>, vector<1x1x256xf32>
    %802 = vector.shape_cast %801 : vector<1x1x256xf32> to vector<1x256xf32>
    %803 = vector.broadcast %802 : vector<1x256xf32> to vector<4x256xf32>
    %804 = arith.mulf %800, %803 : vector<4x256xf32>
    %805 = arith.addf %691, %804 : vector<4x256xf32>
    %806 = vector.extract_strided_slice %123 {offsets = [0, 32], sizes = [4, 224], strides = [1, 1]} : vector<4x256xf32> to vector<4x224xf32>
    %807 = vector.extract_strided_slice %123 {offsets = [0, 0], sizes = [4, 32], strides = [1, 1]} : vector<4x256xf32> to vector<4x32xf32>
    %808 = tpu.concatenate %806, %807 in 1 : vector<4x224xf32>, vector<4x32xf32> -> vector<4x256xf32>
    %cst_384 = arith.constant 0.000000e+00 : f32
    %809 = vector.broadcast %cst_384 : f32 to vector<4x256xf32>
    %c54 = arith.constant 54 : index
    %c0_385 = arith.constant 0 : index
    %c0_386 = arith.constant 0 : index
    %810 = vector.load %arg6[%c54, %c0_385, %c0_386] : memref<81x4x1xf32, #tpu.memory_space<vmem>>, vector<1x4x1xf32>
    %811 = vector.shape_cast %810 : vector<1x4x1xf32> to vector<4x1xf32>
    %812 = vector.extract_strided_slice %808 {offsets = [0, 252], sizes = [4, 4], strides = [1, 1]} : vector<4x256xf32> to vector<4x4xf32>
    %813 = vector.extract_strided_slice %808 {offsets = [0, 0], sizes = [4, 252], strides = [1, 1]} : vector<4x256xf32> to vector<4x252xf32>
    %814 = tpu.concatenate %812, %813 in 1 : vector<4x4xf32>, vector<4x252xf32> -> vector<4x256xf32>
    %c0_387 = arith.constant 0 : index
    %c0_388 = arith.constant 0 : index
    %c0_389 = arith.constant 0 : index
    %815 = vector.load %arg9[%c0_387, %c0_388, %c0_389] : memref<9x1x256xf32, #tpu.memory_space<vmem>>, vector<1x1x256xf32>
    %816 = vector.shape_cast %815 : vector<1x1x256xf32> to vector<1x256xf32>
    %817 = vector.broadcast %816 : vector<1x256xf32> to vector<4x256xf32>
    %818 = arith.mulf %814, %817 : vector<4x256xf32>
    %819 = vector.broadcast %811 : vector<4x1xf32> to vector<4x256xf32>
    %820 = arith.mulf %818, %819 : vector<4x256xf32>
    %821 = arith.addf %809, %820 : vector<4x256xf32>
    %c55 = arith.constant 55 : index
    %c0_390 = arith.constant 0 : index
    %c0_391 = arith.constant 0 : index
    %822 = vector.load %arg6[%c55, %c0_390, %c0_391] : memref<81x4x1xf32, #tpu.memory_space<vmem>>, vector<1x4x1xf32>
    %823 = vector.shape_cast %822 : vector<1x4x1xf32> to vector<4x1xf32>
    %824 = vector.extract_strided_slice %808 {offsets = [0, 253], sizes = [4, 3], strides = [1, 1]} : vector<4x256xf32> to vector<4x3xf32>
    %825 = vector.extract_strided_slice %808 {offsets = [0, 0], sizes = [4, 253], strides = [1, 1]} : vector<4x256xf32> to vector<4x253xf32>
    %826 = tpu.concatenate %824, %825 in 1 : vector<4x3xf32>, vector<4x253xf32> -> vector<4x256xf32>
    %c1_392 = arith.constant 1 : index
    %c0_393 = arith.constant 0 : index
    %c0_394 = arith.constant 0 : index
    %827 = vector.load %arg9[%c1_392, %c0_393, %c0_394] : memref<9x1x256xf32, #tpu.memory_space<vmem>>, vector<1x1x256xf32>
    %828 = vector.shape_cast %827 : vector<1x1x256xf32> to vector<1x256xf32>
    %829 = vector.broadcast %828 : vector<1x256xf32> to vector<4x256xf32>
    %830 = arith.mulf %826, %829 : vector<4x256xf32>
    %831 = vector.broadcast %823 : vector<4x1xf32> to vector<4x256xf32>
    %832 = arith.mulf %830, %831 : vector<4x256xf32>
    %833 = arith.addf %821, %832 : vector<4x256xf32>
    %c56_395 = arith.constant 56 : index
    %c0_396 = arith.constant 0 : index
    %c0_397 = arith.constant 0 : index
    %834 = vector.load %arg6[%c56_395, %c0_396, %c0_397] : memref<81x4x1xf32, #tpu.memory_space<vmem>>, vector<1x4x1xf32>
    %835 = vector.shape_cast %834 : vector<1x4x1xf32> to vector<4x1xf32>
    %836 = vector.extract_strided_slice %808 {offsets = [0, 254], sizes = [4, 2], strides = [1, 1]} : vector<4x256xf32> to vector<4x2xf32>
    %837 = vector.extract_strided_slice %808 {offsets = [0, 0], sizes = [4, 254], strides = [1, 1]} : vector<4x256xf32> to vector<4x254xf32>
    %838 = tpu.concatenate %836, %837 in 1 : vector<4x2xf32>, vector<4x254xf32> -> vector<4x256xf32>
    %c2_398 = arith.constant 2 : index
    %c0_399 = arith.constant 0 : index
    %c0_400 = arith.constant 0 : index
    %839 = vector.load %arg9[%c2_398, %c0_399, %c0_400] : memref<9x1x256xf32, #tpu.memory_space<vmem>>, vector<1x1x256xf32>
    %840 = vector.shape_cast %839 : vector<1x1x256xf32> to vector<1x256xf32>
    %841 = vector.broadcast %840 : vector<1x256xf32> to vector<4x256xf32>
    %842 = arith.mulf %838, %841 : vector<4x256xf32>
    %843 = vector.broadcast %835 : vector<4x1xf32> to vector<4x256xf32>
    %844 = arith.mulf %842, %843 : vector<4x256xf32>
    %845 = arith.addf %833, %844 : vector<4x256xf32>
    %c57 = arith.constant 57 : index
    %c0_401 = arith.constant 0 : index
    %c0_402 = arith.constant 0 : index
    %846 = vector.load %arg6[%c57, %c0_401, %c0_402] : memref<81x4x1xf32, #tpu.memory_space<vmem>>, vector<1x4x1xf32>
    %847 = vector.shape_cast %846 : vector<1x4x1xf32> to vector<4x1xf32>
    %848 = vector.extract_strided_slice %808 {offsets = [0, 255], sizes = [4, 1], strides = [1, 1]} : vector<4x256xf32> to vector<4x1xf32>
    %849 = vector.extract_strided_slice %808 {offsets = [0, 0], sizes = [4, 255], strides = [1, 1]} : vector<4x256xf32> to vector<4x255xf32>
    %850 = tpu.concatenate %848, %849 in 1 : vector<4x1xf32>, vector<4x255xf32> -> vector<4x256xf32>
    %c3_403 = arith.constant 3 : index
    %c0_404 = arith.constant 0 : index
    %c0_405 = arith.constant 0 : index
    %851 = vector.load %arg9[%c3_403, %c0_404, %c0_405] : memref<9x1x256xf32, #tpu.memory_space<vmem>>, vector<1x1x256xf32>
    %852 = vector.shape_cast %851 : vector<1x1x256xf32> to vector<1x256xf32>
    %853 = vector.broadcast %852 : vector<1x256xf32> to vector<4x256xf32>
    %854 = arith.mulf %850, %853 : vector<4x256xf32>
    %855 = vector.broadcast %847 : vector<4x1xf32> to vector<4x256xf32>
    %856 = arith.mulf %854, %855 : vector<4x256xf32>
    %857 = arith.addf %845, %856 : vector<4x256xf32>
    %c58 = arith.constant 58 : index
    %c0_406 = arith.constant 0 : index
    %c0_407 = arith.constant 0 : index
    %858 = vector.load %arg6[%c58, %c0_406, %c0_407] : memref<81x4x1xf32, #tpu.memory_space<vmem>>, vector<1x4x1xf32>
    %859 = vector.shape_cast %858 : vector<1x4x1xf32> to vector<4x1xf32>
    %c4_408 = arith.constant 4 : index
    %c0_409 = arith.constant 0 : index
    %c0_410 = arith.constant 0 : index
    %860 = vector.load %arg9[%c4_408, %c0_409, %c0_410] : memref<9x1x256xf32, #tpu.memory_space<vmem>>, vector<1x1x256xf32>
    %861 = vector.shape_cast %860 : vector<1x1x256xf32> to vector<1x256xf32>
    %862 = vector.broadcast %861 : vector<1x256xf32> to vector<4x256xf32>
    %863 = arith.mulf %808, %862 : vector<4x256xf32>
    %864 = vector.broadcast %859 : vector<4x1xf32> to vector<4x256xf32>
    %865 = arith.mulf %863, %864 : vector<4x256xf32>
    %866 = arith.addf %857, %865 : vector<4x256xf32>
    %c59 = arith.constant 59 : index
    %c0_411 = arith.constant 0 : index
    %c0_412 = arith.constant 0 : index
    %867 = vector.load %arg6[%c59, %c0_411, %c0_412] : memref<81x4x1xf32, #tpu.memory_space<vmem>>, vector<1x4x1xf32>
    %868 = vector.shape_cast %867 : vector<1x4x1xf32> to vector<4x1xf32>
    %869 = vector.extract_strided_slice %808 {offsets = [0, 1], sizes = [4, 255], strides = [1, 1]} : vector<4x256xf32> to vector<4x255xf32>
    %870 = vector.extract_strided_slice %808 {offsets = [0, 0], sizes = [4, 1], strides = [1, 1]} : vector<4x256xf32> to vector<4x1xf32>
    %871 = tpu.concatenate %869, %870 in 1 : vector<4x255xf32>, vector<4x1xf32> -> vector<4x256xf32>
    %c5_413 = arith.constant 5 : index
    %c0_414 = arith.constant 0 : index
    %c0_415 = arith.constant 0 : index
    %872 = vector.load %arg9[%c5_413, %c0_414, %c0_415] : memref<9x1x256xf32, #tpu.memory_space<vmem>>, vector<1x1x256xf32>
    %873 = vector.shape_cast %872 : vector<1x1x256xf32> to vector<1x256xf32>
    %874 = vector.broadcast %873 : vector<1x256xf32> to vector<4x256xf32>
    %875 = arith.mulf %871, %874 : vector<4x256xf32>
    %876 = vector.broadcast %868 : vector<4x1xf32> to vector<4x256xf32>
    %877 = arith.mulf %875, %876 : vector<4x256xf32>
    %878 = arith.addf %866, %877 : vector<4x256xf32>
    %c60 = arith.constant 60 : index
    %c0_416 = arith.constant 0 : index
    %c0_417 = arith.constant 0 : index
    %879 = vector.load %arg6[%c60, %c0_416, %c0_417] : memref<81x4x1xf32, #tpu.memory_space<vmem>>, vector<1x4x1xf32>
    %880 = vector.shape_cast %879 : vector<1x4x1xf32> to vector<4x1xf32>
    %881 = vector.extract_strided_slice %808 {offsets = [0, 2], sizes = [4, 254], strides = [1, 1]} : vector<4x256xf32> to vector<4x254xf32>
    %882 = vector.extract_strided_slice %808 {offsets = [0, 0], sizes = [4, 2], strides = [1, 1]} : vector<4x256xf32> to vector<4x2xf32>
    %883 = tpu.concatenate %881, %882 in 1 : vector<4x254xf32>, vector<4x2xf32> -> vector<4x256xf32>
    %c6_418 = arith.constant 6 : index
    %c0_419 = arith.constant 0 : index
    %c0_420 = arith.constant 0 : index
    %884 = vector.load %arg9[%c6_418, %c0_419, %c0_420] : memref<9x1x256xf32, #tpu.memory_space<vmem>>, vector<1x1x256xf32>
    %885 = vector.shape_cast %884 : vector<1x1x256xf32> to vector<1x256xf32>
    %886 = vector.broadcast %885 : vector<1x256xf32> to vector<4x256xf32>
    %887 = arith.mulf %883, %886 : vector<4x256xf32>
    %888 = vector.broadcast %880 : vector<4x1xf32> to vector<4x256xf32>
    %889 = arith.mulf %887, %888 : vector<4x256xf32>
    %890 = arith.addf %878, %889 : vector<4x256xf32>
    %c61 = arith.constant 61 : index
    %c0_421 = arith.constant 0 : index
    %c0_422 = arith.constant 0 : index
    %891 = vector.load %arg6[%c61, %c0_421, %c0_422] : memref<81x4x1xf32, #tpu.memory_space<vmem>>, vector<1x4x1xf32>
    %892 = vector.shape_cast %891 : vector<1x4x1xf32> to vector<4x1xf32>
    %893 = vector.extract_strided_slice %808 {offsets = [0, 3], sizes = [4, 253], strides = [1, 1]} : vector<4x256xf32> to vector<4x253xf32>
    %894 = vector.extract_strided_slice %808 {offsets = [0, 0], sizes = [4, 3], strides = [1, 1]} : vector<4x256xf32> to vector<4x3xf32>
    %895 = tpu.concatenate %893, %894 in 1 : vector<4x253xf32>, vector<4x3xf32> -> vector<4x256xf32>
    %c7_423 = arith.constant 7 : index
    %c0_424 = arith.constant 0 : index
    %c0_425 = arith.constant 0 : index
    %896 = vector.load %arg9[%c7_423, %c0_424, %c0_425] : memref<9x1x256xf32, #tpu.memory_space<vmem>>, vector<1x1x256xf32>
    %897 = vector.shape_cast %896 : vector<1x1x256xf32> to vector<1x256xf32>
    %898 = vector.broadcast %897 : vector<1x256xf32> to vector<4x256xf32>
    %899 = arith.mulf %895, %898 : vector<4x256xf32>
    %900 = vector.broadcast %892 : vector<4x1xf32> to vector<4x256xf32>
    %901 = arith.mulf %899, %900 : vector<4x256xf32>
    %902 = arith.addf %890, %901 : vector<4x256xf32>
    %c62 = arith.constant 62 : index
    %c0_426 = arith.constant 0 : index
    %c0_427 = arith.constant 0 : index
    %903 = vector.load %arg6[%c62, %c0_426, %c0_427] : memref<81x4x1xf32, #tpu.memory_space<vmem>>, vector<1x4x1xf32>
    %904 = vector.shape_cast %903 : vector<1x4x1xf32> to vector<4x1xf32>
    %905 = vector.extract_strided_slice %808 {offsets = [0, 4], sizes = [4, 252], strides = [1, 1]} : vector<4x256xf32> to vector<4x252xf32>
    %906 = vector.extract_strided_slice %808 {offsets = [0, 0], sizes = [4, 4], strides = [1, 1]} : vector<4x256xf32> to vector<4x4xf32>
    %907 = tpu.concatenate %905, %906 in 1 : vector<4x252xf32>, vector<4x4xf32> -> vector<4x256xf32>
    %c8_428 = arith.constant 8 : index
    %c0_429 = arith.constant 0 : index
    %c0_430 = arith.constant 0 : index
    %908 = vector.load %arg9[%c8_428, %c0_429, %c0_430] : memref<9x1x256xf32, #tpu.memory_space<vmem>>, vector<1x1x256xf32>
    %909 = vector.shape_cast %908 : vector<1x1x256xf32> to vector<1x256xf32>
    %910 = vector.broadcast %909 : vector<1x256xf32> to vector<4x256xf32>
    %911 = arith.mulf %907, %910 : vector<4x256xf32>
    %912 = vector.broadcast %904 : vector<4x1xf32> to vector<4x256xf32>
    %913 = arith.mulf %911, %912 : vector<4x256xf32>
    %914 = arith.addf %902, %913 : vector<4x256xf32>
    %c6_431 = arith.constant 6 : index
    %c0_432 = arith.constant 0 : index
    %c0_433 = arith.constant 0 : index
    %915 = vector.load %arg8[%c6_431, %c0_432, %c0_433] : memref<9x1x256xf32, #tpu.memory_space<vmem>>, vector<1x1x256xf32>
    %916 = vector.shape_cast %915 : vector<1x1x256xf32> to vector<1x256xf32>
    %917 = vector.broadcast %916 : vector<1x256xf32> to vector<4x256xf32>
    %918 = arith.mulf %914, %917 : vector<4x256xf32>
    %919 = arith.addf %805, %918 : vector<4x256xf32>
    %920 = vector.extract_strided_slice %123 {offsets = [0, 48], sizes = [4, 208], strides = [1, 1]} : vector<4x256xf32> to vector<4x208xf32>
    %921 = vector.extract_strided_slice %123 {offsets = [0, 0], sizes = [4, 48], strides = [1, 1]} : vector<4x256xf32> to vector<4x48xf32>
    %922 = tpu.concatenate %920, %921 in 1 : vector<4x208xf32>, vector<4x48xf32> -> vector<4x256xf32>
    %cst_434 = arith.constant 0.000000e+00 : f32
    %923 = vector.broadcast %cst_434 : f32 to vector<4x256xf32>
    %c63 = arith.constant 63 : index
    %c0_435 = arith.constant 0 : index
    %c0_436 = arith.constant 0 : index
    %924 = vector.load %arg6[%c63, %c0_435, %c0_436] : memref<81x4x1xf32, #tpu.memory_space<vmem>>, vector<1x4x1xf32>
    %925 = vector.shape_cast %924 : vector<1x4x1xf32> to vector<4x1xf32>
    %926 = vector.extract_strided_slice %922 {offsets = [0, 252], sizes = [4, 4], strides = [1, 1]} : vector<4x256xf32> to vector<4x4xf32>
    %927 = vector.extract_strided_slice %922 {offsets = [0, 0], sizes = [4, 252], strides = [1, 1]} : vector<4x256xf32> to vector<4x252xf32>
    %928 = tpu.concatenate %926, %927 in 1 : vector<4x4xf32>, vector<4x252xf32> -> vector<4x256xf32>
    %c0_437 = arith.constant 0 : index
    %c0_438 = arith.constant 0 : index
    %c0_439 = arith.constant 0 : index
    %929 = vector.load %arg9[%c0_437, %c0_438, %c0_439] : memref<9x1x256xf32, #tpu.memory_space<vmem>>, vector<1x1x256xf32>
    %930 = vector.shape_cast %929 : vector<1x1x256xf32> to vector<1x256xf32>
    %931 = vector.broadcast %930 : vector<1x256xf32> to vector<4x256xf32>
    %932 = arith.mulf %928, %931 : vector<4x256xf32>
    %933 = vector.broadcast %925 : vector<4x1xf32> to vector<4x256xf32>
    %934 = arith.mulf %932, %933 : vector<4x256xf32>
    %935 = arith.addf %923, %934 : vector<4x256xf32>
    %c64_440 = arith.constant 64 : index
    %c0_441 = arith.constant 0 : index
    %c0_442 = arith.constant 0 : index
    %936 = vector.load %arg6[%c64_440, %c0_441, %c0_442] : memref<81x4x1xf32, #tpu.memory_space<vmem>>, vector<1x4x1xf32>
    %937 = vector.shape_cast %936 : vector<1x4x1xf32> to vector<4x1xf32>
    %938 = vector.extract_strided_slice %922 {offsets = [0, 253], sizes = [4, 3], strides = [1, 1]} : vector<4x256xf32> to vector<4x3xf32>
    %939 = vector.extract_strided_slice %922 {offsets = [0, 0], sizes = [4, 253], strides = [1, 1]} : vector<4x256xf32> to vector<4x253xf32>
    %940 = tpu.concatenate %938, %939 in 1 : vector<4x3xf32>, vector<4x253xf32> -> vector<4x256xf32>
    %c1_443 = arith.constant 1 : index
    %c0_444 = arith.constant 0 : index
    %c0_445 = arith.constant 0 : index
    %941 = vector.load %arg9[%c1_443, %c0_444, %c0_445] : memref<9x1x256xf32, #tpu.memory_space<vmem>>, vector<1x1x256xf32>
    %942 = vector.shape_cast %941 : vector<1x1x256xf32> to vector<1x256xf32>
    %943 = vector.broadcast %942 : vector<1x256xf32> to vector<4x256xf32>
    %944 = arith.mulf %940, %943 : vector<4x256xf32>
    %945 = vector.broadcast %937 : vector<4x1xf32> to vector<4x256xf32>
    %946 = arith.mulf %944, %945 : vector<4x256xf32>
    %947 = arith.addf %935, %946 : vector<4x256xf32>
    %c65 = arith.constant 65 : index
    %c0_446 = arith.constant 0 : index
    %c0_447 = arith.constant 0 : index
    %948 = vector.load %arg6[%c65, %c0_446, %c0_447] : memref<81x4x1xf32, #tpu.memory_space<vmem>>, vector<1x4x1xf32>
    %949 = vector.shape_cast %948 : vector<1x4x1xf32> to vector<4x1xf32>
    %950 = vector.extract_strided_slice %922 {offsets = [0, 254], sizes = [4, 2], strides = [1, 1]} : vector<4x256xf32> to vector<4x2xf32>
    %951 = vector.extract_strided_slice %922 {offsets = [0, 0], sizes = [4, 254], strides = [1, 1]} : vector<4x256xf32> to vector<4x254xf32>
    %952 = tpu.concatenate %950, %951 in 1 : vector<4x2xf32>, vector<4x254xf32> -> vector<4x256xf32>
    %c2_448 = arith.constant 2 : index
    %c0_449 = arith.constant 0 : index
    %c0_450 = arith.constant 0 : index
    %953 = vector.load %arg9[%c2_448, %c0_449, %c0_450] : memref<9x1x256xf32, #tpu.memory_space<vmem>>, vector<1x1x256xf32>
    %954 = vector.shape_cast %953 : vector<1x1x256xf32> to vector<1x256xf32>
    %955 = vector.broadcast %954 : vector<1x256xf32> to vector<4x256xf32>
    %956 = arith.mulf %952, %955 : vector<4x256xf32>
    %957 = vector.broadcast %949 : vector<4x1xf32> to vector<4x256xf32>
    %958 = arith.mulf %956, %957 : vector<4x256xf32>
    %959 = arith.addf %947, %958 : vector<4x256xf32>
    %c66 = arith.constant 66 : index
    %c0_451 = arith.constant 0 : index
    %c0_452 = arith.constant 0 : index
    %960 = vector.load %arg6[%c66, %c0_451, %c0_452] : memref<81x4x1xf32, #tpu.memory_space<vmem>>, vector<1x4x1xf32>
    %961 = vector.shape_cast %960 : vector<1x4x1xf32> to vector<4x1xf32>
    %962 = vector.extract_strided_slice %922 {offsets = [0, 255], sizes = [4, 1], strides = [1, 1]} : vector<4x256xf32> to vector<4x1xf32>
    %963 = vector.extract_strided_slice %922 {offsets = [0, 0], sizes = [4, 255], strides = [1, 1]} : vector<4x256xf32> to vector<4x255xf32>
    %964 = tpu.concatenate %962, %963 in 1 : vector<4x1xf32>, vector<4x255xf32> -> vector<4x256xf32>
    %c3_453 = arith.constant 3 : index
    %c0_454 = arith.constant 0 : index
    %c0_455 = arith.constant 0 : index
    %965 = vector.load %arg9[%c3_453, %c0_454, %c0_455] : memref<9x1x256xf32, #tpu.memory_space<vmem>>, vector<1x1x256xf32>
    %966 = vector.shape_cast %965 : vector<1x1x256xf32> to vector<1x256xf32>
    %967 = vector.broadcast %966 : vector<1x256xf32> to vector<4x256xf32>
    %968 = arith.mulf %964, %967 : vector<4x256xf32>
    %969 = vector.broadcast %961 : vector<4x1xf32> to vector<4x256xf32>
    %970 = arith.mulf %968, %969 : vector<4x256xf32>
    %971 = arith.addf %959, %970 : vector<4x256xf32>
    %c67 = arith.constant 67 : index
    %c0_456 = arith.constant 0 : index
    %c0_457 = arith.constant 0 : index
    %972 = vector.load %arg6[%c67, %c0_456, %c0_457] : memref<81x4x1xf32, #tpu.memory_space<vmem>>, vector<1x4x1xf32>
    %973 = vector.shape_cast %972 : vector<1x4x1xf32> to vector<4x1xf32>
    %c4_458 = arith.constant 4 : index
    %c0_459 = arith.constant 0 : index
    %c0_460 = arith.constant 0 : index
    %974 = vector.load %arg9[%c4_458, %c0_459, %c0_460] : memref<9x1x256xf32, #tpu.memory_space<vmem>>, vector<1x1x256xf32>
    %975 = vector.shape_cast %974 : vector<1x1x256xf32> to vector<1x256xf32>
    %976 = vector.broadcast %975 : vector<1x256xf32> to vector<4x256xf32>
    %977 = arith.mulf %922, %976 : vector<4x256xf32>
    %978 = vector.broadcast %973 : vector<4x1xf32> to vector<4x256xf32>
    %979 = arith.mulf %977, %978 : vector<4x256xf32>
    %980 = arith.addf %971, %979 : vector<4x256xf32>
    %c68 = arith.constant 68 : index
    %c0_461 = arith.constant 0 : index
    %c0_462 = arith.constant 0 : index
    %981 = vector.load %arg6[%c68, %c0_461, %c0_462] : memref<81x4x1xf32, #tpu.memory_space<vmem>>, vector<1x4x1xf32>
    %982 = vector.shape_cast %981 : vector<1x4x1xf32> to vector<4x1xf32>
    %983 = vector.extract_strided_slice %922 {offsets = [0, 1], sizes = [4, 255], strides = [1, 1]} : vector<4x256xf32> to vector<4x255xf32>
    %984 = vector.extract_strided_slice %922 {offsets = [0, 0], sizes = [4, 1], strides = [1, 1]} : vector<4x256xf32> to vector<4x1xf32>
    %985 = tpu.concatenate %983, %984 in 1 : vector<4x255xf32>, vector<4x1xf32> -> vector<4x256xf32>
    %c5_463 = arith.constant 5 : index
    %c0_464 = arith.constant 0 : index
    %c0_465 = arith.constant 0 : index
    %986 = vector.load %arg9[%c5_463, %c0_464, %c0_465] : memref<9x1x256xf32, #tpu.memory_space<vmem>>, vector<1x1x256xf32>
    %987 = vector.shape_cast %986 : vector<1x1x256xf32> to vector<1x256xf32>
    %988 = vector.broadcast %987 : vector<1x256xf32> to vector<4x256xf32>
    %989 = arith.mulf %985, %988 : vector<4x256xf32>
    %990 = vector.broadcast %982 : vector<4x1xf32> to vector<4x256xf32>
    %991 = arith.mulf %989, %990 : vector<4x256xf32>
    %992 = arith.addf %980, %991 : vector<4x256xf32>
    %c69 = arith.constant 69 : index
    %c0_466 = arith.constant 0 : index
    %c0_467 = arith.constant 0 : index
    %993 = vector.load %arg6[%c69, %c0_466, %c0_467] : memref<81x4x1xf32, #tpu.memory_space<vmem>>, vector<1x4x1xf32>
    %994 = vector.shape_cast %993 : vector<1x4x1xf32> to vector<4x1xf32>
    %995 = vector.extract_strided_slice %922 {offsets = [0, 2], sizes = [4, 254], strides = [1, 1]} : vector<4x256xf32> to vector<4x254xf32>
    %996 = vector.extract_strided_slice %922 {offsets = [0, 0], sizes = [4, 2], strides = [1, 1]} : vector<4x256xf32> to vector<4x2xf32>
    %997 = tpu.concatenate %995, %996 in 1 : vector<4x254xf32>, vector<4x2xf32> -> vector<4x256xf32>
    %c6_468 = arith.constant 6 : index
    %c0_469 = arith.constant 0 : index
    %c0_470 = arith.constant 0 : index
    %998 = vector.load %arg9[%c6_468, %c0_469, %c0_470] : memref<9x1x256xf32, #tpu.memory_space<vmem>>, vector<1x1x256xf32>
    %999 = vector.shape_cast %998 : vector<1x1x256xf32> to vector<1x256xf32>
    %1000 = vector.broadcast %999 : vector<1x256xf32> to vector<4x256xf32>
    %1001 = arith.mulf %997, %1000 : vector<4x256xf32>
    %1002 = vector.broadcast %994 : vector<4x1xf32> to vector<4x256xf32>
    %1003 = arith.mulf %1001, %1002 : vector<4x256xf32>
    %1004 = arith.addf %992, %1003 : vector<4x256xf32>
    %c70 = arith.constant 70 : index
    %c0_471 = arith.constant 0 : index
    %c0_472 = arith.constant 0 : index
    %1005 = vector.load %arg6[%c70, %c0_471, %c0_472] : memref<81x4x1xf32, #tpu.memory_space<vmem>>, vector<1x4x1xf32>
    %1006 = vector.shape_cast %1005 : vector<1x4x1xf32> to vector<4x1xf32>
    %1007 = vector.extract_strided_slice %922 {offsets = [0, 3], sizes = [4, 253], strides = [1, 1]} : vector<4x256xf32> to vector<4x253xf32>
    %1008 = vector.extract_strided_slice %922 {offsets = [0, 0], sizes = [4, 3], strides = [1, 1]} : vector<4x256xf32> to vector<4x3xf32>
    %1009 = tpu.concatenate %1007, %1008 in 1 : vector<4x253xf32>, vector<4x3xf32> -> vector<4x256xf32>
    %c7_473 = arith.constant 7 : index
    %c0_474 = arith.constant 0 : index
    %c0_475 = arith.constant 0 : index
    %1010 = vector.load %arg9[%c7_473, %c0_474, %c0_475] : memref<9x1x256xf32, #tpu.memory_space<vmem>>, vector<1x1x256xf32>
    %1011 = vector.shape_cast %1010 : vector<1x1x256xf32> to vector<1x256xf32>
    %1012 = vector.broadcast %1011 : vector<1x256xf32> to vector<4x256xf32>
    %1013 = arith.mulf %1009, %1012 : vector<4x256xf32>
    %1014 = vector.broadcast %1006 : vector<4x1xf32> to vector<4x256xf32>
    %1015 = arith.mulf %1013, %1014 : vector<4x256xf32>
    %1016 = arith.addf %1004, %1015 : vector<4x256xf32>
    %c71 = arith.constant 71 : index
    %c0_476 = arith.constant 0 : index
    %c0_477 = arith.constant 0 : index
    %1017 = vector.load %arg6[%c71, %c0_476, %c0_477] : memref<81x4x1xf32, #tpu.memory_space<vmem>>, vector<1x4x1xf32>
    %1018 = vector.shape_cast %1017 : vector<1x4x1xf32> to vector<4x1xf32>
    %1019 = vector.extract_strided_slice %922 {offsets = [0, 4], sizes = [4, 252], strides = [1, 1]} : vector<4x256xf32> to vector<4x252xf32>
    %1020 = vector.extract_strided_slice %922 {offsets = [0, 0], sizes = [4, 4], strides = [1, 1]} : vector<4x256xf32> to vector<4x4xf32>
    %1021 = tpu.concatenate %1019, %1020 in 1 : vector<4x252xf32>, vector<4x4xf32> -> vector<4x256xf32>
    %c8_478 = arith.constant 8 : index
    %c0_479 = arith.constant 0 : index
    %c0_480 = arith.constant 0 : index
    %1022 = vector.load %arg9[%c8_478, %c0_479, %c0_480] : memref<9x1x256xf32, #tpu.memory_space<vmem>>, vector<1x1x256xf32>
    %1023 = vector.shape_cast %1022 : vector<1x1x256xf32> to vector<1x256xf32>
    %1024 = vector.broadcast %1023 : vector<1x256xf32> to vector<4x256xf32>
    %1025 = arith.mulf %1021, %1024 : vector<4x256xf32>
    %1026 = vector.broadcast %1018 : vector<4x1xf32> to vector<4x256xf32>
    %1027 = arith.mulf %1025, %1026 : vector<4x256xf32>
    %1028 = arith.addf %1016, %1027 : vector<4x256xf32>
    %c7_481 = arith.constant 7 : index
    %c0_482 = arith.constant 0 : index
    %c0_483 = arith.constant 0 : index
    %1029 = vector.load %arg8[%c7_481, %c0_482, %c0_483] : memref<9x1x256xf32, #tpu.memory_space<vmem>>, vector<1x1x256xf32>
    %1030 = vector.shape_cast %1029 : vector<1x1x256xf32> to vector<1x256xf32>
    %1031 = vector.broadcast %1030 : vector<1x256xf32> to vector<4x256xf32>
    %1032 = arith.mulf %1028, %1031 : vector<4x256xf32>
    %1033 = arith.addf %919, %1032 : vector<4x256xf32>
    %1034 = vector.extract_strided_slice %123 {offsets = [0, 64], sizes = [4, 192], strides = [1, 1]} : vector<4x256xf32> to vector<4x192xf32>
    %1035 = vector.extract_strided_slice %123 {offsets = [0, 0], sizes = [4, 64], strides = [1, 1]} : vector<4x256xf32> to vector<4x64xf32>
    %1036 = tpu.concatenate %1034, %1035 in 1 : vector<4x192xf32>, vector<4x64xf32> -> vector<4x256xf32>
    %cst_484 = arith.constant 0.000000e+00 : f32
    %1037 = vector.broadcast %cst_484 : f32 to vector<4x256xf32>
    %c72 = arith.constant 72 : index
    %c0_485 = arith.constant 0 : index
    %c0_486 = arith.constant 0 : index
    %1038 = vector.load %arg6[%c72, %c0_485, %c0_486] : memref<81x4x1xf32, #tpu.memory_space<vmem>>, vector<1x4x1xf32>
    %1039 = vector.shape_cast %1038 : vector<1x4x1xf32> to vector<4x1xf32>
    %1040 = vector.extract_strided_slice %1036 {offsets = [0, 252], sizes = [4, 4], strides = [1, 1]} : vector<4x256xf32> to vector<4x4xf32>
    %1041 = vector.extract_strided_slice %1036 {offsets = [0, 0], sizes = [4, 252], strides = [1, 1]} : vector<4x256xf32> to vector<4x252xf32>
    %1042 = tpu.concatenate %1040, %1041 in 1 : vector<4x4xf32>, vector<4x252xf32> -> vector<4x256xf32>
    %c0_487 = arith.constant 0 : index
    %c0_488 = arith.constant 0 : index
    %c0_489 = arith.constant 0 : index
    %1043 = vector.load %arg9[%c0_487, %c0_488, %c0_489] : memref<9x1x256xf32, #tpu.memory_space<vmem>>, vector<1x1x256xf32>
    %1044 = vector.shape_cast %1043 : vector<1x1x256xf32> to vector<1x256xf32>
    %1045 = vector.broadcast %1044 : vector<1x256xf32> to vector<4x256xf32>
    %1046 = arith.mulf %1042, %1045 : vector<4x256xf32>
    %1047 = vector.broadcast %1039 : vector<4x1xf32> to vector<4x256xf32>
    %1048 = arith.mulf %1046, %1047 : vector<4x256xf32>
    %1049 = arith.addf %1037, %1048 : vector<4x256xf32>
    %c73 = arith.constant 73 : index
    %c0_490 = arith.constant 0 : index
    %c0_491 = arith.constant 0 : index
    %1050 = vector.load %arg6[%c73, %c0_490, %c0_491] : memref<81x4x1xf32, #tpu.memory_space<vmem>>, vector<1x4x1xf32>
    %1051 = vector.shape_cast %1050 : vector<1x4x1xf32> to vector<4x1xf32>
    %1052 = vector.extract_strided_slice %1036 {offsets = [0, 253], sizes = [4, 3], strides = [1, 1]} : vector<4x256xf32> to vector<4x3xf32>
    %1053 = vector.extract_strided_slice %1036 {offsets = [0, 0], sizes = [4, 253], strides = [1, 1]} : vector<4x256xf32> to vector<4x253xf32>
    %1054 = tpu.concatenate %1052, %1053 in 1 : vector<4x3xf32>, vector<4x253xf32> -> vector<4x256xf32>
    %c1_492 = arith.constant 1 : index
    %c0_493 = arith.constant 0 : index
    %c0_494 = arith.constant 0 : index
    %1055 = vector.load %arg9[%c1_492, %c0_493, %c0_494] : memref<9x1x256xf32, #tpu.memory_space<vmem>>, vector<1x1x256xf32>
    %1056 = vector.shape_cast %1055 : vector<1x1x256xf32> to vector<1x256xf32>
    %1057 = vector.broadcast %1056 : vector<1x256xf32> to vector<4x256xf32>
    %1058 = arith.mulf %1054, %1057 : vector<4x256xf32>
    %1059 = vector.broadcast %1051 : vector<4x1xf32> to vector<4x256xf32>
    %1060 = arith.mulf %1058, %1059 : vector<4x256xf32>
    %1061 = arith.addf %1049, %1060 : vector<4x256xf32>
    %c74 = arith.constant 74 : index
    %c0_495 = arith.constant 0 : index
    %c0_496 = arith.constant 0 : index
    %1062 = vector.load %arg6[%c74, %c0_495, %c0_496] : memref<81x4x1xf32, #tpu.memory_space<vmem>>, vector<1x4x1xf32>
    %1063 = vector.shape_cast %1062 : vector<1x4x1xf32> to vector<4x1xf32>
    %1064 = vector.extract_strided_slice %1036 {offsets = [0, 254], sizes = [4, 2], strides = [1, 1]} : vector<4x256xf32> to vector<4x2xf32>
    %1065 = vector.extract_strided_slice %1036 {offsets = [0, 0], sizes = [4, 254], strides = [1, 1]} : vector<4x256xf32> to vector<4x254xf32>
    %1066 = tpu.concatenate %1064, %1065 in 1 : vector<4x2xf32>, vector<4x254xf32> -> vector<4x256xf32>
    %c2_497 = arith.constant 2 : index
    %c0_498 = arith.constant 0 : index
    %c0_499 = arith.constant 0 : index
    %1067 = vector.load %arg9[%c2_497, %c0_498, %c0_499] : memref<9x1x256xf32, #tpu.memory_space<vmem>>, vector<1x1x256xf32>
    %1068 = vector.shape_cast %1067 : vector<1x1x256xf32> to vector<1x256xf32>
    %1069 = vector.broadcast %1068 : vector<1x256xf32> to vector<4x256xf32>
    %1070 = arith.mulf %1066, %1069 : vector<4x256xf32>
    %1071 = vector.broadcast %1063 : vector<4x1xf32> to vector<4x256xf32>
    %1072 = arith.mulf %1070, %1071 : vector<4x256xf32>
    %1073 = arith.addf %1061, %1072 : vector<4x256xf32>
    %c75 = arith.constant 75 : index
    %c0_500 = arith.constant 0 : index
    %c0_501 = arith.constant 0 : index
    %1074 = vector.load %arg6[%c75, %c0_500, %c0_501] : memref<81x4x1xf32, #tpu.memory_space<vmem>>, vector<1x4x1xf32>
    %1075 = vector.shape_cast %1074 : vector<1x4x1xf32> to vector<4x1xf32>
    %1076 = vector.extract_strided_slice %1036 {offsets = [0, 255], sizes = [4, 1], strides = [1, 1]} : vector<4x256xf32> to vector<4x1xf32>
    %1077 = vector.extract_strided_slice %1036 {offsets = [0, 0], sizes = [4, 255], strides = [1, 1]} : vector<4x256xf32> to vector<4x255xf32>
    %1078 = tpu.concatenate %1076, %1077 in 1 : vector<4x1xf32>, vector<4x255xf32> -> vector<4x256xf32>
    %c3_502 = arith.constant 3 : index
    %c0_503 = arith.constant 0 : index
    %c0_504 = arith.constant 0 : index
    %1079 = vector.load %arg9[%c3_502, %c0_503, %c0_504] : memref<9x1x256xf32, #tpu.memory_space<vmem>>, vector<1x1x256xf32>
    %1080 = vector.shape_cast %1079 : vector<1x1x256xf32> to vector<1x256xf32>
    %1081 = vector.broadcast %1080 : vector<1x256xf32> to vector<4x256xf32>
    %1082 = arith.mulf %1078, %1081 : vector<4x256xf32>
    %1083 = vector.broadcast %1075 : vector<4x1xf32> to vector<4x256xf32>
    %1084 = arith.mulf %1082, %1083 : vector<4x256xf32>
    %1085 = arith.addf %1073, %1084 : vector<4x256xf32>
    %c76 = arith.constant 76 : index
    %c0_505 = arith.constant 0 : index
    %c0_506 = arith.constant 0 : index
    %1086 = vector.load %arg6[%c76, %c0_505, %c0_506] : memref<81x4x1xf32, #tpu.memory_space<vmem>>, vector<1x4x1xf32>
    %1087 = vector.shape_cast %1086 : vector<1x4x1xf32> to vector<4x1xf32>
    %c4_507 = arith.constant 4 : index
    %c0_508 = arith.constant 0 : index
    %c0_509 = arith.constant 0 : index
    %1088 = vector.load %arg9[%c4_507, %c0_508, %c0_509] : memref<9x1x256xf32, #tpu.memory_space<vmem>>, vector<1x1x256xf32>
    %1089 = vector.shape_cast %1088 : vector<1x1x256xf32> to vector<1x256xf32>
    %1090 = vector.broadcast %1089 : vector<1x256xf32> to vector<4x256xf32>
    %1091 = arith.mulf %1036, %1090 : vector<4x256xf32>
    %1092 = vector.broadcast %1087 : vector<4x1xf32> to vector<4x256xf32>
    %1093 = arith.mulf %1091, %1092 : vector<4x256xf32>
    %1094 = arith.addf %1085, %1093 : vector<4x256xf32>
    %c77 = arith.constant 77 : index
    %c0_510 = arith.constant 0 : index
    %c0_511 = arith.constant 0 : index
    %1095 = vector.load %arg6[%c77, %c0_510, %c0_511] : memref<81x4x1xf32, #tpu.memory_space<vmem>>, vector<1x4x1xf32>
    %1096 = vector.shape_cast %1095 : vector<1x4x1xf32> to vector<4x1xf32>
    %1097 = vector.extract_strided_slice %1036 {offsets = [0, 1], sizes = [4, 255], strides = [1, 1]} : vector<4x256xf32> to vector<4x255xf32>
    %1098 = vector.extract_strided_slice %1036 {offsets = [0, 0], sizes = [4, 1], strides = [1, 1]} : vector<4x256xf32> to vector<4x1xf32>
    %1099 = tpu.concatenate %1097, %1098 in 1 : vector<4x255xf32>, vector<4x1xf32> -> vector<4x256xf32>
    %c5_512 = arith.constant 5 : index
    %c0_513 = arith.constant 0 : index
    %c0_514 = arith.constant 0 : index
    %1100 = vector.load %arg9[%c5_512, %c0_513, %c0_514] : memref<9x1x256xf32, #tpu.memory_space<vmem>>, vector<1x1x256xf32>
    %1101 = vector.shape_cast %1100 : vector<1x1x256xf32> to vector<1x256xf32>
    %1102 = vector.broadcast %1101 : vector<1x256xf32> to vector<4x256xf32>
    %1103 = arith.mulf %1099, %1102 : vector<4x256xf32>
    %1104 = vector.broadcast %1096 : vector<4x1xf32> to vector<4x256xf32>
    %1105 = arith.mulf %1103, %1104 : vector<4x256xf32>
    %1106 = arith.addf %1094, %1105 : vector<4x256xf32>
    %c78 = arith.constant 78 : index
    %c0_515 = arith.constant 0 : index
    %c0_516 = arith.constant 0 : index
    %1107 = vector.load %arg6[%c78, %c0_515, %c0_516] : memref<81x4x1xf32, #tpu.memory_space<vmem>>, vector<1x4x1xf32>
    %1108 = vector.shape_cast %1107 : vector<1x4x1xf32> to vector<4x1xf32>
    %1109 = vector.extract_strided_slice %1036 {offsets = [0, 2], sizes = [4, 254], strides = [1, 1]} : vector<4x256xf32> to vector<4x254xf32>
    %1110 = vector.extract_strided_slice %1036 {offsets = [0, 0], sizes = [4, 2], strides = [1, 1]} : vector<4x256xf32> to vector<4x2xf32>
    %1111 = tpu.concatenate %1109, %1110 in 1 : vector<4x254xf32>, vector<4x2xf32> -> vector<4x256xf32>
    %c6_517 = arith.constant 6 : index
    %c0_518 = arith.constant 0 : index
    %c0_519 = arith.constant 0 : index
    %1112 = vector.load %arg9[%c6_517, %c0_518, %c0_519] : memref<9x1x256xf32, #tpu.memory_space<vmem>>, vector<1x1x256xf32>
    %1113 = vector.shape_cast %1112 : vector<1x1x256xf32> to vector<1x256xf32>
    %1114 = vector.broadcast %1113 : vector<1x256xf32> to vector<4x256xf32>
    %1115 = arith.mulf %1111, %1114 : vector<4x256xf32>
    %1116 = vector.broadcast %1108 : vector<4x1xf32> to vector<4x256xf32>
    %1117 = arith.mulf %1115, %1116 : vector<4x256xf32>
    %1118 = arith.addf %1106, %1117 : vector<4x256xf32>
    %c79 = arith.constant 79 : index
    %c0_520 = arith.constant 0 : index
    %c0_521 = arith.constant 0 : index
    %1119 = vector.load %arg6[%c79, %c0_520, %c0_521] : memref<81x4x1xf32, #tpu.memory_space<vmem>>, vector<1x4x1xf32>
    %1120 = vector.shape_cast %1119 : vector<1x4x1xf32> to vector<4x1xf32>
    %1121 = vector.extract_strided_slice %1036 {offsets = [0, 3], sizes = [4, 253], strides = [1, 1]} : vector<4x256xf32> to vector<4x253xf32>
    %1122 = vector.extract_strided_slice %1036 {offsets = [0, 0], sizes = [4, 3], strides = [1, 1]} : vector<4x256xf32> to vector<4x3xf32>
    %1123 = tpu.concatenate %1121, %1122 in 1 : vector<4x253xf32>, vector<4x3xf32> -> vector<4x256xf32>
    %c7_522 = arith.constant 7 : index
    %c0_523 = arith.constant 0 : index
    %c0_524 = arith.constant 0 : index
    %1124 = vector.load %arg9[%c7_522, %c0_523, %c0_524] : memref<9x1x256xf32, #tpu.memory_space<vmem>>, vector<1x1x256xf32>
    %1125 = vector.shape_cast %1124 : vector<1x1x256xf32> to vector<1x256xf32>
    %1126 = vector.broadcast %1125 : vector<1x256xf32> to vector<4x256xf32>
    %1127 = arith.mulf %1123, %1126 : vector<4x256xf32>
    %1128 = vector.broadcast %1120 : vector<4x1xf32> to vector<4x256xf32>
    %1129 = arith.mulf %1127, %1128 : vector<4x256xf32>
    %1130 = arith.addf %1118, %1129 : vector<4x256xf32>
    %c80 = arith.constant 80 : index
    %c0_525 = arith.constant 0 : index
    %c0_526 = arith.constant 0 : index
    %1131 = vector.load %arg6[%c80, %c0_525, %c0_526] : memref<81x4x1xf32, #tpu.memory_space<vmem>>, vector<1x4x1xf32>
    %1132 = vector.shape_cast %1131 : vector<1x4x1xf32> to vector<4x1xf32>
    %1133 = vector.extract_strided_slice %1036 {offsets = [0, 4], sizes = [4, 252], strides = [1, 1]} : vector<4x256xf32> to vector<4x252xf32>
    %1134 = vector.extract_strided_slice %1036 {offsets = [0, 0], sizes = [4, 4], strides = [1, 1]} : vector<4x256xf32> to vector<4x4xf32>
    %1135 = tpu.concatenate %1133, %1134 in 1 : vector<4x252xf32>, vector<4x4xf32> -> vector<4x256xf32>
    %c8_527 = arith.constant 8 : index
    %c0_528 = arith.constant 0 : index
    %c0_529 = arith.constant 0 : index
    %1136 = vector.load %arg9[%c8_527, %c0_528, %c0_529] : memref<9x1x256xf32, #tpu.memory_space<vmem>>, vector<1x1x256xf32>
    %1137 = vector.shape_cast %1136 : vector<1x1x256xf32> to vector<1x256xf32>
    %1138 = vector.broadcast %1137 : vector<1x256xf32> to vector<4x256xf32>
    %1139 = arith.mulf %1135, %1138 : vector<4x256xf32>
    %1140 = vector.broadcast %1132 : vector<4x1xf32> to vector<4x256xf32>
    %1141 = arith.mulf %1139, %1140 : vector<4x256xf32>
    %1142 = arith.addf %1130, %1141 : vector<4x256xf32>
    %c8_530 = arith.constant 8 : index
    %c0_531 = arith.constant 0 : index
    %c0_532 = arith.constant 0 : index
    %1143 = vector.load %arg8[%c8_530, %c0_531, %c0_532] : memref<9x1x256xf32, #tpu.memory_space<vmem>>, vector<1x1x256xf32>
    %1144 = vector.shape_cast %1143 : vector<1x1x256xf32> to vector<1x256xf32>
    %1145 = vector.broadcast %1144 : vector<1x256xf32> to vector<4x256xf32>
    %1146 = arith.mulf %1142, %1145 : vector<4x256xf32>
    %1147 = arith.addf %1033, %1146 : vector<4x256xf32>
    %c0_533 = arith.constant 0 : index
    %c0_534 = arith.constant 0 : index
    %1148 = vector.load %arg7[%c0_533, %c0_534] : memref<4x1xf32, #tpu.memory_space<vmem>>, vector<4x1xf32>
    %1149 = vector.broadcast %1148 : vector<4x1xf32> to vector<4x256xf32>
    %1150 = arith.addf %1147, %1149 : vector<4x256xf32>
    %cst_535 = arith.constant 0.000000e+00 : f32
    %1151 = vector.broadcast %cst_535 : f32 to vector<4x256xf32>
    %1152 = arith.maximumf %1150, %1151 : vector<4x256xf32>
    %1153 = arith.negf %1152 : vector<4x256xf32>
    %1154 = math.exp %1153 : vector<4x256xf32>
    %cst_536 = arith.constant 1.000000e+00 : f32
    %1155 = vector.broadcast %cst_536 : f32 to vector<4x256xf32>
    %1156 = arith.addf %1155, %1154 : vector<4x256xf32>
    %1157 = arith.divf %1155, %1156 : vector<4x256xf32>
    %cst_537 = arith.constant 1.000000e+00 : f32
    %1158 = vector.broadcast %cst_537 : f32 to vector<4x256xf32>
    %1159 = arith.addf %1158, %1157 : vector<4x256xf32>
    %1160 = arith.mulf %116, %1159 : vector<4x256xf32>
    %c0_538 = arith.constant 0 : index
    %c0_539 = arith.constant 0 : index
    %c0_540 = arith.constant 0 : index
    %1161 = vector.load %arg10[%c0_538, %c0_539, %c0_540] : memref<1x4x256xf32, #tpu.memory_space<vmem>>, vector<1x4x256xf32>
    %1162 = vector.shape_cast %1161 : vector<1x4x256xf32> to vector<4x256xf32>
    %1163 = vector.shape_cast %1160 : vector<4x256xf32> to vector<1x4x256xf32>
    tpu.vector_store %arg10[%c0_538, %c0_539, %c0_540], %1163 {strides = array<i32>} : memref<1x4x256xf32, #tpu.memory_space<vmem>>, vector<1x4x256xf32>,
    return
  }
  func.func @transform_0(%arg0: i32) -> (i32, i32, i32) {
    %c0_i32 = arith.constant 0 : i32
    %c0_i32_0 = arith.constant 0 : i32
    %c0_i32_1 = arith.constant 0 : i32
    return %arg0, %c0_i32, %c0_i32_0 : i32, i32, i32
  }
  func.func @transform_1(%arg0: i32) -> (i32, i32) {
    %c0_i32 = arith.constant 0 : i32
    %c0_i32_0 = arith.constant 0 : i32
    %c0_i32_1 = arith.constant 0 : i32
    return %c0_i32, %c0_i32_0 : i32, i32
  }
  func.func @transform_2(%arg0: i32) -> (i32, i32) {
    %c0_i32 = arith.constant 0 : i32
    %c0_i32_0 = arith.constant 0 : i32
    %c0_i32_1 = arith.constant 0 : i32
    return %c0_i32, %c0_i32_0 : i32, i32
  }
  func.func @transform_3(%arg0: i32) -> (i32, i32) {
    %c0_i32 = arith.constant 0 : i32
    %c0_i32_0 = arith.constant 0 : i32
    %c0_i32_1 = arith.constant 0 : i32
    return %c0_i32, %c0_i32_0 : i32, i32
  }
  func.func @transform_4(%arg0: i32) -> (i32, i32) {
    %c0_i32 = arith.constant 0 : i32
    %c0_i32_0 = arith.constant 0 : i32
    %c0_i32_1 = arith.constant 0 : i32
    return %c0_i32, %c0_i32_0 : i32, i32
  }
  func.func @transform_5(%arg0: i32) -> (i32, i32, i32) {
    %c0_i32 = arith.constant 0 : i32
    %c0_i32_0 = arith.constant 0 : i32
    %c0_i32_1 = arith.constant 0 : i32
    %c0_i32_2 = arith.constant 0 : i32
    return %c0_i32, %c0_i32_0, %c0_i32_1 : i32, i32, i32
  }
  func.func @transform_6(%arg0: i32) -> (i32, i32) {
    %c0_i32 = arith.constant 0 : i32
    %c0_i32_0 = arith.constant 0 : i32
    %c0_i32_1 = arith.constant 0 : i32
    return %c0_i32, %c0_i32_0 : i32, i32
  }
  func.func @transform_7(%arg0: i32) -> (i32, i32, i32) {
    %c0_i32 = arith.constant 0 : i32
    %c0_i32_0 = arith.constant 0 : i32
    %c0_i32_1 = arith.constant 0 : i32
    %c0_i32_2 = arith.constant 0 : i32
    return %c0_i32, %c0_i32_0, %c0_i32_1 : i32, i32, i32
  }
  func.func @transform_8(%arg0: i32) -> (i32, i32, i32) {
    %c0_i32 = arith.constant 0 : i32
    %c0_i32_0 = arith.constant 0 : i32
    %c0_i32_1 = arith.constant 0 : i32
    %c0_i32_2 = arith.constant 0 : i32
    return %c0_i32, %c0_i32_0, %c0_i32_1 : i32, i32, i32
  }
  func.func @transform_9(%arg0: i32) -> (i32, i32, i32) {
    %c0_i32 = arith.constant 0 : i32
    %c0_i32_0 = arith.constant 0 : i32
    %c0_i32_1 = arith.constant 0 : i32
    return %arg0, %c0_i32, %c0_i32_0 : i32, i32, i32
  }
}

</mosaic_0001>

<bundles_post_ra>
// kernel: spatial_attention_pallas.1
= control target key start
LH: loop header
LB: loop body
LE: loop exit
PB: predicated region body
PF: predicated region fallthrough
CT: control target
= control target key end

     0   :  { %s3238_s30 = smov 0   ;;  %s5021_s0 = inlined_call_operand.vmem [shape: f32[2,4,256], index: 0, kind: input, shape index: {}]   ;;  %s5022_s1 = inlined_call_operand.vmem [shape: f32[4,72], index: 1, kind: input, shape index: {}]   ;;  %s5023_s2 = inlined_call_operand.vmem [shape: f32[4,1], index: 2, kind: input, shape index: {}]   ;;  %s5024_s3 = inlined_call_operand.vmem [shape: f32[4,4], index: 3, kind: input, shape index: {}]   ;;  %s5025_s4 = inlined_call_operand.vmem [shape: f32[4,1], index: 4, kind: input, shape index: {}]   ;;  %s5026_s5 = inlined_call_operand.vmem [shape: f32[81,4,1], index: 5, kind: input, shape index: {}]   ;;  %s5027_s6 = inlined_call_operand.vmem [shape: f32[4,1], index: 6, kind: input, shape index: {}]   ;;  %s5028_s7 = inlined_call_operand.vmem [shape: f32[9,1,256], index: 7, kind: input, shape index: {}]   ;;  %s5029_s8 = inlined_call_operand.vmem [shape: f32[9,1,256], index: 8, kind: input, shape index: {}]   ;;  %s5030_s9 = inlined_call_operand.vmem [shape: f32[2,4,256], index: 9, kind: output, shape index: {}]  }
   0x1 LB: > { %s2986_s10 = sadd.s32 4294967295, %s3165_s30   ;;  %p2990_p0 = scmp.ge.s32.totalorder %s3165_s30, 1  ;;  %s3165_s30 = sphi %s3238_s30, %s19_s30  }
   0x2   : > { %p287_p1 = scmp.lt.s32.totalorder %s3165_s30, 3 }
   0x4   : > { %p288_p2 = pnand %p2990_p0, %p287_p1 }
   0x6   : > { %291 = sbr.rel (%p288_p2) target bundleno = 1114 (0x45a), region = 56 }
   0xb   : > { %p3246_p3 = scmp.lt.s32.totalorder %s2986_s10, 1  ;;  %v3167_v0 = vmov 0   ;;  %v3168_v1 = vmov 0.0   ;;  %v367_v2 = vlaneseq  ;;  %s3169_s16 = smov 112   ;;  %v3003_v8 = vld [vmem:[%s5028_s7 + $0x8] sm:$0x3] }
   0xc   : > { %3148 = vset.pattern.permute.xlu0 %v3167_v0  ;;  %348 = vst [vmem:[#allocation2 + $0x30] sm:$0xff] %v3168_v1  ;;  %349 = vst [vmem:[#allocation2 + $0x18] sm:$0xff] %v3168_v1  ;;  %804 = vmatprep.mubr.f32.mxu0 %v3168_v1  ;;  %s3170_s17 = smov 111   ;;  %s3171_s18 = smov 113   ;;  %v3004_v9 = vld [vmem:[%s5029_s8 + $0x8] sm:$0x3] }
   0xd   : > { %334 = vst [vmem:[#allocation2] sm:$0xff] %v3168_v1  ;;  %335 = vst [vmem:[#allocation2 + $0x38] sm:$0xff] %v3168_v1  ;;  %s5387_s10 = smov (!%p3246_p3, %s2986_s10), 1  ;;  %3149 = vset.pattern.permute.xlu1 %v3167_v0  ;;  %895 = vmatprep.mubr.f32.mxu1 %v3168_v1  ;;  %v368_v5 = vshrl.u32 %v367_v2, 7  ;;  %s3172_s23 = smov 127   ;;  %vm635_vm0 = vcmask 916480  }
   0xe   : > { %336 = vst [vmem:[#allocation2 + $0x78] sm:$0xff] %v3168_v1  ;;  %337 = vst [vmem:[#allocation2 + $0x58] sm:$0xff] %v3168_v1  ;;  %s3117_s12 = sshll.u32 %s5387_s10, 3  ;;  %s3173_s24 = smov 1   ;;  %v730_v19 = vld [vmem:[%s5023_s2] sm:$0xf] }
   0xf   : > { %338 = vst [vmem:[#allocation2 + $0x20] sm:$0xff] %v3168_v1  ;;  %339 = vst [vmem:[#allocation2 + $0x8] sm:$0xff] %v3168_v1  ;;  %s327_s15 = scalar_lea.vmem %s5021_s0, %s3117_s12  ;;  %v3262_v6 = vsub.s32 0, %v368_v5  ;;  %v3264_v7 = vsub.s32 1, %v368_v5  ;;  %s3174_s25 = smov 15   ;;  %vm594_vm1 = vcmask 924672  }
  0x10   : > { %340 = vst [vmem:[#allocation2 + $0x70] sm:$0xff] %v3168_v1  ;;  %341 = vst [vmem:[#allocation2 + $0x80] sm:$0xff] %v3168_v1  ;;  %v333_v3 = vld [vmem:[%s327_s15] sm:$0xff]  ;;  %s3175_s26 = smov 16   ;;  %s3176_s27 = smov 17   ;;  %vm675_vm2 = vcmask 908288  }
  0x11   : > { %342 = vst [vmem:[#allocation2 + $0x88] sm:$0xff] %v3168_v1  ;;  %343 = vst [vmem:[#allocation2 + $0x40] sm:$0xff] %v3168_v1  ;;  %631 = vrot.lane.b32.xlu1 %v333_v3, %s3169_s16  ;;  %671 = vrot.lane.b32.xlu0 %v333_v3, %s3170_s17  ;;  %v353_v4 = vcombine.high %v333_v3, %v333_v3  ;;  %v524_v10 = vrot.slane %v3003_v8, %v3262_v6  ;;  %v3017_v20 = vld [vmem:[%s5026_s5 + $0x4] sm:$0xf]  ;;  %v3021_v21 = vld [vmem:[%s5026_s5 + $0xc] sm:$0xf] }
  0x12   : > { %344 = vst [vmem:[#allocation2 + $0x50] sm:$0xff] %v3168_v1  ;;  %345 = vst [vmem:[#allocation2 + $0x28] sm:$0xff] %v3168_v1  ;;  %v528_v11 = vrot.slane %v3003_v8, %v3264_v7  ;;  %v537_v12 = vrot.slane %v3004_v9, %v3262_v6  ;;  %v541_v13 = vrot.slane %v3004_v9, %v3264_v7  ;;  %v3025_v22 = vld [vmem:[%s5026_s5 + $0x14] sm:$0xf]  ;;  %v3029_v23 = vld [vmem:[%s5026_s5 + $0x1c] sm:$0xf] }
  0x13   : > { %346 = vst [vmem:[#allocation2 + $0x10] sm:$0xff] %v3168_v1  ;;  %347 = vst [vmem:[#allocation2 + $0x48] sm:$0xff] %v3168_v1  ;;  %v3033_v24 = vld [vmem:[%s5026_s5 + $0x24] sm:$0xf]  ;;  %v3035_v25 = vld [vmem:[%s5026_s5 + $0x2c] sm:$0xf] }
  0x14   : > { %350 = vst [vmem:[#allocation2 + $0x68] sm:$0xff] %v3168_v1  ;;  %351 = vst [vmem:[#allocation2 + $0x60] sm:$0xff] %v3168_v1  ;;  %v529_v14 = vcombine.low %v524_v10, %v528_v11  ;;  %v542_v15 = vcombine.low %v537_v12, %v541_v13  ;;  %v814_v26 = vld [vmem:[%s5025_s4] sm:$0xf]  ;;  %v3037_v27 = vld [vmem:[%s5026_s5 + $0x34] sm:$0xf] }
  0x15   : > { %590 = vrot.lane.b32.xlu0 %v333_v3, %s3171_s18  ;;  %633 = vrot.lane.b32.xlu1 %v353_v4, %s3169_s16  ;;  %5152 = vst [vmem:[#allocation3_spill] sm:$0xff] %v3262_v6  ;;  %5153 = vst [vmem:[#allocation4_spill] sm:$0xff] %v3264_v7  ;;  %v916_v28 = vld [vmem:[%s5026_s5] sm:$0xf]  ;;  %v3039_v29 = vld [vmem:[%s5026_s5 + $0x3c] sm:$0xf] }
  0x16   : > { %v531_v16 = vmul.f32 %v529_v14, %v333_v3  ;;  %v3019_v30 = vld [vmem:[%s5026_s5 + $0x8] sm:$0xf]  ;;  %v3041_v31 = vld [vmem:[%s5026_s5 + $0x44] sm:$0xf]  ;;  %v3023_v32 = vld [vmem:[%s5026_s5 + $0x10] sm:$0xf] }
  0x17   : > { %v3044_v33 = vld [vmem:[%s5026_s5 + $0x4c] sm:$0xf]  ;;  %v3027_v34 = vld [vmem:[%s5026_s5 + $0x18] sm:$0xf]  ;;  %v3046_v35 = vld [vmem:[%s5026_s5 + $0x54] sm:$0xf] }
  0x18   : > { %v544_v17 = vmul.f32 %v542_v15, %v531_v16  ;;  %v3031_v36 = vld [vmem:[%s5026_s5 + $0x20] sm:$0xf]  ;;  %v3048_v37 = vld [vmem:[%s5026_s5 + $0x5c] sm:$0xf]  ;;  %v3034_v38 = vld [vmem:[%s5026_s5 + $0x28] sm:$0xf] }
  0x19   : > { %592 = vrot.lane.b32.xlu1 %v353_v4, %s3171_s18  ;;  %673 = vrot.lane.b32.xlu0 %v353_v4, %s3170_s17  ;;  %v3050_v39 = vld [vmem:[%s5026_s5 + $0x64] sm:$0xf]  ;;  %v3036_v40 = vld [vmem:[%s5026_s5 + $0x30] sm:$0xf]  ;;  %vm554_vm3 = vcmask 1039360   ;;  %vm483_vm4 = vcmask 7168  }
  0x1a   : > { %v546_v18 = vcombine.high %v544_v17, %v544_v17  ;;  %548 = vst [vmem:[#allocation2 + $0x88] sm:$0xf] %v544_v17  ;;  %v3053_v41 = vld [vmem:[%s5026_s5 + $0x6c] sm:$0xf]  ;;  %v3038_v42 = vld [vmem:[%s5026_s5 + $0x38] sm:$0xf] }
  0x1b   : > { %v3055_v43 = vld [vmem:[%s5026_s5 + $0x74] sm:$0xf]  ;;  %v3040_v44 = vld [vmem:[%s5026_s5 + $0x40] sm:$0xf]  ;;  %v3057_v45 = vld [vmem:[%s5026_s5 + $0x7c] sm:$0xf] }
  0x1c   : > { %549 = vst [vmem:[#allocation2 + $0x40] sm:$0xf] %v546_v18  ;;  %v3043_v46 = vld [vmem:[%s5026_s5 + $0x48] sm:$0xf]  ;;  %v3059_v47 = vld [vmem:[%s5026_s5 + $0x84] sm:$0xf] }
  0x1d   : > { %552 = vrot.lane.b32.xlu1 %v353_v4, %s3172_s23  ;;  %550 = vrot.lane.b32.xlu0 %v333_v3, %s3172_s23  ;;  %v3045_v48 = vld [vmem:[%s5026_s5 + $0x50] sm:$0xf]  ;;  %v3061_v49 = vld [vmem:[%s5026_s5 + $0x8c] sm:$0xf]  ;;  %vm442_vm5 = vcmask 121856   ;;  %vm401_vm6 = vcmask 130048  }
  0x1e   : > { %v3047_v50 = vld [vmem:[%s5026_s5 + $0x58] sm:$0xf]  ;;  %v3064_v51 = vld [vmem:[%s5026_s5 + $0x94] sm:$0xf]  ;;  %v3049_v52 = vld [vmem:[%s5026_s5 + $0x60] sm:$0xf] }
  0x1f   : > { %v3066_v53 = vld [vmem:[%s5026_s5 + $0x9c] sm:$0xf]  ;;  %v3051_v54 = vld [vmem:[%s5026_s5 + $0x68] sm:$0xf]  ;;  %v3068_v56 = vld [vmem:[%s5026_s5 + $0xa4] sm:$0xf] }
  0x20   : > { %v3009_v55 = vld [vmem:[%s5028_s7 + $0xa] sm:$0x3]  ;;  %v3010_v59 = vld [vmem:[%s5029_s8 + $0x8] sm:$0x3]  ;;  %v3054_v61 = vld [vmem:[%s5026_s5 + $0x70] sm:$0xf] }
  0x21   : > { %481 = vrot.lane.b32.xlu1 %v333_v3, %s3173_s24  ;;  %478 = vrot.lane.b32.xlu0 %v353_v4, %s3173_s24  ;;  %v3007_v60 = vld [vmem:[%s5028_s7 + $0xa] sm:$0x3]  ;;  %v646_v62 = vrot.slane %v3009_v55, %v3262_v6  ;;  %v650_v63 = vrot.slane %v3009_v55, %v3264_v7  ;;  %v3008_v0 = vld [vmem:[%s5029_s8 + $0x6] sm:$0x3]  ;;  %v660_v1 = vrot.slane %v3010_v59, %v3262_v6  ;;  %vm359_vm7 = vcmask 138240   ;;  %s3177_s14 = smov 48  }
  0x22   : > { %v3011_v2 = vld [vmem:[%s5028_s7 + $0xa] sm:$0x3]  ;;  %v664_v5 = vrot.slane %v3010_v59, %v3264_v7  ;;  %v606_v9 = vrot.slane %v3007_v60, %v3262_v6  ;;  %v610_v13 = vrot.slane %v3007_v60, %v3264_v7  ;;  %v620_v14 = vrot.slane %v3008_v0, %v3262_v6  ;;  %v3005_v15 = vld [vmem:[%s5028_s7 + $0x8] sm:$0x3]  ;;  %v3056_v16 = vld [vmem:[%s5026_s5 + $0x78] sm:$0xf] }
  0x23   : > { %v3012_v10 = vld [vmem:[%s5029_s8 + $0xa] sm:$0x3]  ;;  %v2999_v59 = vld [vmem:[%s5028_s7 + $0x6] sm:$0x3]  ;;  %vm736_vm8 = vcmask 588800   ;;  %vm824_vm9 = vcmask 1043456  }
  0x24   : > { %v3077_v60 = vld [vmem:[%s5026_s5 + $0xc4] sm:$0xf]  ;;  %vm820_vm10 = vcmask 31744   ;;  %s3178_s15 = smov 64   ;;  %s3179_s17 = smov 32   ;;  %vm911_vm11 = vcmask 523264  }
  0x25   : > { %440 = vrot.lane.b32.xlu1 %v333_v3, %s3174_s25  ;;  %437 = vrot.lane.b32.xlu0 %v353_v4, %s3174_s25  ;;  %s3180_s18 = smov 3   ;;  %s3181_s19 = smov 4   ;;  %vm1244_vm12 = vcmask 392192   ;;  %vm1461_vm13 = vcmask 261120   ;;  %vm993_vm14 = vcmask 15360   ;;  %vm957_vm15 = vcmask 23552  }
  0x26   : > { %s3182_s20 = smov 2   ;;  %s3183_s21 = smov 126  }
  0x27   : > { %s3184_s22 = smov 124   ;;  %s3185_s25 = smov 125  }
  0x28   : > { %s3187_s28 = smov 80  }
  0x29   : > { %399 = vrot.lane.b32.xlu1 %v333_v3, %s3175_s26  ;;  %396 = vrot.lane.b32.xlu0 %v353_v4, %s3175_s26 }
  0x2d   : > { %357 = vrot.lane.b32.xlu1 %v333_v3, %s3176_s27  ;;  %354 = vrot.lane.b32.xlu0 %v353_v4, %s3176_s27  ;;  %v3070_v3 = vld [vmem:[%s5026_s5 + $0xac] sm:$0xf]  ;;  %s3186_s27 = smov 96  }
  0x31   : > { %733 = vperm.xlu0 %3148, %v730_v19   ;;  %817 = vperm.xlu1 %3149, %v814_v26   ;;  %v686_v19 = vrot.slane %v3011_v2, %v3262_v6 }
  0x35   : > { %979 = vperm.xlu0 %3148, %v3017_v20   ;;  %943 = vperm.xlu1 %3149, %v916_v28   ;;  %v690_v20 = vrot.slane %v3011_v2, %v3264_v7 }
  0x39   : > { %1049 = vperm.xlu0 %3148, %v3021_v21   ;;  %1015 = vperm.xlu1 %3149, %v3019_v30   ;;  %v624_v21 = vrot.slane %v3008_v0, %v3264_v7  ;;  %v569_v30 = vrot.slane %v3005_v15, %v3264_v7 }
  0x3d   : > { %1108 = vperm.xlu0 %3148, %v3025_v22   ;;  %1074 = vperm.xlu1 %3149, %v3023_v32   ;;  %v700_v22 = vrot.slane %v3012_v10, %v3262_v6 }
  0x41   : > { %1180 = vperm.xlu0 %3148, %v3029_v23   ;;  %1144 = vperm.xlu1 %3149, %v3027_v34   ;;  %v704_v23 = vrot.slane %v3012_v10, %v3264_v7 }
  0x45   : > { %1265 = vperm.xlu0 %3148, %v3033_v24   ;;  %1216 = vperm.xlu1 %3149, %v3031_v36   ;;  %v3073_v24 = vld [vmem:[%s5026_s5 + $0xb4] sm:$0xf]  ;;  %v3058_v36 = vld [vmem:[%s5026_s5 + $0x80] sm:$0xf] }
  0x49   : > { %1309 = vperm.xlu0 %3148, %v3035_v25   ;;  %1287 = vperm.xlu1 %3149, %v3034_v38  }
  0x4d   : > { %1344 = vperm.xlu0 %3148, %v3037_v27   ;;  %1331 = vperm.xlu1 %3149, %v3036_v40  }
  0x51   : > { %1388 = vperm.xlu0 %3148, %v3039_v29   ;;  %1366 = vperm.xlu1 %3149, %v3038_v42   ;;  %v565_v29 = vrot.slane %v3005_v15, %v3262_v6 }
  0x55   : > { %1432 = vperm.xlu0 %3148, %v3041_v31   ;;  %1410 = vperm.xlu1 %3149, %v3040_v44   ;;  %v3006_v31 = vld [vmem:[%s5029_s8 + $0xa] sm:$0x3]  ;;  %v3075_v44 = vld [vmem:[%s5026_s5 + $0xbc] sm:$0xf] }
  0x56   : > { %v583_v42 = vrot.slane %v3006_v31, %v3264_v7 }
  0x59   : > { %1504 = vperm.xlu0 %3148, %v3044_v33   ;;  %1482 = vperm.xlu1 %3149, %v3043_v46  }
  0x5d   : > { %1548 = vperm.xlu0 %3148, %v3046_v35   ;;  %1526 = vperm.xlu1 %3149, %v3045_v48  }
  0x61   : > { %1583 = vperm.xlu0 %3148, %v3048_v37   ;;  %1561 = vperm.xlu1 %3149, %v3047_v50  }
  0x65   : > { %1627 = vperm.xlu0 %3148, %v3050_v39   ;;  %1605 = vperm.xlu1 %3149, %v3049_v52  }
  0x69   : > { %1698 = vperm.xlu0 %3148, %v3053_v41   ;;  %1649 = vperm.xlu1 %3149, %v3051_v54   ;;  %v579_v41 = vrot.slane %v3006_v31, %v3262_v6  ;;  %v3060_v54 = vld [vmem:[%s5026_s5 + $0x88] sm:$0xf]  ;;  %v3065_v31 = vld [vmem:[%s5026_s5 + $0x98] sm:$0xf] }
  0x6d   : > { %1742 = vperm.xlu0 %3148, %v3055_v43   ;;  %1720 = vperm.xlu1 %3149, %v3054_v61   ;;  %v3001_v43 = vld [vmem:[%s5028_s7 + $0x8] sm:$0x3] }
  0x71   : > { %1777 = vperm.xlu0 %3148, %v3057_v45   ;;  %1764 = vperm.xlu1 %3149, %v3056_v16  }
  0x75   : > { %1821 = vperm.xlu0 %3148, %v3059_v47   ;;  %1799 = vperm.xlu1 %3149, %v3058_v36  }
  0x79   : > { %1865 = vperm.xlu0 %3148, %v3061_v49   ;;  %1843 = vperm.xlu1 %3149, %v3060_v54  }
  0x7d   : > { %1925 = vperm.xlu0 %3148, %v3064_v51  }
  0x81   : > { %1969 = vperm.xlu0 %3148, %v3066_v53   ;;  %v3002_v53 = vld [vmem:[%s5029_s8 + $0x6] sm:$0x3] }
  0x82   : > { %v508_v0 = vrot.slane %v3002_v53, %v3262_v6 }
  0x83   : > { %v632_v57 = vpop.permute.xlu1 %631  ;;  %v672_v58 = vpop.permute.xlu0 %671 }
  0x85   : > { %2004 = vperm.xlu0 %3148, %v3068_v56  }
  0x87   : > { %v591_v4 = vpop.permute.xlu0 %590  ;;  %v634_v8 = vpop.permute.xlu1 %633 }
  0x88   : > { %v636_v11 = vsel %vm635_vm0, %v632_v57, %v634_v8  ;;  %v640_v12 = vsel %vm635_vm0, %v634_v8, %v632_v57  ;;  %v494_v57 = vrot.slane %v3001_v43, %v3262_v6  ;;  %v3063_v8 = vld [vmem:[%s5026_s5 + $0x90] sm:$0xf] }
  0x89   : > { %v653_v17 = vmul.f32 %v646_v62, %v636_v11  ;;  %v654_v18 = vmul.f32 %v650_v63, %v640_v12  ;;  %2048 = vperm.xlu0 %3148, %v3070_v3   ;;  %v452_v11 = vrot.slane %v2999_v59, %v3262_v6  ;;  %v456_v12 = vrot.slane %v2999_v59, %v3264_v7 }
  0x8a   : > { %1903 = vperm.xlu1 %3149, %v3063_v8  }
  0x8b   : > { %v667_v25 = vmul.f32 %v660_v1, %v653_v17  ;;  %v668_v26 = vmul.f32 %v664_v5, %v654_v18  ;;  %v593_v27 = vpop.permute.xlu1 %592  ;;  %v674_v28 = vpop.permute.xlu0 %673  ;;  %v512_v1 = vrot.slane %v3002_v53, %v3264_v7  ;;  %v3000_v5 = vld [vmem:[%s5029_s8 + $0xa] sm:$0x3]  ;;  %v3084_v53 = vld [vmem:[%s5026_s5 + $0xdc] sm:$0xf] }
  0x8c   : > { %v595_v32 = vsel %vm594_vm1, %v591_v4, %v593_v27  ;;  %v599_v33 = vsel %vm594_vm1, %v593_v27, %v591_v4  ;;  %v676_v34 = vsel %vm675_vm2, %v672_v58, %v674_v28  ;;  %v680_v35 = vsel %vm675_vm2, %v674_v28, %v672_v58 }
  0x8d   : > { %669 = vst [vmem:[#allocation2 + $0x30] sm:$0xf] %v667_v25  ;;  %670 = vst [vmem:[#allocation2 + $0x18] sm:$0xf] %v668_v26  ;;  %v613_v37 = vmul.f32 %v606_v9, %v595_v32  ;;  %v614_v38 = vmul.f32 %v610_v13, %v599_v33  ;;  %v693_v39 = vmul.f32 %v686_v19, %v676_v34  ;;  %2118 = vperm.xlu0 %3148, %v3073_v24   ;;  %v2997_v13 = vld [vmem:[%s5028_s7 + $0x6] sm:$0x3] }
  0x8e   : > { %v694_v40 = vmul.f32 %v690_v20, %v680_v35  ;;  %v498_v58 = vrot.slane %v3001_v43, %v3264_v7  ;;  %v467_v18 = vrot.slane %v3000_v5, %v3262_v6  ;;  %v471_v19 = vrot.slane %v3000_v5, %v3264_v7  ;;  %v2998_v26 = vld [vmem:[%s5029_s8 + $0x8] sm:$0x3]  ;;  %v3081_v33 = vld [vmem:[%s5026_s5 + $0xd4] sm:$0xf]  ;;  %1947 = vperm.xlu1 %3149, %v3065_v31  }
  0x8f   : > { %v627_v45 = vmul.f32 %v620_v14, %v613_v37  ;;  %v628_v46 = vmul.f32 %v624_v21, %v614_v38  ;;  %v707_v47 = vmul.f32 %v700_v22, %v693_v39  ;;  %v553_v49 = vpop.permute.xlu1 %552  ;;  %v551_v50 = vpop.permute.xlu0 %550  ;;  %v3079_v14 = vld [vmem:[%s5026_s5 + $0xcc] sm:$0xf]  ;;  %v411_v25 = vrot.slane %v2997_v13, %v3262_v6  ;;  %v3087_v31 = vld [vmem:[%s5026_s5 + $0xe8] sm:$0xf] }
  0x90   : > { %v708_v48 = vmul.f32 %v704_v23, %v694_v40  ;;  %v555_v51 = vsel %vm554_vm3, %v551_v50, %v553_v49  ;;  %v559_v52 = vsel %vm554_vm3, %v553_v49, %v551_v50  ;;  %v426_v37 = vrot.slane %v2998_v26, %v3262_v6 }
  0x91   : > { %629 = vst [vmem:[#allocation2 + $0x10] sm:$0xf] %v627_v45  ;;  %630 = vst [vmem:[#allocation2 + $0x48] sm:$0xf] %v628_v46  ;;  %v572_v55 = vmul.f32 %v565_v29, %v555_v51  ;;  %v573_v56 = vmul.f32 %v569_v30, %v559_v52  ;;  %2162 = vperm.xlu0 %3148, %v3075_v44   ;;  %v415_v29 = vrot.slane %v2997_v13, %v3264_v7  ;;  %v2995_v30 = vld [vmem:[%s5028_s7 + $0x6] sm:$0x3] }
  0x92   : > { %709 = vst [vmem:[#allocation2 + $0x68] sm:$0xf] %v707_v47  ;;  %710 = vst [vmem:[#allocation2 + $0x60] sm:$0xf] %v708_v48  ;;  %v430_v38 = vrot.slane %v2998_v26, %v3264_v7  ;;  %v370_v44 = vrot.slane %v2995_v30, %v3262_v6  ;;  %v2996_v45 = vld [vmem:[%s5029_s8 + $0x6] sm:$0x3]  ;;  %v374_v50 = vrot.slane %v2995_v30, %v3264_v7 }
  0x93   : > { %v586_v61 = vmul.f32 %v579_v41, %v572_v55  ;;  %v587_v62 = vmul.f32 %v583_v42, %v573_v56  ;;  %v482_v63 = vpop.permute.xlu1 %481  ;;  %v479_v2 = vpop.permute.xlu0 %478  ;;  %v3067_v46 = vld [vmem:[%s5026_s5 + $0xa0] sm:$0xf]  ;;  %v3088_v13 = vld [vmem:[%s5026_s5 + $0xec] sm:$0xf]  ;;  %v3107_v30 = vld [vmem:[%s5026_s5 + $0x130] sm:$0xf] }
  0x94   : > { %v484_v3 = vsel %vm483_vm4, %v482_v63, %v479_v2  ;;  %v487_v4 = vsel %vm483_vm4, %v479_v2, %v482_v63  ;;  %v727_v32 = vld [vmem:[#allocation2 + $0x18] sm:$0xff]  ;;  %v726_v40 = vld [vmem:[#allocation2 + $0x30] sm:$0xff]  ;;  %v721_v52 = vld [vmem:[#allocation2 + $0x40] sm:$0xff]  ;;  %1982 = vperm.xlu1 %3149, %v3067_v46   ;;  %vm1121_vm1 = vcmask 1031168   ;;  %vm1157_vm2 = vcmask 1022976  }
  0x95   : > { %588 = vst [vmem:[#allocation2 + $0x50] sm:$0xf] %v586_v61  ;;  %589 = vst [vmem:[#allocation2 + $0x28] sm:$0xf] %v587_v62  ;;  %v501_v9 = vmul.f32 %v494_v57, %v487_v4  ;;  %v502_v10 = vmul.f32 %v498_v58, %v484_v3  ;;  %2197 = vperm.xlu0 %3148, %v3077_v60   ;;  %v385_v57 = vrot.slane %v2996_v45, %v3262_v6  ;;  %v720_v61 = vld [vmem:[#allocation2 + $0x88] sm:$0xff] }
  0x96   : > { %v389_v58 = vrot.slane %v2996_v45, %v3264_v7  ;;  %v3086_v4 = vld [vmem:[%s5026_s5 + $0xe4] sm:$0xf]  ;;  %v3097_v26 = vld [vmem:[%s5026_s5 + $0x10c] sm:$0xf]  ;;  %v3101_v45 = vld [vmem:[%s5026_s5 + $0x11c] sm:$0xf] }
  0x97   : > { %v515_v15 = vmul.f32 %v508_v0, %v501_v9  ;;  %v516_v16 = vmul.f32 %v512_v1, %v502_v10  ;;  %v441_v17 = vpop.permute.xlu1 %440  ;;  %v438_v20 = vpop.permute.xlu0 %437  ;;  %v3069_v0 = vld [vmem:[%s5026_s5 + $0xa8] sm:$0xf] }
  0x98   : > { %v443_v21 = vsel %vm442_vm5, %v441_v17, %v438_v20  ;;  %v446_v22 = vsel %vm442_vm5, %v438_v20, %v441_v17  ;;  %v725_v43 = vld [vmem:[#allocation2 + $0x48] sm:$0xff]  ;;  %v724_v49 = vld [vmem:[#allocation2 + $0x10] sm:$0xff]  ;;  %2026 = vperm.xlu1 %3149, %v3069_v0   ;;  %v3094_v17 = vld [vmem:[%s5026_s5 + $0x100] sm:$0xf]  ;;  %vm1193_vm5 = vcmask 1014784  }
  0x99   : > { %v729_v23 = vld [vmem:[#allocation2 + $0x60] sm:$0xff]  ;;  %v728_v24 = vld [vmem:[#allocation2 + $0x68] sm:$0xff]  ;;  %517 = vst [vmem:[#allocation2 + $0x70] sm:$0xf] %v515_v15  ;;  %518 = vst [vmem:[#allocation2 + $0x80] sm:$0xf] %v516_v16  ;;  %v459_v27 = vmul.f32 %v452_v11, %v446_v22  ;;  %v460_v28 = vmul.f32 %v456_v12, %v443_v21  ;;  %2241 = vperm.xlu0 %3148, %v3079_v14  }
  0x9a   : > { %754 = vmatprep.subr.mxu0 %v729_v23  ;;  %v3071_v12 = vld [vmem:[%s5026_s5 + $0xb0] sm:$0xf]  ;;  %v3074_v16 = vld [vmem:[%s5026_s5 + $0xb8] sm:$0xf]  ;;  %v3076_v21 = vld [vmem:[%s5026_s5 + $0xc0] sm:$0xf] }
  0x9b   : > { %755 = vmatpush1.msra.mxu0 %v728_v24  ;;  %v474_v34 = vmul.f32 %v467_v18, %v459_v27  ;;  %v475_v35 = vmul.f32 %v471_v19, %v460_v28  ;;  %v400_v36 = vpop.permute.xlu1 %399  ;;  %v397_v39 = vpop.permute.xlu0 %396  ;;  %v711_v18 = vld [vmem:[%s5022_s1] sm:$0xf]  ;;  %v3078_v23 = vld [vmem:[%s5026_s5 + $0xc8] sm:$0xf]  ;;  %v3083_v27 = vld [vmem:[%s5026_s5 + $0xd8] sm:$0xf] }
  0x9c   : > { %756 = vmatprep.subr.mxu0 %v727_v32  ;;  %v402_v41 = vsel %vm401_vm6, %v400_v36, %v397_v39  ;;  %v405_v42 = vsel %vm401_vm6, %v397_v39, %v400_v36  ;;  %v723_v51 = vld [vmem:[#allocation2 + $0x28] sm:$0xff]  ;;  %v722_v60 = vld [vmem:[#allocation2 + $0x50] sm:$0xff]  ;;  %2070 = vperm.xlu1 %3149, %v3071_v12   ;;  %v3103_v22 = vld [vmem:[%s5026_s5 + $0x120] sm:$0xf] }
  0x9d   : > { %757 = vmatpush1.msra.mxu0 %v726_v40  ;;  %476 = vst [vmem:[#allocation2 + $0x20] sm:$0xf] %v474_v34  ;;  %477 = vst [vmem:[#allocation2 + $0x8] sm:$0xf] %v475_v35  ;;  %v418_v47 = vmul.f32 %v411_v25, %v405_v42  ;;  %v419_v48 = vmul.f32 %v415_v29, %v402_v41  ;;  %2285 = vperm.xlu0 %3148, %v3081_v33   ;;  %v3096_v24 = vld [vmem:[%s5026_s5 + $0x108] sm:$0xf] }
  0x9e   : > { %758 = vmatprep.subr.mxu0 %v725_v43  ;;  %v3080_v25 = vld [vmem:[%s5026_s5 + $0xd0] sm:$0xf]  ;;  %v3085_v29 = vld [vmem:[%s5026_s5 + $0xe0] sm:$0xf]  ;;  %v3099_v32 = vld [vmem:[%s5026_s5 + $0x114] sm:$0xf] }
  0x9f   : > { %759 = vmatpush1.msra.mxu0 %v724_v49  ;;  %v433_v54 = vmul.f32 %v426_v37, %v418_v47  ;;  %v434_v55 = vmul.f32 %v430_v38, %v419_v48  ;;  %v358_v56 = vpop.permute.xlu1 %357  ;;  %v355_v59 = vpop.permute.xlu0 %354  ;;  %v3089_v28 = vld [vmem:[%s5026_s5 + $0xf0] sm:$0xf]  ;;  %v3093_v33 = vld [vmem:[%s5026_s5 + $0xfc] sm:$0xf]  ;;  %v3091_v34 = vld [vmem:[%s5026_s5 + $0xf8] sm:$0xf] }
  0xa0   : > { %760 = vmatprep.subr.mxu0 %v723_v51  ;;  %v360_v62 = vsel %vm359_vm7, %v358_v56, %v355_v59  ;;  %v363_v63 = vsel %vm359_vm7, %v355_v59, %v358_v56  ;;  %v719_v3 = vld [vmem:[#allocation2 + $0x80] sm:$0xff]  ;;  %v718_v9 = vld [vmem:[#allocation2 + $0x70] sm:$0xff]  ;;  %2140 = vperm.xlu1 %3149, %v3074_v16   ;;  %v3109_v35 = vld [vmem:[%s5026_s5 + $0x138] sm:$0xf] }
  0xa1   : > { %761 = vmatpush1.msra.mxu0 %v722_v60  ;;  %435 = vst [vmem:[#allocation2 + $0x78] sm:$0xf] %v433_v54  ;;  %436 = vst [vmem:[#allocation2 + $0x58] sm:$0xf] %v434_v55  ;;  %v377_v1 = vmul.f32 %v370_v44, %v363_v63  ;;  %v378_v2 = vmul.f32 %v374_v50, %v360_v62  ;;  %2356 = vperm.xlu0 %3148, %v3084_v53   ;;  %v3110_v36 = vld [vmem:[%s5026_s5 + $0x13c] sm:$0xf] }
  0xa2   : > { %762 = vmatprep.subr.mxu0 %v721_v52  ;;  %v3095_v37 = vld [vmem:[%s5026_s5 + $0x104] sm:$0xf]  ;;  %v3105_v39 = vld [vmem:[%s5026_s5 + $0x128] sm:$0xf]  ;;  %v3106_v40 = vld [vmem:[%s5026_s5 + $0x12c] sm:$0xf] }
  0xa3   : > { %763 = vmatpush1.msra.mxu0 %v720_v61  ;;  %v392_v5 = vmul.f32 %v385_v57, %v377_v1  ;;  %v393_v8 = vmul.f32 %v389_v58, %v378_v2  ;;  %v3104_v38 = vld [vmem:[%s5026_s5 + $0x124] sm:$0xf]  ;;  %v3098_v41 = vld [vmem:[%s5026_s5 + $0x110] sm:$0xf]  ;;  %v3090_v42 = vld [vmem:[%s5026_s5 + $0xf4] sm:$0xf] }
  0xa4   : > { %764 = vmatprep.subr.mxu0 %v719_v3  ;;  %v717_v10 = vld [vmem:[#allocation2 + $0x8] sm:$0xff]  ;;  %v716_v11 = vld [vmem:[#allocation2 + $0x20] sm:$0xff]  ;;  %2184 = vperm.xlu1 %3149, %v3076_v21   ;;  %v3108_v43 = vld [vmem:[%s5026_s5 + $0x134] sm:$0xf] }
  0xa5   : > { %765 = vmatpush1.msra.mxu0 %v718_v9  ;;  %394 = vst [vmem:[#allocation2] sm:$0xf] %v392_v5  ;;  %395 = vst [vmem:[#allocation2 + $0x38] sm:$0xf] %v393_v8  ;;  %2400 = vperm.xlu0 %3148, %v3086_v4   ;;  %v3100_v44 = vld [vmem:[%s5026_s5 + $0x118] sm:$0xf] }
  0xa6   : > { %766 = vmatprep.subr.mxu0 %v717_v10  ;;  %v813_v53 = vld [vmem:[%s5024_s3] sm:$0xf] }
  0xa7   : > { %767 = vmatpush1.msra.mxu0 %v716_v11 }
  0xa8   : > { %v715_v14 = vld [vmem:[#allocation2 + $0x58] sm:$0xff]  ;;  %2219 = vperm.xlu1 %3149, %v3078_v23  }
  0xa9   : > { %v714_v15 = vld [vmem:[#allocation2 + $0x78] sm:$0xff]  ;;  %768 = vmatprep.subr.mxu0 %v715_v14  ;;  %2435 = vperm.xlu0 %3148, %v3088_v13  }
  0xaa   : > { %769 = vmatpush1.msra.mxu0 %v714_v15 }
  0xac   : > { %v713_v19 = vld [vmem:[#allocation2 + $0x38] sm:$0xff]  ;;  %v712_v20 = vld [vmem:[#allocation2] sm:$0xff]  ;;  %2263 = vperm.xlu1 %3149, %v3080_v25   ;;  %v734_v47 = vpop.permute.xlu0 %733  ;;  %v3641_v54 = vpop.permute.xlu1 %817 }
  0xad   : > { %770 = vmatprep.subr.mxu0 %v713_v19  ;;  %2573 = vperm.xlu0 %3148, %v3094_v17  }
  0xae   : > { %771 = vmatpush1.msra.mxu0 %v712_v20 }
  0xaf   : > { %3013 = vmatmul.mubr.msk.f32.vlgmr.msra.gmra.mxu0 %vm736_vm8, %v711_v18 }
  0xb0   : > { %2334 = vperm.xlu1 %3149, %v3083_v27   ;;  %v3643_v55 = vpop.permute.xlu0 %979  ;;  %v3645_v56 = vpop.permute.xlu1 %943 }
  0xb1   : > { %2751 = vperm.xlu0 %3148, %v3103_v22  }
  0xb4   : > { %2378 = vperm.xlu1 %3149, %v3085_v29   ;;  %v3647_v57 = vpop.permute.xlu0 %1049  ;;  %v3649_v58 = vpop.permute.xlu1 %1015 }
  0xb5   : > { %2617 = vperm.xlu0 %3148, %v3096_v24  }
  0xb8   : > { %2413 = vperm.xlu1 %3149, %v3087_v31   ;;  %v3651_v59 = vpop.permute.xlu0 %1108  ;;  %v3653_v60 = vpop.permute.xlu1 %1074 }
  0xb9   : > { %2630 = vperm.xlu0 %3148, %v3097_v26  }
  0xbc   : > { %2551 = vperm.xlu1 %3149, %v3093_v33   ;;  %v3655_v61 = vpop.permute.xlu0 %1180  ;;  %v3657_v62 = vpop.permute.xlu1 %1144 }
  0xbd   : > { %2457 = vperm.xlu0 %3148, %v3089_v28   ;;  %5156 = vst [vmem:[#allocation7_spill] sm:$0xff] %v3655_v61 }
  0xc0   : > { %2595 = vperm.xlu1 %3149, %v3095_v37   ;;  %v3659_v63 = vpop.permute.xlu0 %1265  ;;  %v3661_v0 = vpop.permute.xlu1 %1216 }
  0xc1   : > { %2812 = vperm.xlu0 %3148, %v3107_v30   ;;  %5157 = vst [vmem:[#allocation8_spill] sm:$0xff] %v3661_v0 }
  0xc4   : > { %2767 = vperm.xlu1 %3149, %v3104_v38   ;;  %v3663_v1 = vpop.permute.xlu0 %1309  ;;  %v3665_v2 = vpop.permute.xlu1 %1287 }
  0xc5   : > { %2674 = vperm.xlu0 %3148, %v3099_v32  }
  0xc8   : > { %2783 = vperm.xlu1 %3149, %v3105_v39   ;;  %v3667_v3 = vpop.permute.xlu0 %1344  ;;  %v3669_v4 = vpop.permute.xlu1 %1331 }
  0xc9   : > { %2501 = vperm.xlu0 %3148, %v3091_v34  }
  0xcc   : > { %2799 = vperm.xlu1 %3149, %v3106_v40   ;;  %v3671_v5 = vpop.permute.xlu0 %1388  ;;  %v3673_v8 = vpop.permute.xlu1 %1366 }
  0xcd   : > { %2844 = vperm.xlu0 %3148, %v3109_v35   ;;  %5158 = vst [vmem:[#allocation9_spill] sm:$0xff] %v3671_v5 }
  0xd0   : > { %2652 = vperm.xlu1 %3149, %v3098_v41   ;;  %v3675_v9 = vpop.permute.xlu0 %1432  ;;  %v3677_v10 = vpop.permute.xlu1 %1410 }
  0xd1   : > { %2860 = vperm.xlu0 %3148, %v3110_v36   ;;  %5159 = vst [vmem:[#allocation10_spill] sm:$0xff] %v3675_v9  ;;  %5160 = vst [vmem:[#allocation11_spill] sm:$0xff] %v3677_v10 }
  0xd4   : > { %2479 = vperm.xlu1 %3149, %v3090_v42   ;;  %v3679_v11 = vpop.permute.xlu0 %1504  ;;  %v3681_v12 = vpop.permute.xlu1 %1482 }
  0xd5   : > { %5161 = vst [vmem:[#allocation12_spill] sm:$0xff] %v3679_v11  ;;  %5162 = vst [vmem:[#allocation13_spill] sm:$0xff] %v3681_v12  ;;  %v3028_v12 = vld [vmem:[%s5029_s8 + $0xc] sm:$0x3] }
  0xd8   : > { %2828 = vperm.xlu1 %3149, %v3108_v43   ;;  %v3683_v13 = vpop.permute.xlu0 %1548  ;;  %v3685_v14 = vpop.permute.xlu1 %1526 }
  0xd9   : > { %5163 = vst [vmem:[#allocation14_spill] sm:$0xff] %v3683_v13  ;;  %5164 = vst [vmem:[#allocation15_spill] sm:$0xff] %v3685_v14 }
  0xdc   : > { %2696 = vperm.xlu1 %3149, %v3100_v44   ;;  %v3687_v15 = vpop.permute.xlu0 %1583  ;;  %v3689_v16 = vpop.permute.xlu1 %1561 }
  0xdd   : > { %5165 = vst [vmem:[#allocation16_spill] sm:$0xff] %v3687_v15  ;;  %5166 = vst [vmem:[#allocation17_spill] sm:$0xff] %v3689_v16 }
  0xe0   : > { %2718 = vperm.xlu1 %3149, %v3101_v45   ;;  %v3691_v17 = vpop.permute.xlu0 %1627  ;;  %v3693_v18 = vpop.permute.xlu1 %1605 }
  0xe1   : > { %5167 = vst [vmem:[#allocation18_spill] sm:$0xff] %v3691_v17  ;;  %5168 = vst [vmem:[#allocation19_spill] sm:$0xff] %v3693_v18 }
  0xe4   : > { %v3695_v19 = vpop.permute.xlu0 %1698  ;;  %v3697_v20 = vpop.permute.xlu1 %1649 }
  0xe5   : > { %5169 = vst [vmem:[#allocation20_spill] sm:$0xff] %v3695_v19  ;;  %5170 = vst [vmem:[#allocation21_spill] sm:$0xff] %v3697_v20  ;;  %v3020_v20 = vld [vmem:[%s5029_s8 + $0x4] sm:$0x3] }
  0xe6   : > { %v4117_v18 = vrot.slane %v3020_v20, %v3262_v6 }
  0xe8   : > { %v3699_v21 = vpop.permute.xlu0 %1742  ;;  %v3701_v22 = vpop.permute.xlu1 %1720 }
  0xe9   : > { %5171 = vst [vmem:[#allocation22_spill] sm:$0xff] %v3699_v21  ;;  %5172 = vst [vmem:[#allocation23_spill] sm:$0xff] %v3701_v22 }
  0xec   : > { %v3703_v23 = vpop.permute.xlu0 %1777  ;;  %v3705_v24 = vpop.permute.xlu1 %1764 }
  0xed   : > { %5173 = vst [vmem:[#allocation24_spill] sm:$0xff] %v3703_v23  ;;  %5174 = vst [vmem:[#allocation25_spill] sm:$0xff] %v3705_v24 }
  0xf0   : > { %v3707_v25 = vpop.permute.xlu0 %1821  ;;  %v3709_v26 = vpop.permute.xlu1 %1799 }
  0xf1   : > { %5175 = vst [vmem:[#allocation26_spill] sm:$0xff] %v3707_v25  ;;  %5176 = vst [vmem:[#allocation27_spill] sm:$0xff] %v3709_v26 }
  0xf4   : > { %v3711_v27 = vpop.permute.xlu0 %1865  ;;  %v3713_v28 = vpop.permute.xlu1 %1843 }
  0xf5   : > { %5177 = vst [vmem:[#allocation28_spill] sm:$0xff] %v3711_v27  ;;  %5178 = vst [vmem:[#allocation29_spill] sm:$0xff] %v3713_v28 }
  0xf8   : > { %v3715_v29 = vpop.permute.xlu0 %1925 }
  0xf9   : > { %5179 = vst [vmem:[#allocation30_spill] sm:$0xff] %v3715_v29  ;;  %v3026_v29 = vld [vmem:[%s5029_s8 + $0xa] sm:$0x3] }
  0xfa   : > { %v4134_v15 = vrot.slane %v3026_v29, %v3264_v7 }
  0xfc   : > { %v3719_v31 = vpop.permute.xlu0 %1969 }
  0xfd   : > { %5181 = vst [vmem:[#allocation32_spill] sm:$0xff] %v3719_v31 }
 0x100   : > { %v3723_v34 = vpop.permute.xlu0 %2004 }
 0x101   : > { %5183 = vst [vmem:[#allocation34_spill] sm:$0xff] %v3723_v34 }
 0x104   : > { %v3733_v38 = vpop.permute.xlu0 %2048 }
 0x105   : > { %v3717_v30 = vpop.permute.xlu1 %1903  ;;  %5186 = vst [vmem:[#allocation37_spill] sm:$0xff] %v3733_v38 }
 0x106   : > { %5180 = vst [vmem:[#allocation31_spill] sm:$0xff] %v3717_v30  ;;  %v927_v30 = vld [vmem:[%s5029_s8] sm:$0x3] }
 0x108   : > { %v3740_v40 = vpop.permute.xlu0 %2118 }
 0x109   : > { %v3721_v32 = vpop.permute.xlu1 %1947  ;;  %5188 = vst [vmem:[#allocation39_spill] sm:$0xff] %v3740_v40 }
 0x10a   : > { %5182 = vst [vmem:[#allocation33_spill] sm:$0xff] %v3721_v32 }
 0x10c   : > { %v3752_v42 = vpop.permute.xlu0 %2162 }
 0x10d   : > { %5190 = vst [vmem:[#allocation41_spill] sm:$0xff] %v3752_v42 }
 0x10f   : > { %v3725_v35 = vpop.permute.xlu1 %1982 }
 0x110   : > { %5184 = vst [vmem:[#allocation35_spill] sm:$0xff] %v3725_v35 }
 0x113   : > { %v3735_v39 = vpop.permute.xlu1 %2026 }
 0x114   : > { %5187 = vst [vmem:[#allocation38_spill] sm:$0xff] %v3735_v39 }
 0x117   : > { %v3742_v41 = vpop.permute.xlu1 %2070 }
 0x118   : > { %5189 = vst [vmem:[#allocation40_spill] sm:$0xff] %v3742_v41 }
 0x11b   : > { %v3754_v43 = vpop.permute.xlu1 %2140 }
 0x11c   : > { %5191 = vst [vmem:[#allocation42_spill] sm:$0xff] %v3754_v43 }
 0x16f   : > { %v806_v46 = vpop.f32.mrf.mxu0 }
 0x170   : > { %v3627_v48 = vadd.f32 %v806_v46, %v734_v47  ;;  %v3761_v46 = vpop.permute.xlu0 %2197 }
 0x171   : > { %v808_v49 = vpop.f32.mrf.mxu0  ;;  %5192 = vst [vmem:[#allocation43_spill] sm:$0xff] %v3761_v46 }
 0x172   : > { %5154 = vst [vmem:[#allocation5_spill] sm:$0xff] %v3627_v48  ;;  %v3629_v50 = vadd.f32 %v808_v49, %v734_v47  ;;  %v5032_v52 = vmax.f32 %v3627_v48, 0.0  ;;  %v3763_v47 = vpop.permute.xlu1 %2184 }
 0x173   : > { %5193 = vst [vmem:[#allocation44_spill] sm:$0xff] %v3763_v47 }
 0x174   : > { %5155 = vst [vmem:[#allocation6_spill] sm:$0xff] %v3629_v50  ;;  %v5031_v51 = vmax.f32 %v3629_v50, 0.0 }
 0x176   : > { %3014 = vmatprep.subr.msk.mxu1 %vm824_vm9, %v5031_v51 }
 0x177   : > { %3015 = vmatpush1.msk.msra.mxu1 %vm824_vm9, %v5032_v52 }
 0x178   : > { %3016 = vmatmul.mubr.msk.f32.vlgmr.msra.gmra.mxu1 %vm820_vm10, %v813_v53  ;;  %v3774_v53 = vpop.permute.xlu0 %2241 }
 0x179   : > { %5195 = vst [vmem:[#allocation46_spill] sm:$0xff] %v3774_v53 }
 0x238   : > { %v897_v33 = vpop.f32.mrf.mxu1 }
 0x239   : > { %v898_v36 = vadd.f32 %v897_v33, %v3641_v54  ;;  %v3780_v33 = vpop.permute.xlu0 %2285 }
 0x23a   : > { %v899_v44 = vpop.f32.mrf.mxu1  ;;  %5197 = vst [vmem:[#allocation48_spill] sm:$0xff] %v3780_v33 }
 0x23b   : > { %v3728_v37 = vmax.f32 %v898_v36, 0.0  ;;  %v900_v45 = vadd.f32 %v899_v44, %v3641_v54  ;;  %v3776_v54 = vpop.permute.xlu1 %2219 }
 0x23c   : > { %5196 = vst [vmem:[#allocation47_spill] sm:$0xff] %v3776_v54 }
 0x23d   : > { %5185 = vst [vmem:[#allocation36_spill] sm:$0xff] %v3728_v37  ;;  %1242 = vrot.lane.b32.xlu1 %v3728_v37, %s3177_s14  ;;  %909 = vrot.lane.b32.xlu0 %v3728_v37, %s3178_s15  ;;  %v3769_v49 = vmax.f32 %v900_v45, 0.0  ;;  %v3791_v44 = vpop.permute.xlu0 %2356 }
 0x23e   : > { %5199 = vst [vmem:[#allocation50_spill] sm:$0xff] %v3791_v44 }
 0x23f   : > { %5194 = vst [vmem:[#allocation45_spill] sm:$0xff] %v3769_v49  ;;  %v3782_v36 = vpop.permute.xlu1 %2263 }
 0x240   : > { %5198 = vst [vmem:[#allocation49_spill] sm:$0xff] %v3782_v36 }
 0x241   : > { %1676 = vrot.lane.b32.xlu1 %v3728_v37, %s3175_s26  ;;  %1459 = vrot.lane.b32.xlu0 %v3728_v37, %s3179_s17  ;;  %v3799_v51 = vpop.permute.xlu0 %2400 }
 0x242   : > { %5201 = vst [vmem:[#allocation52_spill] sm:$0xff] %v3799_v51 }
 0x243   : > { %v3793_v45 = vpop.permute.xlu1 %2334 }
 0x244   : > { %5200 = vst [vmem:[#allocation51_spill] sm:$0xff] %v3793_v45 }
 0x245   : > { %1915 = vrot.lane.b32.xlu1 %v3728_v37, %s3180_s18  ;;  %1893 = vrot.lane.b32.xlu0 %v3728_v37, %s3181_s19  ;;  %v3811_v50 = vpop.permute.xlu0 %2435 }
 0x246   : > { %5203 = vst [vmem:[#allocation54_spill] sm:$0xff] %v3811_v50 }
 0x247   : > { %v3801_v52 = vpop.permute.xlu1 %2378 }
 0x248   : > { %5202 = vst [vmem:[#allocation53_spill] sm:$0xff] %v3801_v52 }
 0x249   : > { %1959 = vrot.lane.b32.xlu1 %v3728_v37, %s3173_s24  ;;  %1937 = vrot.lane.b32.xlu0 %v3728_v37, %s3182_s20  ;;  %v3818_v51 = vpop.permute.xlu0 %2573 }
 0x24a   : > { %5205 = vst [vmem:[#allocation56_spill] sm:$0xff] %v3818_v51 }
 0x24b   : > { %v3813_v48 = vpop.permute.xlu1 %2413 }
 0x24c   : > { %5204 = vst [vmem:[#allocation55_spill] sm:$0xff] %v3813_v48 }
 0x24d   : > { %2013 = vrot.lane.b32.xlu1 %v3728_v37, %s3183_s21  ;;  %1991 = vrot.lane.b32.xlu0 %v3728_v37, %s3172_s23  ;;  %v3825_v45 = vpop.permute.xlu0 %2751 }
 0x24e   : > { %5207 = vst [vmem:[#allocation58_spill] sm:$0xff] %v3825_v45 }
 0x24f   : > { %v3820_v52 = vpop.permute.xlu1 %2551 }
 0x250   : > { %5206 = vst [vmem:[#allocation57_spill] sm:$0xff] %v3820_v52 }
 0x251   : > { %2057 = vrot.lane.b32.xlu1 %v3728_v37, %s3184_s22  ;;  %2035 = vrot.lane.b32.xlu0 %v3728_v37, %s3185_s25  ;;  %v3829_v50 = vpop.permute.xlu0 %2617 }
 0x252   : > { %5209 = vst [vmem:[#allocation60_spill] sm:$0xff] %v3829_v50 }
 0x253   : > { %v3827_v44 = vpop.permute.xlu1 %2595 }
 0x254   : > { %5208 = vst [vmem:[#allocation59_spill] sm:$0xff] %v3827_v44 }
 0x255   : > { %905 = vrot.lane.b32.xlu1 %v3769_v49, %s3178_s15  ;;  %2093 = vrot.lane.b32.xlu0 %v3728_v37, %s3169_s16  ;;  %v3833_v33 = vpop.permute.xlu0 %2630 }
 0x256   : > { %5211 = vst [vmem:[#allocation62_spill] sm:$0xff] %v3833_v33 }
 0x257   : > { %v3831_v48 = vpop.permute.xlu1 %2767 }
 0x258   : > { %5210 = vst [vmem:[#allocation61_spill] sm:$0xff] %v3831_v48 }
 0x259   : > { %1456 = vrot.lane.b32.xlu1 %v3769_v49, %s3179_s17  ;;  %2308 = vrot.lane.b32.xlu0 %v3728_v37, %s3186_s27  ;;  %v3837_v51 = vpop.permute.xlu0 %2457 }
 0x25a   : > { %5213 = vst [vmem:[#allocation64_spill] sm:$0xff] %v3837_v51 }
 0x25b   : > { %v3835_v36 = vpop.permute.xlu1 %2783 }
 0x25c   : > { %5212 = vst [vmem:[#allocation63_spill] sm:$0xff] %v3835_v36 }
 0x25d   : > { %1890 = vrot.lane.b32.xlu1 %v3769_v49, %s3181_s19  ;;  %2525 = vrot.lane.b32.xlu0 %v3728_v37, %s3187_s28  ;;  %v3841_v53 = vpop.permute.xlu0 %2812 }
 0x25e   : > { %5215 = vst [vmem:[#allocation66_spill] sm:$0xff] %v3841_v53 }
 0x25f   : > { %v3839_v52 = vpop.permute.xlu1 %2799 }
 0x260   : > { %5214 = vst [vmem:[#allocation65_spill] sm:$0xff] %v3839_v52 }
 0x261   : > { %1934 = vrot.lane.b32.xlu1 %v3769_v49, %s3182_s20  ;;  %1239 = vrot.lane.b32.xlu0 %v3769_v49, %s3177_s14  ;;  %v3845_v46 = vpop.permute.xlu0 %2674 }
 0x262   : > { %5217 = vst [vmem:[#allocation68_spill] sm:$0xff] %v3845_v46 }
 0x263   : > { %v3843_v54 = vpop.permute.xlu1 %2652 }
 0x264   : > { %5216 = vst [vmem:[#allocation67_spill] sm:$0xff] %v3843_v54 }
 0x265   : > { %1993 = vrot.lane.b32.xlu1 %v3769_v49, %s3172_s23  ;;  %1673 = vrot.lane.b32.xlu0 %v3769_v49, %s3175_s26  ;;  %v3849_v44 = vpop.permute.xlu0 %2501 }
 0x266   : > { %5219 = vst [vmem:[#allocation70_spill] sm:$0xff] %v3849_v44 }
 0x267   : > { %v3847_v45 = vpop.permute.xlu1 %2479 }
 0x268   : > { %5218 = vst [vmem:[#allocation69_spill] sm:$0xff] %v3847_v45 }
 0x269   : > { %2037 = vrot.lane.b32.xlu1 %v3769_v49, %s3185_s25  ;;  %1912 = vrot.lane.b32.xlu0 %v3769_v49, %s3180_s18  ;;  %v3853_v48 = vpop.permute.xlu0 %2844 }
 0x26a   : > { %5221 = vst [vmem:[#allocation72_spill] sm:$0xff] %v3853_v48 }
 0x26b   : > { %v3851_v50 = vpop.permute.xlu1 %2828 }
 0x26c   : > { %5220 = vst [vmem:[#allocation71_spill] sm:$0xff] %v3851_v50 }
 0x26d   : > { %2095 = vrot.lane.b32.xlu1 %v3769_v49, %s3169_s16  ;;  %1956 = vrot.lane.b32.xlu0 %v3769_v49, %s3173_s24  ;;  %v3857_v36 = vpop.permute.xlu0 %2860 }
 0x26e   : > { %5223 = vst [vmem:[#allocation74_spill] sm:$0xff] %v3857_v36 }
 0x26f   : > { %v3855_v33 = vpop.permute.xlu1 %2696 }
 0x270   : > { %5222 = vst [vmem:[#allocation73_spill] sm:$0xff] %v3855_v33 }
 0x271   : > { %2310 = vrot.lane.b32.xlu1 %v3769_v49, %s3186_s27  ;;  %2015 = vrot.lane.b32.xlu0 %v3769_v49, %s3183_s21 }
 0x273   : > { %v3859_v51 = vpop.permute.xlu1 %2718 }
 0x274   : > { %5224 = vst [vmem:[#allocation75_spill] sm:$0xff] %v3859_v51 }
 0x275   : > { %2527 = vrot.lane.b32.xlu1 %v3769_v49, %s3187_s28  ;;  %2059 = vrot.lane.b32.xlu0 %v3769_v49, %s3184_s22 }
 0x2af   : > { %v1243_v52 = vpop.permute.xlu1 %1242  ;;  %v910_v53 = vpop.permute.xlu0 %909 }
 0x2b3   : > { %v3861_v47 = vpop.permute.xlu1 %1676  ;;  %v1460_v54 = vpop.permute.xlu0 %1459 }
 0x2b7   : > { %v3863_v46 = vpop.permute.xlu1 %1915  ;;  %v3865_v45 = vpop.permute.xlu0 %1893 }
 0x2b8   : > { %5225 = vst [vmem:[#allocation76_spill] sm:$0xff] %v3863_v46  ;;  %5226 = vst [vmem:[#allocation77_spill] sm:$0xff] %v3865_v45  ;;  %v4111_v45 = vrot.slane %v927_v30, %v3262_v6  ;;  %v3018_v46 = vld [vmem:[%s5029_s8 + $0x2] sm:$0x3] }
 0x2b9   : > { %v4156_v14 = vrot.slane %v3018_v46, %v3264_v7 }
 0x2bb   : > { %v3867_v44 = vpop.permute.xlu1 %1959  ;;  %v3871_v48 = vpop.permute.xlu0 %1937 }
 0x2bc   : > { %5227 = vst [vmem:[#allocation78_spill] sm:$0xff] %v3867_v44  ;;  %5229 = vst [vmem:[#allocation80_spill] sm:$0xff] %v3871_v48  ;;  %v3030_v48 = vld [vmem:[%s5029_s8 + $0xe] sm:$0x3] }
 0x2bd   : > { %v4139_v16 = vrot.slane %v3030_v48, %v3262_v6  ;;  %v4142_v13 = vrot.slane %v3030_v48, %v3264_v7 }
 0x2bf   : > { %v3869_v50 = vpop.permute.xlu1 %2013  ;;  %v3875_v36 = vpop.permute.xlu0 %1991 }
 0x2c0   : > { %5228 = vst [vmem:[#allocation79_spill] sm:$0xff] %v3869_v50  ;;  %5231 = vst [vmem:[#allocation82_spill] sm:$0xff] %v3875_v36 }
 0x2c3   : > { %v3873_v33 = vpop.permute.xlu1 %2057  ;;  %v3885_v40 = vpop.permute.xlu0 %2035 }
 0x2c4   : > { %5230 = vst [vmem:[#allocation81_spill] sm:$0xff] %v3873_v33  ;;  %5234 = vst [vmem:[#allocation85_spill] sm:$0xff] %v3885_v40 }
 0x2c7   : > { %v906_v51 = vpop.permute.xlu1 %905 }
 0x2c8   : > { %v3877_v42 = vsel %vm911_vm11, %v910_v53, %v906_v51  ;;  %v3879_v43 = vsel %vm911_vm11, %v906_v51, %v910_v53  ;;  %v3895_v51 = vpop.permute.xlu0 %2093 }
 0x2c9   : > { %5232 = vst [vmem:[#allocation83_spill] sm:$0xff] %v3877_v42  ;;  %5233 = vst [vmem:[#allocation84_spill] sm:$0xff] %v3879_v43  ;;  %921 = vrot.lane.b32.xlu0 %v3879_v43, %s3181_s19  ;;  %917 = vrot.lane.b32.xlu1 %v3877_v42, %s3181_s19 }
 0x2cc   : > { %v3901_v53 = vpop.permute.xlu0 %2308 }
 0x2cd   : > { %952 = vrot.lane.b32.xlu0 %v3877_v42, %s3180_s18  ;;  %955 = vrot.lane.b32.xlu1 %v3879_v43, %s3180_s18 }
 0x2d0   : > { %v3911_v27 = vpop.permute.xlu0 %2525 }
 0x2d1   : > { %991 = vrot.lane.b32.xlu0 %v3879_v43, %s3182_s20  ;;  %988 = vrot.lane.b32.xlu1 %v3877_v42, %s3182_s20  ;;  %5235 = vst [vmem:[#allocation86_spill] sm:$0xff] %v3911_v27 }
 0x2d4   : > { %v1240_v41 = vpop.permute.xlu0 %1239 }
 0x2d5   : > { %1024 = vrot.lane.b32.xlu0 %v3877_v42, %s3173_s24  ;;  %1027 = vrot.lane.b32.xlu1 %v3879_v43, %s3173_s24  ;;  %v3921_v28 = vsel %vm1244_vm12, %v1243_v52, %v1240_v41  ;;  %v3923_v38 = vsel %vm1244_vm12, %v1240_v41, %v1243_v52  ;;  %v1457_v52 = vpop.permute.xlu1 %1456 }
 0x2d6   : > { %v3957_v41 = vsel %vm1461_vm13, %v1457_v52, %v1460_v54  ;;  %v3959_v25 = vsel %vm1461_vm13, %v1460_v54, %v1457_v52 }
 0x2d7   : > { %5236 = vst [vmem:[#allocation87_spill] sm:$0xff] %v3957_v41  ;;  %5237 = vst [vmem:[#allocation88_spill] sm:$0xff] %v3959_v25 }
 0x2d8   : > { %v1674_v39 = vpop.permute.xlu0 %1673 }
 0x2d9   : > { %1083 = vrot.lane.b32.xlu0 %v3879_v43, %s3172_s23  ;;  %1085 = vrot.lane.b32.xlu1 %v3877_v42, %s3172_s23  ;;  %v3973_v54 = vpop.permute.xlu1 %1890  ;;  %v4005_v24 = vsel %vm401_vm6, %v3861_v47, %v1674_v39  ;;  %v4009_v50 = vsel %vm401_vm6, %v1674_v39, %v3861_v47  ;;  %vm2529_vm6 = vcmask 654336  }
 0x2da   : > { %5238 = vst [vmem:[#allocation89_spill] sm:$0xff] %v3973_v54  ;;  %5243 = vst [vmem:[#allocation94_spill] sm:$0xff] %v4005_v24  ;;  %v4114_v54 = vrot.slane %v927_v30, %v3264_v7  ;;  %v4131_v30 = vrot.slane %v3026_v29, %v3262_v6  ;;  %v4153_v29 = vrot.slane %v3018_v46, %v3262_v6 }
 0x2db   : > { %5244 = vst [vmem:[#allocation95_spill] sm:$0xff] %v4009_v50 }
 0x2dc   : > { %v3997_v40 = vpop.permute.xlu0 %1912 }
 0x2dd   : > { %1119 = vrot.lane.b32.xlu0 %v3877_v42, %s3183_s21  ;;  %1117 = vrot.lane.b32.xlu1 %v3879_v43, %s3183_s21  ;;  %v3979_v52 = vpop.permute.xlu1 %1934  ;;  %5242 = vst [vmem:[#allocation93_spill] sm:$0xff] %v3997_v40  ;;  %v4128_v40 = vrot.slane %v3020_v20, %v3264_v7 }
 0x2de   : > { %5239 = vst [vmem:[#allocation90_spill] sm:$0xff] %v3979_v52 }
 0x2e0   : > { %v4015_v23 = vpop.permute.xlu0 %1956 }
 0x2e1   : > { %1153 = vrot.lane.b32.xlu0 %v3879_v43, %s3185_s25  ;;  %1155 = vrot.lane.b32.xlu1 %v3877_v42, %s3185_s25  ;;  %v3989_v33 = vpop.permute.xlu1 %1993  ;;  %5245 = vst [vmem:[#allocation96_spill] sm:$0xff] %v4015_v23 }
 0x2e2   : > { %5240 = vst [vmem:[#allocation91_spill] sm:$0xff] %v3989_v33 }
 0x2e4   : > { %v4023_v21 = vpop.permute.xlu0 %2015 }
 0x2e5   : > { %1191 = vrot.lane.b32.xlu0 %v3877_v42, %s3184_s22  ;;  %1189 = vrot.lane.b32.xlu1 %v3879_v43, %s3184_s22  ;;  %v3995_v26 = vpop.permute.xlu1 %2037  ;;  %5246 = vst [vmem:[#allocation97_spill] sm:$0xff] %v4023_v21 }
 0x2e6   : > { %5241 = vst [vmem:[#allocation92_spill] sm:$0xff] %v3995_v26 }
 0x2e8   : > { %v4035_v47 = vpop.permute.xlu0 %2059 }
 0x2e9   : > { %1251 = vrot.lane.b32.xlu0 %v3921_v28, %s3181_s19  ;;  %1255 = vrot.lane.b32.xlu1 %v3923_v38, %s3181_s19  ;;  %v2096_v26 = vpop.permute.xlu1 %2095  ;;  %5248 = vst [vmem:[#allocation99_spill] sm:$0xff] %v4035_v47 }
 0x2ea   : > { %v4059_v32 = vsel %vm635_vm0, %v2096_v26, %v3895_v51  ;;  %v4063_v44 = vsel %vm635_vm0, %v3895_v51, %v2096_v26  ;;  %v3024_v51 = vld [vmem:[%s5029_s8 + $0x8] sm:$0x3]  ;;  %vm2312_vm0 = vcmask 785408  }
 0x2eb   : > { %v4103_v52 = vrot.slane %v3024_v51, %v3262_v6  ;;  %v4106_v49 = vrot.slane %v3024_v51, %v3264_v7  ;;  %v3022_v51 = vld [vmem:[%s5029_s8 + $0x6] sm:$0x3] }
 0x2ec   : > { %v4159_v11 = vrot.slane %v3022_v51, %v3262_v6  ;;  %v4162_v48 = vrot.slane %v3022_v51, %v3264_v7 }
 0x2ed   : > { %1277 = vrot.lane.b32.xlu0 %v3923_v38, %s3180_s18  ;;  %1274 = vrot.lane.b32.xlu1 %v3921_v28, %s3180_s18  ;;  %v4021_v34 = vpop.permute.xlu1 %2310  ;;  %v1070_v51 = vmul.f32 %v4103_v52, %v3879_v43  ;;  %v4200_v43 = vrot.slane %v3028_v12, %v3264_v7 }
 0x2f1   : > { %1296 = vrot.lane.b32.xlu0 %v3921_v28, %s3182_s20  ;;  %1299 = vrot.lane.b32.xlu1 %v3923_v38, %s3182_s20  ;;  %v4033_v39 = vpop.permute.xlu1 %2527 }
 0x2f2   : > { %5247 = vst [vmem:[#allocation98_spill] sm:$0xff] %v4033_v39  ;;  %v1071_v39 = vmul.f32 %v4106_v49, %v3877_v42 }
 0x2f5   : > { %1321 = vrot.lane.b32.xlu0 %v3923_v38, %s3173_s24  ;;  %1318 = vrot.lane.b32.xlu1 %v3921_v28, %s3173_s24 }
 0x2f9   : > { %1355 = vrot.lane.b32.xlu0 %v3921_v28, %s3172_s23  ;;  %1353 = vrot.lane.b32.xlu1 %v3923_v38, %s3172_s23 }
 0x2fd   : > { %1375 = vrot.lane.b32.xlu0 %v3923_v38, %s3183_s21  ;;  %1377 = vrot.lane.b32.xlu1 %v3921_v28, %s3183_s21 }
 0x301   : > { %1399 = vrot.lane.b32.xlu0 %v3921_v28, %s3185_s25  ;;  %1397 = vrot.lane.b32.xlu1 %v3923_v38, %s3185_s25 }
 0x305   : > { %1419 = vrot.lane.b32.xlu0 %v3923_v38, %s3184_s22  ;;  %1421 = vrot.lane.b32.xlu1 %v3921_v28, %s3184_s22 }
 0x309   : > { %1472 = vrot.lane.b32.xlu0 %v3957_v41, %s3181_s19  ;;  %1468 = vrot.lane.b32.xlu1 %v3959_v25, %s3181_s19 }
 0x30d   : > { %1491 = vrot.lane.b32.xlu0 %v3959_v25, %s3180_s18  ;;  %1494 = vrot.lane.b32.xlu1 %v3957_v41, %s3180_s18 }
 0x311   : > { %1516 = vrot.lane.b32.xlu0 %v3957_v41, %s3182_s20  ;;  %1513 = vrot.lane.b32.xlu1 %v3959_v25, %s3182_s20 }
 0x315   : > { %1535 = vrot.lane.b32.xlu0 %v3959_v25, %s3173_s24  ;;  %1538 = vrot.lane.b32.xlu1 %v3957_v41, %s3173_s24 }
 0x319   : > { %1570 = vrot.lane.b32.xlu0 %v3957_v41, %s3172_s23  ;;  %1572 = vrot.lane.b32.xlu1 %v3959_v25, %s3172_s23 }
 0x31d   : > { %1594 = vrot.lane.b32.xlu0 %v3959_v25, %s3183_s21  ;;  %1592 = vrot.lane.b32.xlu1 %v3957_v41, %s3183_s21 }
 0x321   : > { %1614 = vrot.lane.b32.xlu0 %v3957_v41, %s3185_s25  ;;  %1616 = vrot.lane.b32.xlu1 %v3959_v25, %s3185_s25 }
 0x325   : > { %1638 = vrot.lane.b32.xlu0 %v3959_v25, %s3184_s22  ;;  %1636 = vrot.lane.b32.xlu1 %v3957_v41, %s3184_s22 }
 0x329   : > { %1684 = vrot.lane.b32.xlu0 %v4005_v24, %s3181_s19  ;;  %1688 = vrot.lane.b32.xlu1 %v4009_v50, %s3181_s19 }
 0x32d   : > { %1710 = vrot.lane.b32.xlu0 %v4009_v50, %s3180_s18  ;;  %1707 = vrot.lane.b32.xlu1 %v4005_v24, %s3180_s18 }
 0x331   : > { %1729 = vrot.lane.b32.xlu0 %v4005_v24, %s3182_s20  ;;  %1732 = vrot.lane.b32.xlu1 %v4009_v50, %s3182_s20 }
 0x335   : > { %1754 = vrot.lane.b32.xlu0 %v4009_v50, %s3173_s24  ;;  %1751 = vrot.lane.b32.xlu1 %v4005_v24, %s3173_s24 }
 0x339   : > { %1788 = vrot.lane.b32.xlu0 %v4005_v24, %s3172_s23  ;;  %1786 = vrot.lane.b32.xlu1 %v4009_v50, %s3172_s23 }
 0x33b   : > { %v918_v21 = vpop.permute.xlu1 %917  ;;  %v922_v35 = vpop.permute.xlu0 %921 }
 0x33c   : > { %v4173_v27 = vsel %vm820_vm10, %v922_v35, %v918_v21  ;;  %v4176_v46 = vsel %vm820_vm10, %v918_v21, %v922_v35  ;;  %v4197_v35 = vrot.slane %v3028_v12, %v3262_v6 }
 0x33d   : > { %1808 = vrot.lane.b32.xlu0 %v4009_v50, %s3183_s21  ;;  %1810 = vrot.lane.b32.xlu1 %v4005_v24, %s3183_s21  ;;  %5251 = vst [vmem:[#allocation102_spill] sm:$0xff] %v4173_v27  ;;  %5252 = vst [vmem:[#allocation103_spill] sm:$0xff] %v4176_v46 }
 0x33f   : > { %v956_v31 = vpop.permute.xlu1 %955  ;;  %v953_v22 = vpop.permute.xlu0 %952 }
 0x340   : > { %v4145_v25 = vsel %vm957_vm15, %v956_v31, %v953_v22  ;;  %v4148_v20 = vsel %vm957_vm15, %v953_v22, %v956_v31  ;;  %v3032_v22 = vld [vmem:[%s5029_s8 + $0x10] sm:$0x3] }
 0x341   : > { %1832 = vrot.lane.b32.xlu0 %v4005_v24, %s3185_s25  ;;  %1830 = vrot.lane.b32.xlu1 %v4009_v50, %s3185_s25  ;;  %5249 = vst [vmem:[#allocation100_spill] sm:$0xff] %v4145_v25  ;;  %5250 = vst [vmem:[#allocation101_spill] sm:$0xff] %v4148_v20  ;;  %v975_v9 = vmul.f32 %v4153_v29, %v4148_v20  ;;  %v976_v10 = vmul.f32 %v4156_v14, %v4145_v25 }
 0x342   : > { %v4203_v20 = vrot.slane %v3032_v22, %v3262_v6  ;;  %v4206_v25 = vrot.slane %v3032_v22, %v3264_v7 }
 0x343   : > { %v989_v47 = vpop.permute.xlu1 %988  ;;  %v992_v19 = vpop.permute.xlu0 %991  ;;  %v982_v5 = vmul.f32 %v3643_v55, %v975_v9  ;;  %v1340_v9 = vmul.f32 %v3923_v38, %v4103_v52 }
 0x344   : > { %v4189_v0 = vsel %vm993_vm14, %v992_v19, %v989_v47  ;;  %v4192_v21 = vsel %vm993_vm14, %v989_v47, %v992_v19  ;;  %5255 = vst [vmem:[#allocation106_spill] sm:$0xff] %v4203_v20  ;;  %5256 = vst [vmem:[#allocation107_spill] sm:$0xff] %v4206_v25  ;;  %v939_v19 = vmul.f32 %v4111_v45, %v4176_v46 }
 0x345   : > { %1852 = vrot.lane.b32.xlu0 %v4009_v50, %s3184_s22  ;;  %1854 = vrot.lane.b32.xlu1 %v4005_v24, %s3184_s22  ;;  %5253 = vst [vmem:[#allocation104_spill] sm:$0xff] %v4189_v0  ;;  %5254 = vst [vmem:[#allocation105_spill] sm:$0xff] %v4192_v21  ;;  %v940_v47 = vmul.f32 %v4114_v54, %v4173_v27  ;;  %v1011_v22 = vmul.f32 %v4117_v18, %v4192_v21 }
 0x346   : > { %v1012_v46 = vmul.f32 %v4128_v40, %v4189_v0  ;;  %v4236_v25 = vmul.f32 %v3653_v60, %v1071_v39 }
 0x347   : > { %v4053_v36 = vpop.permute.xlu1 %1027  ;;  %v4055_v33 = vpop.permute.xlu0 %1024 }
 0x348   : > { %v4215_v61 = vsel %vm483_vm4, %v4053_v36, %v4055_v33  ;;  %v4220_v12 = vsel %vm483_vm4, %v4055_v33, %v4053_v36  ;;  %v983_v33 = vmul.f32 %v3643_v55, %v976_v10  ;;  %v4233_v36 = vmul.f32 %v3653_v60, %v1070_v51 }
 0x349   : > { %2105 = vrot.lane.b32.xlu0 %v4059_v32, %s3181_s19  ;;  %2108 = vrot.lane.b32.xlu1 %v4063_v44, %s3181_s19  ;;  %5257 = vst [vmem:[#allocation108_spill] sm:$0xff] %v4215_v61  ;;  %5258 = vst [vmem:[#allocation109_spill] sm:$0xff] %v4220_v12  ;;  %v1045_v21 = vmul.f32 %v4159_v11, %v4220_v12  ;;  %v1341_v55 = vmul.f32 %v3921_v28, %v4106_v49 }
 0x34a   : > { %v946_v10 = vmul.f32 %v3645_v56, %v939_v19  ;;  %v947_v60 = vmul.f32 %v3645_v56, %v940_v47  ;;  %v1018_v12 = vmul.f32 %v3649_v58, %v1011_v22 }
 0x34b   : > { %v4069_v50 = vpop.permute.xlu1 %1085  ;;  %v4071_v24 = vpop.permute.xlu0 %1083 }
 0x34c   : > { %v984_v28 = vadd.f32 %v982_v5, %v946_v10  ;;  %v985_v19 = vadd.f32 %v983_v33, %v947_v60  ;;  %v4272_v5 = vsel %vm554_vm3, %v4069_v50, %v4071_v24 }
 0x34d   : > { %2130 = vrot.lane.b32.xlu0 %v4063_v44, %s3180_s18  ;;  %2127 = vrot.lane.b32.xlu1 %v4059_v32, %s3180_s18 }
 0x34e   : > { %v1020_v33 = vadd.f32 %v1018_v12, %v984_v28 }
 0x34f   : > { %v4077_v23 = vpop.permute.xlu0 %1119  ;;  %v4079_v26 = vpop.permute.xlu1 %1117 }
 0x351   : > { %2149 = vrot.lane.b32.xlu0 %v4059_v32, %s3182_s20  ;;  %2152 = vrot.lane.b32.xlu1 %v4063_v44, %s3182_s20 }
 0x353   : > { %v4097_v17 = vpop.permute.xlu0 %1153  ;;  %v4108_v37 = vpop.permute.xlu1 %1155 }
 0x355   : > { %2174 = vrot.lane.b32.xlu0 %v4063_v44, %s3173_s24  ;;  %2171 = vrot.lane.b32.xlu1 %v4059_v32, %s3173_s24 }
 0x357   : > { %v4150_v41 = vpop.permute.xlu0 %1191  ;;  %v4170_v31 = vpop.permute.xlu1 %1189 }
 0x359   : > { %2208 = vrot.lane.b32.xlu0 %v4059_v32, %s3172_s23  ;;  %2206 = vrot.lane.b32.xlu1 %v4063_v44, %s3172_s23 }
 0x35b   : > { %v1252_v42 = vpop.permute.xlu0 %1251  ;;  %v1256_v6 = vpop.permute.xlu1 %1255 }
 0x35c   : > { %v1257_v27 = vsel %vm820_vm10, %v1256_v6, %v1252_v42  ;;  %v1260_v7 = vsel %vm820_vm10, %v1252_v42, %v1256_v6  ;;  %v1046_v6 = vmul.f32 %v4162_v48, %v4215_v61  ;;  %v1019_v61 = vmul.f32 %v3649_v58, %v1012_v46 }
 0x35d   : > { %2228 = vrot.lane.b32.xlu0 %v4063_v44, %s3183_s21  ;;  %2230 = vrot.lane.b32.xlu1 %v4059_v32, %s3183_s21  ;;  %v1261_v39 = vmul.f32 %v1260_v7, %v4111_v45  ;;  %v1262_v51 = vmul.f32 %v1257_v27, %v4114_v54  ;;  %v1052_v27 = vmul.f32 %v3647_v57, %v1045_v21 }
 0x35e   : > { %v1053_v58 = vmul.f32 %v3647_v57, %v1046_v6  ;;  %v1021_v6 = vadd.f32 %v1019_v61, %v985_v19 }
 0x35f   : > { %v1278_v42 = vpop.permute.xlu0 %1277  ;;  %v1275_v0 = vpop.permute.xlu1 %1274  ;;  %v1269_v47 = vmul.f32 %v3659_v63, %v1262_v51 }
 0x360   : > { %v1279_v20 = vsel %vm957_vm15, %v1278_v42, %v1275_v0  ;;  %v1282_v38 = vsel %vm957_vm15, %v1275_v0, %v1278_v42  ;;  %v4267_v0 = vsel %vm554_vm3, %v4071_v24, %v4069_v50  ;;  %v1055_v12 = vadd.f32 %v1053_v58, %v1021_v6 }
 0x361   : > { %2252 = vrot.lane.b32.xlu0 %v4059_v32, %s3185_s25  ;;  %v1283_v56 = vmul.f32 %v1282_v38, %v4153_v29  ;;  %v1284_v7 = vmul.f32 %v1279_v20, %v4156_v14  ;;  %2250 = vrot.lane.b32.xlu1 %v4063_v44, %s3185_s25  ;;  %v1268_v20 = vmul.f32 %v3659_v63, %v1261_v39 }
 0x362   : > { %v1104_v61 = vmul.f32 %v4131_v30, %v4267_v0  ;;  %v1105_v39 = vmul.f32 %v4134_v15, %v4272_v5  ;;  %v4293_v38 = vsel %vm2312_vm0, %v3901_v53, %v4021_v34 }
 0x363   : > { %v1297_v46 = vpop.permute.xlu0 %1296  ;;  %v1290_v21 = vmul.f32 %v3665_v2, %v1283_v56  ;;  %v1291_v57 = vmul.f32 %v3665_v2, %v1284_v7  ;;  %v1300_v22 = vpop.permute.xlu1 %1299  ;;  %v1054_v2 = vadd.f32 %v1052_v27, %v1020_v33  ;;  %v1347_v7 = vmul.f32 %v3667_v3, %v1340_v9 }
 0x364   : > { %v1301_v42 = vsel %vm993_vm14, %v1300_v22, %v1297_v46  ;;  %v1304_v10 = vsel %vm993_vm14, %v1297_v46, %v1300_v22  ;;  %v4301_v27 = vsel %vm2312_vm0, %v4021_v34, %v3901_v53  ;;  %v1080_v53 = vadd.f32 %v4236_v25, %v1055_v12 }
 0x365   : > { %2272 = vrot.lane.b32.xlu0 %v4063_v44, %s3184_s22  ;;  %v1292_v50 = vadd.f32 %v1290_v21, %v1268_v20  ;;  %v1293_v24 = vadd.f32 %v1291_v57, %v1269_v47  ;;  %v1305_v60 = vmul.f32 %v1304_v10, %v4117_v18  ;;  %v1306_v63 = vmul.f32 %v1301_v42, %v4128_v40 }
 0x366   : > { %2274 = vrot.lane.b32.xlu1 %v4059_v32, %s3184_s22  ;;  %v1348_v20 = vmul.f32 %v3667_v3, %v1341_v55  ;;  %v1079_v34 = vadd.f32 %v4233_v36, %v1054_v2  ;;  %v1111_v57 = vmul.f32 %v3651_v59, %v1104_v61  ;;  %v1112_v22 = vmul.f32 %v3651_v59, %v1105_v39 }
 0x367   : > { %v1322_v51 = vpop.permute.xlu0 %1321  ;;  %v1312_v28 = vmul.f32 %v3663_v1, %v1305_v60  ;;  %v1313_v19 = vmul.f32 %v3663_v1, %v1306_v63  ;;  %v1319_v56 = vpop.permute.xlu1 %1318  ;;  %v4319_v3 = vsel %vm1121_vm1, %v4079_v26, %v4077_v23  ;;  %v4324_v55 = vsel %vm1121_vm1, %v4077_v23, %v4079_v26 }
 0x368   : > { %v1323_v58 = vsel %vm483_vm4, %v1322_v51, %v1319_v56  ;;  %v1326_v46 = vsel %vm483_vm4, %v1319_v56, %v1322_v51  ;;  %5259 = vst [vmem:[#allocation110_spill] sm:$0xff] %v4319_v3  ;;  %v4331_v59 = vsel %vm1157_vm2, %v4097_v17, %v4108_v37  ;;  %v4336_v42 = vsel %vm1157_vm2, %v4108_v37, %v4097_v17 }
 0x369   : > { %2324 = vrot.lane.b32.xlu0 %v4293_v38, %s3181_s19  ;;  %v1314_v47 = vadd.f32 %v1312_v28, %v1292_v50  ;;  %v1315_v21 = vadd.f32 %v1313_v19, %v1293_v24  ;;  %v1327_v1 = vmul.f32 %v1326_v46, %v4159_v11  ;;  %v1328_v9 = vmul.f32 %v1323_v58, %v4162_v48 }
 0x36a   : > { %2321 = vrot.lane.b32.xlu1 %v4301_v27, %s3181_s19  ;;  %5260 = vst [vmem:[#allocation111_spill] sm:$0xff] %v4331_v59  ;;  %5261 = vst [vmem:[#allocation112_spill] sm:$0xff] %v4336_v42  ;;  %v1140_v17 = vmul.f32 %v4197_v35, %v4319_v3  ;;  %v1141_v37 = vmul.f32 %v4200_v43, %v4324_v55  ;;  %v4353_v63 = vsel %vm1193_vm5, %v4170_v31, %v4150_v41 }
 0x36b   : > { %v1356_v33 = vpop.permute.xlu0 %1355  ;;  %v1334_v6 = vmul.f32 %v3669_v4, %v1327_v1  ;;  %v1335_v36 = vmul.f32 %v3669_v4, %v1328_v9  ;;  %v1354_v25 = vpop.permute.xlu1 %1353  ;;  %5262 = vst [vmem:[#allocation113_spill] sm:$0xff] %v4353_v63  ;;  %v4358_v2 = vsel %vm1193_vm5, %v4150_v41, %v4170_v31  ;;  %v1176_v19 = vmul.f32 %v4139_v16, %v4331_v59  ;;  %v5264_v1 = vld [vmem:[#allocation106_spill] sm:$0xff] }
 0x36c   : > { %v1357_v10 = vsel %vm554_vm3, %v1354_v25, %v1356_v33  ;;  %v1361_v23 = vsel %vm554_vm3, %v1356_v33, %v1354_v25  ;;  %5263 = vst [vmem:[#allocation114_spill] sm:$0xff] %v4358_v2  ;;  %v1177_v56 = vmul.f32 %v4142_v13, %v4336_v42  ;;  %v1212_v9 = vmul.f32 %v5264_v1, %v4353_v63  ;;  %v5265_v33 = vld [vmem:[#allocation107_spill] sm:$0xff] }
 0x36d   : > { %2343 = vrot.lane.b32.xlu0 %v4301_v27, %s3180_s18  ;;  %v1336_v26 = vadd.f32 %v1334_v6, %v1314_v47  ;;  %v1337_v4 = vadd.f32 %v1335_v36, %v1315_v21  ;;  %v1362_v50 = vmul.f32 %v1357_v10, %v4131_v30  ;;  %v1363_v24 = vmul.f32 %v1361_v23, %v4134_v15  ;;  %v5266_v10 = vld [vmem:[#allocation9_spill] sm:$0xff] }
 0x36e   : > { %2346 = vrot.lane.b32.xlu1 %v4293_v38, %s3180_s18  ;;  %v1148_v47 = vmul.f32 %v3657_v62, %v1141_v37  ;;  %v1213_v6 = vmul.f32 %v5265_v33, %v4358_v2  ;;  %v1113_v36 = vadd.f32 %v1111_v57, %v1079_v34  ;;  %v1114_v25 = vadd.f32 %v1112_v22, %v1080_v53 }
 0x36f   : > { %v1376_v60 = vpop.permute.xlu0 %1375  ;;  %v1349_v12 = vadd.f32 %v1347_v7, %v1336_v26  ;;  %v1350_v61 = vadd.f32 %v1348_v20, %v1337_v4  ;;  %v1369_v39 = vmul.f32 %v3673_v8, %v1362_v50  ;;  %v1370_v51 = vmul.f32 %v3673_v8, %v1363_v24  ;;  %v1378_v28 = vpop.permute.xlu1 %1377  ;;  %v5267_v50 = vld [vmem:[#allocation7_spill] sm:$0xff] }
 0x370   : > { %v1379_v58 = vsel %vm1121_vm1, %v1376_v60, %v1378_v28  ;;  %v1383_v46 = vsel %vm1121_vm1, %v1378_v28, %v1376_v60  ;;  %v1147_v20 = vmul.f32 %v3657_v62, %v1140_v17  ;;  %v1183_v24 = vmul.f32 %v5267_v50, %v1176_v19  ;;  %v5269_v19 = vld [vmem:[#allocation11_spill] sm:$0xff] }
 0x371   : > { %2368 = vrot.lane.b32.xlu0 %v4293_v38, %s3182_s20  ;;  %v1371_v41 = vadd.f32 %v1369_v39, %v1349_v12  ;;  %v1372_v31 = vadd.f32 %v1370_v51, %v1350_v61  ;;  %v1384_v7 = vmul.f32 %v1379_v58, %v4197_v35  ;;  %v1385_v8 = vmul.f32 %v1383_v46, %v4200_v43  ;;  %v5268_v39 = vld [vmem:[#allocation8_spill] sm:$0xff] }
 0x372   : > { %2365 = vrot.lane.b32.xlu1 %v4301_v27, %s3182_s20  ;;  %v1184_v17 = vmul.f32 %v5267_v50, %v1177_v56  ;;  %v1149_v57 = vadd.f32 %v1147_v20, %v1113_v36  ;;  %v1150_v22 = vadd.f32 %v1148_v47, %v1114_v25  ;;  %v1219_v51 = vmul.f32 %v5268_v39, %v1212_v9 }
 0x373   : > { %v1400_v21 = vpop.permute.xlu0 %1399  ;;  %v1391_v23 = vmul.f32 %v5266_v10, %v1384_v7  ;;  %v1392_v26 = vmul.f32 %v5266_v10, %v1385_v8  ;;  %v1398_v4 = vpop.permute.xlu1 %1397  ;;  %v1220_v28 = vmul.f32 %v5268_v39, %v1213_v6  ;;  %v3042_v8 = vld [vmem:[%s5028_s7 + $0x2] sm:$0x3]  ;;  %v5270_v10 = vld [vmem:[#allocation3_spill] sm:$0xff]  ;;  %v5273_v39 = vld [vmem:[#allocation98_spill] sm:$0xff] }
 0x374   : > { %v1401_v62 = vsel %vm1157_vm2, %v1398_v4, %v1400_v21  ;;  %v1405_v37 = vsel %vm1157_vm2, %v1400_v21, %v1398_v4  ;;  %v1186_v7 = vadd.f32 %v1184_v17, %v1150_v22  ;;  %v1445_v17 = vrot.slane %v3042_v8, %v5270_v10 }
 0x375   : > { %2387 = vrot.lane.b32.xlu0 %v4301_v27, %s3173_s24  ;;  %v1393_v60 = vadd.f32 %v1391_v23, %v1371_v41  ;;  %v1394_v12 = vadd.f32 %v1392_v26, %v1372_v31  ;;  %v1406_v34 = vmul.f32 %v1401_v62, %v4139_v16  ;;  %v1407_v53 = vmul.f32 %v1405_v37, %v4142_v13  ;;  %v1223_v41 = vld [vmem:[%s5028_s7] sm:$0x3]  ;;  %v5271_v26 = vld [vmem:[#allocation4_spill] sm:$0xff]  ;;  %v5272_v37 = vld [vmem:[#allocation10_spill] sm:$0xff] }
 0x376   : > { %2390 = vrot.lane.b32.xlu1 %v4293_v38, %s3173_s24  ;;  %v1185_v31 = vadd.f32 %v1183_v24, %v1149_v57  ;;  %v1228_v23 = vrot.slane %v1223_v41, %v5270_v10  ;;  %v1232_v4 = vrot.slane %v1223_v41, %v5271_v26  ;;  %v1222_v24 = vadd.f32 %v1220_v28, %v1186_v7 }
 0x377   : > { %v1420_v61 = vpop.permute.xlu0 %1419  ;;  %v1413_v56 = vmul.f32 %v5269_v19, %v1406_v34  ;;  %v1414_v58 = vmul.f32 %v5269_v19, %v1407_v53  ;;  %v1422_v46 = vpop.permute.xlu1 %1421  ;;  %v1449_v62 = vrot.slane %v3042_v8, %v5271_v26 }
 0x378   : > { %v1423_v20 = vsel %vm1193_vm5, %v1420_v61, %v1422_v46  ;;  %v1427_v47 = vsel %vm1193_vm5, %v1422_v46, %v1420_v61  ;;  %v1221_v50 = vadd.f32 %v1219_v51, %v1185_v31  ;;  %v5274_v51 = vld [vmem:[#allocation86_spill] sm:$0xff] }
 0x379   : > { %2422 = vrot.lane.b32.xlu0 %v4293_v38, %s3172_s23  ;;  %v1415_v21 = vadd.f32 %v1413_v56, %v1393_v60  ;;  %v1416_v9 = vadd.f32 %v1414_v58, %v1394_v12  ;;  %v1428_v6 = vmul.f32 %v1423_v20, %v5264_v1  ;;  %v1429_v36 = vmul.f32 %v1427_v47, %v5265_v33 }
 0x37a   : > { %2424 = vrot.lane.b32.xlu1 %v4301_v27, %s3172_s23  ;;  %v4425_v28 = vsel %vm2529_vm6, %v5274_v51, %v5273_v39  ;;  %v1235_v56 = vmul.f32 %v1228_v23, %v1221_v50  ;;  %v1236_v58 = vmul.f32 %v1232_v4, %v1222_v24  ;;  %v4432_v20 = vsel %vm2529_vm6, %v5273_v39, %v5274_v51  ;;  %v5275_v4 = vld [vmem:[#allocation13_spill] sm:$0xff]  ;;  %v5277_v51 = vld [vmem:[#allocation15_spill] sm:$0xff] }
 0x37b   : > { %v1473_v25 = vpop.permute.xlu0 %1472  ;;  %v1435_v60 = vmul.f32 %v5272_v37, %v1428_v6  ;;  %v1436_v12 = vmul.f32 %v5272_v37, %v1429_v36  ;;  %v1469_v34 = vpop.permute.xlu1 %1468 }
 0x37c   : > { %v1474_v53 = vsel %vm820_vm10, %v1473_v25, %v1469_v34  ;;  %v1477_v57 = vsel %vm820_vm10, %v1469_v34, %v1473_v25 }
 0x37d   : > { %2446 = vrot.lane.b32.xlu0 %v4301_v27, %s3183_s21  ;;  %v1437_v22 = vadd.f32 %v1435_v60, %v1415_v21  ;;  %v1438_v61 = vadd.f32 %v1436_v12, %v1416_v9  ;;  %v1478_v31 = vmul.f32 %v1477_v57, %v4111_v45  ;;  %v1479_v7 = vmul.f32 %v1474_v53, %v4114_v54 }
 0x37e   : > { %2444 = vrot.lane.b32.xlu1 %v4293_v38, %s3183_s21 }
 0x37f   : > { %v1492_v19 = vpop.permute.xlu0 %1491  ;;  %v1452_v46 = vmul.f32 %v1445_v17, %v1437_v22  ;;  %v1453_v41 = vmul.f32 %v1449_v62, %v1438_v61  ;;  %v1495_v8 = vpop.permute.xlu1 %1494  ;;  %v1485_v50 = vmul.f32 %v5275_v4, %v1478_v31  ;;  %v1486_v24 = vmul.f32 %v5275_v4, %v1479_v7  ;;  %v5276_v17 = vld [vmem:[#allocation12_spill] sm:$0xff]  ;;  %v5278_v31 = vld [vmem:[#allocation87_spill] sm:$0xff] }
 0x380   : > { %v1496_v47 = vsel %vm957_vm15, %v1495_v8, %v1492_v19  ;;  %v1499_v21 = vsel %vm957_vm15, %v1492_v19, %v1495_v8  ;;  %v1557_v7 = vmul.f32 %v5278_v31, %v4103_v52  ;;  %v5279_v8 = vld [vmem:[#allocation88_spill] sm:$0xff] }
 0x381   : > { %2541 = vrot.lane.b32.xlu0 %v4425_v28, %s3181_s19  ;;  %v1500_v9 = vmul.f32 %v1499_v21, %v4153_v29  ;;  %v1501_v6 = vmul.f32 %v1496_v47, %v4156_v14  ;;  %v4442_v36 = vadd.f32 %v1452_v46, %v1235_v56  ;;  %v4444_v25 = vadd.f32 %v1453_v41, %v1236_v58 }
 0x382   : > { %2538 = vrot.lane.b32.xlu1 %v4432_v20, %s3181_s19  ;;  %v1558_v47 = vmul.f32 %v5279_v8, %v4106_v49 }
 0x383   : > { %v1517_v23 = vpop.permute.xlu0 %1516  ;;  %v1507_v62 = vmul.f32 %v5276_v17, %v1500_v9  ;;  %v1508_v37 = vmul.f32 %v5276_v17, %v1501_v6  ;;  %v1514_v60 = vpop.permute.xlu1 %1513 }
 0x384   : > { %v1518_v12 = vsel %vm993_vm14, %v1517_v23, %v1514_v60  ;;  %v1521_v34 = vsel %vm993_vm14, %v1514_v60, %v1517_v23 }
 0x385   : > { %2563 = vrot.lane.b32.xlu0 %v4425_v28, %s3180_s18  ;;  %v1509_v53 = vadd.f32 %v1507_v62, %v1485_v50  ;;  %v1510_v57 = vadd.f32 %v1508_v37, %v1486_v24  ;;  %v1522_v22 = vmul.f32 %v1521_v34, %v4117_v18  ;;  %v1523_v61 = vmul.f32 %v1518_v12, %v4128_v40  ;;  %v5280_v50 = vld [vmem:[#allocation14_spill] sm:$0xff]  ;;  %v5281_v37 = vld [vmem:[#allocation17_spill] sm:$0xff] }
 0x386   : > { %2560 = vrot.lane.b32.xlu1 %v4432_v20, %s3180_s18  ;;  %v1564_v60 = vmul.f32 %v5281_v37, %v1557_v7  ;;  %v1565_v12 = vmul.f32 %v5281_v37, %v1558_v47  ;;  %s332_s18 = scalar_lea.vmem %s5030_s9, %s3117_s12 }
 0x387   : > { %v1536_v39 = vpop.permute.xlu0 %1535  ;;  %v1529_v19 = vmul.f32 %v5277_v51, %v1522_v22  ;;  %v1530_v56 = vmul.f32 %v5277_v51, %v1523_v61  ;;  %v1539_v58 = vpop.permute.xlu1 %1538 }
 0x388   : > { %v1540_v46 = vsel %vm483_vm4, %v1539_v58, %v1536_v39  ;;  %v1543_v41 = vsel %vm483_vm4, %v1536_v39, %v1539_v58  ;;  %v5282_v58 = vld [vmem:[#allocation16_spill] sm:$0xff] }
 0x389   : > { %2582 = vrot.lane.b32.xlu0 %v4432_v20, %s3182_s20  ;;  %v1531_v21 = vadd.f32 %v1529_v19, %v1509_v53  ;;  %v1532_v9 = vadd.f32 %v1530_v56, %v1510_v57  ;;  %v1544_v6 = vmul.f32 %v1543_v41, %v4159_v11  ;;  %v1545_v23 = vmul.f32 %v1540_v46, %v4162_v48 }
 0x38a   : > { %2585 = vrot.lane.b32.xlu1 %v4425_v28, %s3182_s20 }
 0x38b   : > { %v1571_v4 = vpop.permute.xlu0 %1570  ;;  %v1551_v24 = vmul.f32 %v5280_v50, %v1544_v6  ;;  %v1552_v17 = vmul.f32 %v5280_v50, %v1545_v23  ;;  %v1573_v62 = vpop.permute.xlu1 %1572  ;;  %v5284_v50 = vld [vmem:[#allocation76_spill] sm:$0xff] }
 0x38c   : > { %v1574_v34 = vsel %vm554_vm3, %v1571_v4, %v1573_v62  ;;  %v1578_v53 = vsel %vm554_vm3, %v1573_v62, %v1571_v4  ;;  %v5283_v4 = vld [vmem:[#allocation93_spill] sm:$0xff]  ;;  %v5285_v62 = vld [vmem:[#allocation19_spill] sm:$0xff] }
 0x38d   : > { %2604 = vrot.lane.b32.xlu0 %v4432_v20, %s3173_s24  ;;  %v1553_v57 = vadd.f32 %v1551_v24, %v1531_v21  ;;  %v1554_v22 = vadd.f32 %v1552_v17, %v1532_v9  ;;  %v1579_v61 = vmul.f32 %v1574_v34, %v4131_v30  ;;  %v1580_v39 = vmul.f32 %v1578_v53, %v4134_v15  ;;  %v5286_v34 = vld [vmem:[#allocation89_spill] sm:$0xff] }
 0x38e   : > { %2607 = vrot.lane.b32.xlu1 %v4425_v28, %s3173_s24  ;;  %v1917_v24 = vsel %vm957_vm15, %v5284_v50, %v5283_v4  ;;  %v1920_v17 = vsel %vm957_vm15, %v5283_v4, %v5284_v50  ;;  %v5287_v53 = vld [vmem:[#allocation77_spill] sm:$0xff]  ;;  %v5292_v50 = vld [vmem:[#allocation18_spill] sm:$0xff] }
 0x38f   : > { %v1595_v51 = vpop.permute.xlu0 %1594  ;;  %v1566_v19 = vadd.f32 %v1564_v60, %v1553_v57  ;;  %v1567_v56 = vadd.f32 %v1565_v12, %v1554_v22  ;;  %v1586_v46 = vmul.f32 %v5282_v58, %v1579_v61  ;;  %v1587_v41 = vmul.f32 %v5282_v58, %v1580_v39  ;;  %v1593_v31 = vpop.permute.xlu1 %1592 }
 0x390   : > { %v1596_v7 = vsel %vm1121_vm1, %v1593_v31, %v1595_v51  ;;  %v1600_v8 = vsel %vm1121_vm1, %v1595_v51, %v1593_v31  ;;  %v1895_v57 = vsel %vm820_vm10, %v5287_v53, %v5286_v34  ;;  %v1898_v22 = vsel %vm820_vm10, %v5286_v34, %v5287_v53  ;;  %v5288_v31 = vld [vmem:[#allocation36_spill] sm:$0xff] }
 0x391   : > { %2639 = vrot.lane.b32.xlu0 %v4425_v28, %s3172_s23  ;;  %v1588_v47 = vadd.f32 %v1586_v46, %v1566_v19  ;;  %v1589_v21 = vadd.f32 %v1587_v41, %v1567_v56  ;;  %v1601_v9 = vmul.f32 %v1596_v7, %v4197_v35  ;;  %v1602_v6 = vmul.f32 %v1600_v8, %v4200_v43  ;;  %v5289_v8 = vld [vmem:[#allocation45_spill] sm:$0xff] }
 0x392   : > { %2641 = vrot.lane.b32.xlu1 %v4432_v20, %s3172_s23  ;;  %v1921_v46 = vmul.f32 %v1920_v17, %v4153_v29  ;;  %v1922_v41 = vmul.f32 %v1917_v24, %v4156_v14  ;;  %v4520_v7 = vmul.f32 %v4103_v52, %v5288_v31  ;;  %v5293_v31 = vld [vmem:[#allocation30_spill] sm:$0xff] }
 0x393   : > { %v1615_v23 = vpop.permute.xlu0 %1614  ;;  %v1608_v37 = vmul.f32 %v5285_v62, %v1601_v9  ;;  %v1609_v60 = vmul.f32 %v5285_v62, %v1602_v6  ;;  %v1617_v12 = vpop.permute.xlu1 %1616  ;;  %v4524_v9 = vmul.f32 %v4106_v49, %v5289_v8  ;;  %v5291_v6 = vld [vmem:[#allocation80_spill] sm:$0xff] }
 0x394   : > { %v1618_v61 = vsel %vm1157_vm2, %v1615_v23, %v1617_v12  ;;  %v1622_v39 = vsel %vm1157_vm2, %v1617_v12, %v1615_v23  ;;  %v3052_v12 = vld [vmem:[%s5028_s7 + $0x4] sm:$0x3]  ;;  %v1928_v8 = vmul.f32 %v5293_v31, %v1921_v46 }
 0x395   : > { %2466 = vrot.lane.b32.xlu0 %v4293_v38, %s3185_s25  ;;  %v1610_v51 = vadd.f32 %v1608_v37, %v1588_v47  ;;  %v1611_v19 = vadd.f32 %v1609_v60, %v1589_v21  ;;  %v1623_v56 = vmul.f32 %v1618_v61, %v4139_v16  ;;  %v1624_v58 = vmul.f32 %v1622_v39, %v4142_v13  ;;  %v5290_v21 = vld [vmem:[#allocation90_spill] sm:$0xff] }
 0x396   : > { %2468 = vrot.lane.b32.xlu1 %v4301_v27, %s3185_s25  ;;  %v1939_v23 = vsel %vm993_vm14, %v5291_v6, %v5290_v21  ;;  %v1942_v4 = vsel %vm993_vm14, %v5290_v21, %v5291_v6  ;;  %v1899_v37 = vmul.f32 %v1898_v22, %v4111_v45  ;;  %v1900_v60 = vmul.f32 %v1895_v57, %v4114_v54 }
 0x397   : > { %v1639_v47 = vpop.permute.xlu0 %1638  ;;  %v1630_v17 = vmul.f32 %v5292_v50, %v1623_v56  ;;  %v1631_v24 = vmul.f32 %v5292_v50, %v1624_v58  ;;  %v1637_v62 = vpop.permute.xlu1 %1636  ;;  %v1943_v57 = vmul.f32 %v1942_v4, %v4117_v18  ;;  %v1944_v22 = vmul.f32 %v1939_v23, %v4128_v40 }
 0x398   : > { %v1640_v34 = vsel %vm1193_vm5, %v1637_v62, %v1639_v47  ;;  %v1644_v53 = vsel %vm1193_vm5, %v1639_v47, %v1637_v62  ;;  %v1929_v47 = vmul.f32 %v5293_v31, %v1922_v41  ;;  %v1662_v6 = vrot.slane %v3052_v12, %v5270_v10  ;;  %v5295_v62 = vld [vmem:[#allocation31_spill] sm:$0xff]  ;;  %v5296_v41 = vld [vmem:[#allocation96_spill] sm:$0xff] }
 0x399   : > { %2663 = vrot.lane.b32.xlu0 %v4432_v20, %s3183_s21  ;;  %v1632_v61 = vadd.f32 %v1630_v17, %v1610_v51  ;;  %v1633_v39 = vadd.f32 %v1631_v24, %v1611_v19  ;;  %v1645_v56 = vmul.f32 %v1640_v34, %v5264_v1  ;;  %v1646_v58 = vmul.f32 %v1644_v53, %v5265_v33  ;;  %v5294_v19 = vld [vmem:[#allocation21_spill] sm:$0xff]  ;;  %v5297_v53 = vld [vmem:[#allocation78_spill] sm:$0xff] }
 0x39a   : > { %2661 = vrot.lane.b32.xlu1 %v4425_v28, %s3183_s21  ;;  %v1666_v51 = vrot.slane %v3052_v12, %v5271_v26  ;;  %v1906_v34 = vmul.f32 %v5295_v62, %v1899_v37  ;;  %v1907_v4 = vmul.f32 %v5295_v62, %v1900_v60  ;;  %v1961_v12 = vsel %vm483_vm4, %v5297_v53, %v5296_v41  ;;  %v5298_v37 = vld [vmem:[#allocation33_spill] sm:$0xff] }
 0x39b   : > { %v1685_v21 = vpop.permute.xlu0 %1684  ;;  %v1652_v50 = vmul.f32 %v5294_v19, %v1645_v56  ;;  %v1653_v17 = vmul.f32 %v5294_v19, %v1646_v58  ;;  %v1689_v24 = vpop.permute.xlu1 %1688  ;;  %v1964_v56 = vsel %vm483_vm4, %v5296_v41, %v5297_v53  ;;  %v1950_v60 = vmul.f32 %v5298_v37, %v1943_v57  ;;  %v5301_v41 = vld [vmem:[#allocation20_spill] sm:$0xff] }
 0x39c   : > { %v1690_v23 = vsel %vm820_vm10, %v1689_v24, %v1685_v21  ;;  %v1693_v46 = vsel %vm820_vm10, %v1685_v21, %v1689_v24  ;;  %v1951_v21 = vmul.f32 %v5298_v37, %v1944_v22  ;;  %v1930_v19 = vadd.f32 %v1928_v8, %v1906_v34 }
 0x39d   : > { %2490 = vrot.lane.b32.xlu0 %v4301_v27, %s3184_s22  ;;  %v1654_v58 = vadd.f32 %v1652_v50, %v1632_v61  ;;  %v1655_v31 = vadd.f32 %v1653_v17, %v1633_v39  ;;  %v1931_v24 = vadd.f32 %v1929_v47, %v1907_v4  ;;  %v1694_v59 = vmul.f32 %v1693_v46, %v4111_v45  ;;  %v5300_v17 = vld [vmem:[#allocation82_spill] sm:$0xff] }
 0x39e   : > { %2488 = vrot.lane.b32.xlu1 %v4293_v38, %s3184_s22  ;;  %v1695_v42 = vmul.f32 %v1690_v23, %v4114_v54  ;;  %v1965_v61 = vmul.f32 %v1964_v56, %v4159_v11  ;;  %v1966_v39 = vmul.f32 %v1961_v12, %v4162_v48  ;;  %v1952_v4 = vadd.f32 %v1950_v60, %v1930_v19  ;;  %v5303_v56 = vld [vmem:[#allocation32_spill] sm:$0xff]  ;;  %v2900_v19 = vld [vmem:[%s5027_s6] sm:$0xf] }
 0x39f   : > { %v1711_v62 = vpop.permute.xlu0 %1710  ;;  %v1669_v63 = vmul.f32 %v1662_v6, %v1654_v58  ;;  %v1670_v2 = vmul.f32 %v1666_v51, %v1655_v31  ;;  %v1708_v3 = vpop.permute.xlu1 %1707  ;;  %v5299_v51 = vld [vmem:[#allocation91_spill] sm:$0xff]  ;;  %v1953_v23 = vadd.f32 %v1951_v21, %v1931_v24  ;;  %v1701_v53 = vmul.f32 %v5301_v41, %v1694_v59 }
 0x3a0   : > { %v1712_v50 = vsel %vm957_vm15, %v1711_v62, %v1708_v3  ;;  %v1715_v57 = vsel %vm957_vm15, %v1708_v3, %v1711_v62  ;;  %v1995_v3 = vsel %vm554_vm3, %v5300_v17, %v5299_v51  ;;  %v1999_v34 = vsel %vm554_vm3, %v5299_v51, %v5300_v17  ;;  %v5306_v17 = vld [vmem:[#allocation35_spill] sm:$0xff] }
 0x3a1   : > { %2685 = vrot.lane.b32.xlu0 %v4432_v20, %s3185_s25  ;;  %v1716_v22 = vmul.f32 %v1715_v57, %v4153_v29  ;;  %v1717_v8 = vmul.f32 %v1712_v50, %v4156_v14  ;;  %v4584_v47 = vadd.f32 %v1669_v63, %v4442_v36  ;;  %v4587_v6 = vadd.f32 %v1670_v2, %v4444_v25  ;;  %v5302_v63 = vld [vmem:[#allocation23_spill] sm:$0xff]  ;;  %v3111_v50 = vld [vmem:[%s5026_s5 + $0x140] sm:$0xf] }
 0x3a2   : > { %2683 = vrot.lane.b32.xlu1 %v4425_v28, %s3185_s25  ;;  %v1702_v12 = vmul.f32 %v5301_v41, %v1695_v42  ;;  %v1972_v58 = vmul.f32 %v5303_v56, %v1965_v61  ;;  %v1973_v31 = vmul.f32 %v5303_v56, %v1966_v39  ;;  %v2000_v24 = vmul.f32 %v1995_v3, %v4131_v30  ;;  %v5304_v57 = vld [vmem:[#allocation95_spill] sm:$0xff]  ;;  %v5307_v3 = vld [vmem:[#allocation22_spill] sm:$0xff] }
 0x3a3   : > { %v1730_v46 = vpop.permute.xlu0 %1729  ;;  %v1723_v36 = vmul.f32 %v5302_v63, %v1716_v22  ;;  %v1724_v2 = vmul.f32 %v5302_v63, %v1717_v8  ;;  %v1733_v25 = vpop.permute.xlu1 %1732  ;;  %v2001_v61 = vmul.f32 %v1999_v34, %v4134_v15  ;;  %v1773_v22 = vmul.f32 %v5304_v57, %v4103_v52  ;;  %v5305_v8 = vld [vmem:[#allocation94_spill] sm:$0xff] }
 0x3a4   : > { %v1734_v37 = vsel %vm993_vm14, %v1733_v25, %v1730_v46  ;;  %v1737_v62 = vsel %vm993_vm14, %v1730_v46, %v1733_v25  ;;  %v1774_v51 = vmul.f32 %v5305_v8, %v4106_v49  ;;  %v1985_v46 = vmul.f32 %v5306_v17, %v4520_v7 }
 0x3a5   : > { %2707 = vrot.lane.b32.xlu0 %v4432_v20, %s3184_s22  ;;  %v1725_v60 = vadd.f32 %v1723_v36, %v1701_v53  ;;  %v1726_v59 = vadd.f32 %v1724_v2, %v1702_v12  ;;  %v1738_v42 = vmul.f32 %v1737_v62, %v4117_v18  ;;  %v1739_v21 = vmul.f32 %v1734_v37, %v4128_v40 }
 0x3a6   : > { %2705 = vrot.lane.b32.xlu1 %v4425_v28, %s3184_s22  ;;  %v1986_v41 = vmul.f32 %v5306_v17, %v4524_v9  ;;  %v1974_v63 = vadd.f32 %v1972_v58, %v1952_v4  ;;  %v1975_v36 = vadd.f32 %v1973_v31, %v1953_v23  ;;  %v5308_v9 = vld [vmem:[#allocation34_spill] sm:$0xff]  ;;  %v5310_v58 = vld [vmem:[#allocation97_spill] sm:$0xff]  ;;  %v5311_v31 = vld [vmem:[#allocation79_spill] sm:$0xff] }
 0x3a7   : > { %v1755_v39 = vpop.permute.xlu0 %1754  ;;  %v1745_v53 = vmul.f32 %v5307_v3, %v1738_v42  ;;  %v1746_v34 = vmul.f32 %v5307_v3, %v1739_v21  ;;  %v1752_v12 = vpop.permute.xlu1 %1751  ;;  %v2007_v57 = vmul.f32 %v5308_v9, %v2000_v24  ;;  %v2008_v42 = vmul.f32 %v5308_v9, %v2001_v61  ;;  %v5309_v21 = vld [vmem:[#allocation24_spill] sm:$0xff] }
 0x3a8   : > { %v1756_v2 = vsel %vm483_vm4, %v1755_v39, %v1752_v12  ;;  %v1759_v25 = vsel %vm483_vm4, %v1752_v12, %v1755_v39  ;;  %v1780_v8 = vmul.f32 %v5309_v21, %v1773_v22  ;;  %v1781_v4 = vmul.f32 %v5309_v21, %v1774_v51 }
 0x3a9   : > { %2903 = vperm.xlu0 %3148, %v2900_v19   ;;  %v1747_v56 = vadd.f32 %v1745_v53, %v1725_v60  ;;  %v1748_v37 = vadd.f32 %v1746_v34, %v1726_v59  ;;  %v1760_v62 = vmul.f32 %v1759_v25, %v4159_v11  ;;  %v1761_v7 = vmul.f32 %v1756_v2, %v4162_v48  ;;  %v5312_v59 = vld [vmem:[#allocation25_spill] sm:$0xff]  ;;  %v5313_v2 = vld [vmem:[#allocation92_spill] sm:$0xff] }
 0x3aa   : > { %2876 = vperm.xlu1 %3149, %v3111_v50   ;;  %v2017_v19 = vsel %vm1121_vm1, %v5311_v31, %v5310_v58  ;;  %v2021_v60 = vsel %vm1121_vm1, %v5310_v58, %v5311_v31  ;;  %v1987_v17 = vadd.f32 %v1985_v46, %v1974_v63  ;;  %v1988_v61 = vadd.f32 %v1986_v41, %v1975_v36  ;;  %v5314_v25 = vld [vmem:[#allocation85_spill] sm:$0xff] }
 0x3ab   : > { %v1789_v23 = vpop.permute.xlu0 %1788  ;;  %v1767_v39 = vmul.f32 %v5312_v59, %v1760_v62  ;;  %v1768_v50 = vmul.f32 %v5312_v59, %v1761_v7  ;;  %v1787_v24 = vpop.permute.xlu1 %1786  ;;  %v2039_v9 = vsel %vm1157_vm2, %v5314_v25, %v5313_v2  ;;  %v2043_v62 = vsel %vm1157_vm2, %v5313_v2, %v5314_v25 }
 0x3ac   : > { %v1790_v22 = vsel %vm554_vm3, %v1787_v24, %v1789_v23  ;;  %v1794_v51 = vsel %vm554_vm3, %v1789_v23, %v1787_v24  ;;  %v2022_v46 = vmul.f32 %v2017_v19, %v4197_v35  ;;  %v2023_v41 = vmul.f32 %v2021_v60, %v4200_v43 }
 0x3ad   : > { %v1769_v3 = vadd.f32 %v1767_v39, %v1747_v56  ;;  %v1770_v53 = vadd.f32 %v1768_v50, %v1748_v37  ;;  %v1795_v34 = vmul.f32 %v1790_v22, %v4131_v30  ;;  %v1796_v12 = vmul.f32 %v1794_v51, %v4134_v15  ;;  %v5315_v37 = vld [vmem:[#allocation27_spill] sm:$0xff]  ;;  %v5316_v22 = vld [vmem:[#allocation38_spill] sm:$0xff] }
 0x3ae   : > { %v2009_v58 = vadd.f32 %v2007_v57, %v1987_v17  ;;  %v2010_v31 = vadd.f32 %v2008_v42, %v1988_v61  ;;  %v2029_v51 = vmul.f32 %v5316_v22, %v2022_v46  ;;  %v5317_v42 = vld [vmem:[#allocation99_spill] sm:$0xff]  ;;  %v5318_v17 = vld [vmem:[#allocation81_spill] sm:$0xff] }
 0x3af   : > { %v1809_v63 = vpop.permute.xlu0 %1808  ;;  %v1782_v36 = vadd.f32 %v1780_v8, %v1769_v3  ;;  %v1783_v56 = vadd.f32 %v1781_v4, %v1770_v53  ;;  %v1802_v7 = vmul.f32 %v5315_v37, %v1795_v34  ;;  %v1803_v21 = vmul.f32 %v5315_v37, %v1796_v12  ;;  %v1811_v23 = vpop.permute.xlu1 %1810  ;;  %v5319_v34 = vld [vmem:[#allocation26_spill] sm:$0xff] }
 0x3b0   : > { %v1812_v59 = vsel %vm1121_vm1, %v1809_v63, %v1811_v23  ;;  %v1816_v39 = vsel %vm1121_vm1, %v1811_v23, %v1809_v63  ;;  %v2044_v8 = vmul.f32 %v2039_v9, %v4139_v16  ;;  %v2045_v4 = vmul.f32 %v2043_v62, %v4142_v13 }
 0x3b1   : > { %v1804_v50 = vadd.f32 %v1802_v7, %v1782_v36  ;;  %v1805_v24 = vadd.f32 %v1803_v21, %v1783_v56  ;;  %v1817_v19 = vmul.f32 %v1812_v59, %v4197_v35  ;;  %v1818_v60 = vmul.f32 %v1816_v39, %v4200_v43  ;;  %v5320_v7 = vld [vmem:[#allocation37_spill] sm:$0xff] }
 0x3b2   : > { %v2030_v3 = vmul.f32 %v5316_v22, %v2023_v41  ;;  %v2061_v61 = vsel %vm1193_vm5, %v5318_v17, %v5317_v42  ;;  %v2065_v53 = vsel %vm1193_vm5, %v5317_v42, %v5318_v17  ;;  %v2031_v9 = vadd.f32 %v2029_v51, %v2009_v58 }
 0x3b3   : > { %v1833_v57 = vpop.permute.xlu0 %1832  ;;  %v1824_v12 = vmul.f32 %v5319_v34, %v1817_v19  ;;  %v1825_v2 = vmul.f32 %v5319_v34, %v1818_v60  ;;  %v1831_v25 = vpop.permute.xlu1 %1830  ;;  %v2051_v21 = vmul.f32 %v5320_v7, %v2044_v8  ;;  %v2052_v23 = vmul.f32 %v5320_v7, %v2045_v4  ;;  %v5321_v19 = vld [vmem:[#allocation29_spill] sm:$0xff] }
 0x3b4   : > { %v2032_v62 = vadd.f32 %v2030_v3, %v2010_v31  ;;  %v1834_v46 = vsel %vm1157_vm2, %v1831_v25, %v1833_v57  ;;  %v1838_v41 = vsel %vm1157_vm2, %v1833_v57, %v1831_v25  ;;  %v2066_v59 = vmul.f32 %v2061_v61, %v5264_v1  ;;  %v3072_v31 = vld [vmem:[%s5028_s7 + $0x8] sm:$0x3]  ;;  %v3062_v8 = vld [vmem:[%s5028_s7 + $0x6] sm:$0x3] }
 0x3b5   : > { %v1826_v63 = vadd.f32 %v1824_v12, %v1804_v50  ;;  %v1827_v36 = vadd.f32 %v1825_v2, %v1805_v24  ;;  %v1839_v56 = vmul.f32 %v1834_v46, %v4139_v16  ;;  %v1840_v37 = vmul.f32 %v1838_v41, %v4142_v13  ;;  %v5322_v12 = vld [vmem:[#allocation40_spill] sm:$0xff] }
 0x3b6   : > { %v2067_v39 = vmul.f32 %v2065_v53, %v5265_v33  ;;  %v2053_v22 = vadd.f32 %v2051_v21, %v2031_v9  ;;  %v2054_v51 = vadd.f32 %v2052_v23, %v2032_v62  ;;  %v2082_v53 = vrot.slane %v3072_v31, %v5270_v10  ;;  %v5323_v41 = vld [vmem:[#allocation28_spill] sm:$0xff] }
 0x3b7   : > { %v1853_v58 = vpop.permute.xlu0 %1852  ;;  %v1846_v50 = vmul.f32 %v5321_v19, %v1839_v56  ;;  %v1847_v24 = vmul.f32 %v5321_v19, %v1840_v37  ;;  %v1855_v60 = vpop.permute.xlu1 %1854  ;;  %v2086_v34 = vrot.slane %v3072_v31, %v5271_v26  ;;  %v2073_v2 = vmul.f32 %v5322_v12, %v2066_v59 }
 0x3b8   : > { %v1856_v4 = vsel %vm1193_vm5, %v1853_v58, %v1855_v60  ;;  %v1860_v3 = vsel %vm1193_vm5, %v1855_v60, %v1853_v58  ;;  %v2074_v25 = vmul.f32 %v5322_v12, %v2067_v39  ;;  %v1877_v62 = vrot.slane %v3062_v8, %v5270_v10 }
 0x3b9   : > { %v1848_v57 = vadd.f32 %v1846_v50, %v1826_v63  ;;  %v1849_v42 = vadd.f32 %v1847_v24, %v1827_v36  ;;  %v1861_v17 = vmul.f32 %v1856_v4, %v5264_v1  ;;  %v1862_v61 = vmul.f32 %v1860_v3, %v5265_v33 }
 0x3ba   : > { %v1881_v46 = vrot.slane %v3062_v8, %v5271_v26  ;;  %v2075_v37 = vadd.f32 %v2073_v2, %v2053_v22  ;;  %v2076_v7 = vadd.f32 %v2074_v25, %v2054_v51 }
 0x3bb   : > { %v2106_v9 = vpop.permute.xlu0 %2105  ;;  %v1868_v63 = vmul.f32 %v5323_v41, %v1861_v17  ;;  %v1869_v36 = vmul.f32 %v5323_v41, %v1862_v61  ;;  %v2109_v56 = vpop.permute.xlu1 %2108  ;;  %v5324_v61 = vld [vmem:[#allocation39_spill] sm:$0xff] }
 0x3bc   : > { %v2110_v21 = vsel %vm820_vm10, %v2109_v56, %v2106_v9  ;;  %v2113_v23 = vsel %vm820_vm10, %v2106_v9, %v2109_v56  ;;  %v2089_v8 = vmul.f32 %v2082_v53, %v2075_v37  ;;  %v2090_v4 = vmul.f32 %v2086_v34, %v2076_v7  ;;  %v5325_v9 = vld [vmem:[#allocation42_spill] sm:$0xff] }
 0x3bd   : > { %v1870_v58 = vadd.f32 %v1868_v63, %v1848_v57  ;;  %v1871_v59 = vadd.f32 %v1869_v36, %v1849_v42  ;;  %v2114_v39 = vmul.f32 %v2113_v23, %v4111_v45  ;;  %v2115_v31 = vmul.f32 %v2110_v21, %v4114_v54  ;;  %v5326_v21 = vld [vmem:[#allocation41_spill] sm:$0xff] }
 0x3bf   : > { %v2131_v19 = vpop.permute.xlu0 %2130  ;;  %v1884_v50 = vmul.f32 %v1877_v62, %v1870_v58  ;;  %v1885_v24 = vmul.f32 %v1881_v46, %v1871_v59  ;;  %v2128_v60 = vpop.permute.xlu1 %2127  ;;  %v2121_v12 = vmul.f32 %v5324_v61, %v2114_v39  ;;  %v2122_v2 = vmul.f32 %v5324_v61, %v2115_v31 }
 0x3c0   : > { %v2132_v3 = vsel %vm957_vm15, %v2131_v19, %v2128_v60  ;;  %v2135_v22 = vsel %vm957_vm15, %v2128_v60, %v2131_v19  ;;  %v2193_v19 = vmul.f32 %v4063_v44, %v4103_v52 }
 0x3c1   : > { %v2136_v51 = vmul.f32 %v2135_v22, %v4153_v29  ;;  %v2137_v17 = vmul.f32 %v2132_v3, %v4156_v14  ;;  %v1886_v57 = vadd.f32 %v1884_v50, %v4584_v47  ;;  %v1887_v42 = vadd.f32 %v1885_v24, %v4587_v6  ;;  %v5327_v22 = vld [vmem:[#allocation44_spill] sm:$0xff] }
 0x3c2   : > { %v2194_v50 = vmul.f32 %v4059_v32, %v4106_v49 }
 0x3c3   : > { %v2150_v25 = vpop.permute.xlu0 %2149  ;;  %v2143_v53 = vmul.f32 %v5325_v9, %v2136_v51  ;;  %v2144_v34 = vmul.f32 %v5325_v9, %v2137_v17  ;;  %v2153_v62 = vpop.permute.xlu1 %2152  ;;  %v4715_v46 = vadd.f32 %v2089_v8, %v1886_v57  ;;  %v4717_v41 = vadd.f32 %v2090_v4, %v1887_v42  ;;  %v5328_v42 = vld [vmem:[#allocation43_spill] sm:$0xff] }
 0x3c4   : > { %v2154_v63 = vsel %vm993_vm14, %v2153_v62, %v2150_v25  ;;  %v2157_v47 = vsel %vm993_vm14, %v2150_v25, %v2153_v62  ;;  %v2200_v61 = vmul.f32 %v5328_v42, %v2193_v19 }
 0x3c5   : > { %v2145_v36 = vadd.f32 %v2143_v53, %v2121_v12  ;;  %v2146_v6 = vadd.f32 %v2144_v34, %v2122_v2  ;;  %v2158_v56 = vmul.f32 %v2157_v47, %v4117_v18  ;;  %v2159_v37 = vmul.f32 %v2154_v63, %v4128_v40  ;;  %v5329_v47 = vld [vmem:[#allocation47_spill] sm:$0xff] }
 0x3c6   : > { %v2201_v12 = vmul.f32 %v5328_v42, %v2194_v50 }
 0x3c7   : > { %v2175_v7 = vpop.permute.xlu0 %2174  ;;  %v2165_v23 = vmul.f32 %v5326_v21, %v2158_v56  ;;  %v2166_v58 = vmul.f32 %v5326_v21, %v2159_v37  ;;  %v2172_v59 = vpop.permute.xlu1 %2171 }
 0x3c8   : > { %v2176_v39 = vsel %vm483_vm4, %v2175_v7, %v2172_v59  ;;  %v2179_v31 = vsel %vm483_vm4, %v2172_v59, %v2175_v7 }
 0x3c9   : > { %v2167_v24 = vadd.f32 %v2165_v23, %v2145_v36  ;;  %v2168_v60 = vadd.f32 %v2166_v58, %v2146_v6  ;;  %v2180_v8 = vmul.f32 %v2179_v31, %v4159_v11  ;;  %v2181_v4 = vmul.f32 %v2176_v39, %v4162_v48  ;;  %v5330_v31 = vld [vmem:[#allocation46_spill] sm:$0xff] }
 0x3cb   : > { %v2209_v3 = vpop.permute.xlu0 %2208  ;;  %v2187_v51 = vmul.f32 %v5327_v22, %v2180_v8  ;;  %v2188_v17 = vmul.f32 %v5327_v22, %v2181_v4  ;;  %v2207_v57 = vpop.permute.xlu1 %2206 }
 0x3cc   : > { %v2210_v44 = vsel %vm554_vm3, %v2207_v57, %v2209_v3  ;;  %v2214_v32 = vsel %vm554_vm3, %v2209_v3, %v2207_v57  ;;  %v5331_v57 = vld [vmem:[#allocation49_spill] sm:$0xff] }
 0x3cd   : > { %v2189_v2 = vadd.f32 %v2187_v51, %v2167_v24  ;;  %v2190_v25 = vadd.f32 %v2188_v17, %v2168_v60  ;;  %v2215_v9 = vmul.f32 %v2210_v44, %v4131_v30  ;;  %v2216_v53 = vmul.f32 %v2214_v32, %v4134_v15  ;;  %v3082_v44 = vld [vmem:[%s5028_s7 + $0xa] sm:$0x3] }
 0x3cf   : > { %v2229_v34 = vpop.permute.xlu0 %2228  ;;  %v2202_v62 = vadd.f32 %v2200_v61, %v2189_v2  ;;  %v2203_v63 = vadd.f32 %v2201_v12, %v2190_v25  ;;  %v2222_v36 = vmul.f32 %v5329_v47, %v2215_v9  ;;  %v2223_v6 = vmul.f32 %v5329_v47, %v2216_v53  ;;  %v2231_v56 = vpop.permute.xlu1 %2230 }
 0x3d0   : > { %v2232_v37 = vsel %vm1121_vm1, %v2229_v34, %v2231_v56  ;;  %v2236_v7 = vsel %vm1121_vm1, %v2231_v56, %v2229_v34  ;;  %v2297_v53 = vrot.slane %v3082_v44, %v5270_v10  ;;  %v2301_v34 = vrot.slane %v3082_v44, %v5271_v26  ;;  %v5350_v26 = vld [vmem:[#allocation62_spill] sm:$0xff] }
 0x3d1   : > { %v2224_v21 = vadd.f32 %v2222_v36, %v2202_v62  ;;  %v2225_v23 = vadd.f32 %v2223_v6, %v2203_v63  ;;  %v2237_v58 = vmul.f32 %v2232_v37, %v4197_v35  ;;  %v2238_v59 = vmul.f32 %v2236_v7, %v4200_v43  ;;  %v5332_v36 = vld [vmem:[#allocation48_spill] sm:$0xff]  ;;  %v5351_v10 = vld [vmem:[#allocation50_spill] sm:$0xff] }
 0x3d3   : > { %v2253_v39 = vpop.permute.xlu0 %2252  ;;  %v2244_v19 = vmul.f32 %v5330_v31, %v2237_v58  ;;  %v2245_v50 = vmul.f32 %v5330_v31, %v2238_v59  ;;  %v2251_v24 = vpop.permute.xlu1 %2250 }
 0x3d4   : > { %v2254_v60 = vsel %vm1157_vm2, %v2251_v24, %v2253_v39  ;;  %v2258_v8 = vsel %vm1157_vm2, %v2253_v39, %v2251_v24 }
 0x3d5   : > { %v2246_v4 = vadd.f32 %v2244_v19, %v2224_v21  ;;  %v2247_v3 = vadd.f32 %v2245_v50, %v2225_v23  ;;  %v2259_v22 = vmul.f32 %v2254_v60, %v4139_v16  ;;  %v2260_v51 = vmul.f32 %v2258_v8, %v4142_v13 }
 0x3d7   : > { %v2273_v17 = vpop.permute.xlu0 %2272  ;;  %v2266_v42 = vmul.f32 %v5331_v57, %v2259_v22  ;;  %v2267_v61 = vmul.f32 %v5331_v57, %v2260_v51  ;;  %v5335_v57 = vld [vmem:[#allocation83_spill] sm:$0xff] }
 0x3d8   : > { %v2275_v12 = vpop.permute.xlu1 %2274 }
 0x3d9   : > { %v2276_v32 = vsel %vm1193_vm5, %v2273_v17, %v2275_v12  ;;  %v2280_v2 = vsel %vm1193_vm5, %v2275_v12, %v2273_v17  ;;  %v2268_v63 = vadd.f32 %v2266_v42, %v2246_v4  ;;  %v2269_v47 = vadd.f32 %v2267_v61, %v2247_v3  ;;  %v5336_v42 = vld [vmem:[#allocation84_spill] sm:$0xff] }
 0x3da   : > { %v2281_v25 = vmul.f32 %v2276_v32, %v5264_v1  ;;  %v2282_v9 = vmul.f32 %v2280_v2, %v5265_v33  ;;  %v2409_v61 = vmul.f32 %v4293_v38, %v4103_v52  ;;  %v2410_v12 = vmul.f32 %v4301_v27, %v4106_v49  ;;  %v5337_v32 = vld [vmem:[#allocation102_spill] sm:$0xff] }
 0x3db   : > { %v2325_v62 = vpop.permute.xlu0 %2324  ;;  %v2747_v2 = vmul.f32 %v4111_v45, %v5337_v32 }
 0x3dc   : > { %v2288_v6 = vmul.f32 %v5332_v36, %v2281_v25  ;;  %v2289_v56 = vmul.f32 %v5332_v36, %v2282_v9  ;;  %v2322_v37 = vpop.permute.xlu1 %2321  ;;  %v5338_v25 = vld [vmem:[#allocation103_spill] sm:$0xff] }
 0x3dd   : > { %v2748_v9 = vmul.f32 %v4114_v54, %v5338_v25 }
 0x3de   : > { %v2290_v7 = vadd.f32 %v2288_v6, %v2268_v63  ;;  %v2291_v21 = vadd.f32 %v2289_v56, %v2269_v47  ;;  %v5340_v63 = vld [vmem:[#allocation101_spill] sm:$0xff]  ;;  %v5341_v6 = vld [vmem:[#allocation66_spill] sm:$0xff]  ;;  %v5342_v56 = vld [vmem:[#allocation104_spill] sm:$0xff] }
 0x3df   : > { %v2344_v23 = vpop.permute.xlu0 %2343  ;;  %v2764_v47 = vmul.f32 %v4156_v14, %v5340_v63  ;;  %v5345_v63 = vld [vmem:[#allocation58_spill] sm:$0xff] }
 0x3e0   : > { %v2304_v58 = vmul.f32 %v2297_v53, %v2290_v7  ;;  %v2305_v59 = vmul.f32 %v2301_v34, %v2291_v21  ;;  %v2347_v39 = vpop.permute.xlu1 %2346  ;;  %v5339_v53 = vld [vmem:[#allocation100_spill] sm:$0xff]  ;;  %v2779_v7 = vmul.f32 %v4117_v18, %v5342_v56  ;;  %v5343_v21 = vld [vmem:[#allocation105_spill] sm:$0xff]  ;;  %v2755_v56 = vmul.f32 %v5345_v63, %v2748_v9 }
 0x3e1   : > { %v2763_v34 = vmul.f32 %v4153_v29, %v5339_v53  ;;  %v2348_v25 = vsel %vm957_vm15, %v2347_v39, %v2344_v23  ;;  %v2627_v53 = vmul.f32 %v4432_v20, %v4106_v49 }
 0x3e2   : > { %v4767_v31 = vadd.f32 %v2304_v58, %v4715_v46  ;;  %v4770_v19 = vadd.f32 %v2305_v59, %v4717_v41  ;;  %v2808_v46 = vmul.f32 %v4103_v52, %v5335_v57  ;;  %v2809_v41 = vmul.f32 %v4106_v49, %v5336_v42  ;;  %v5344_v59 = vld [vmem:[#allocation55_spill] sm:$0xff] }
 0x3e3   : > { %v2369_v50 = vpop.permute.xlu0 %2368  ;;  %v2780_v58 = vmul.f32 %v4128_v40, %v5343_v21  ;;  %v4811_v57 = vmul.f32 %v5344_v59, %v2409_v61  ;;  %v4814_v42 = vmul.f32 %v5344_v59, %v2410_v12  ;;  %v5346_v61 = vld [vmem:[#allocation61_spill] sm:$0xff]  ;;  %v2326_v59 = vsel %vm820_vm10, %v2325_v62, %v2322_v37 }
 0x3e4   : > { %5333 = vst [vmem:[#allocation9_spill] sm:$0xff] %v4767_v31  ;;  %5334 = vst [vmem:[#allocation7_spill] sm:$0xff] %v4770_v19  ;;  %v2366_v24 = vpop.permute.xlu1 %2365  ;;  %v4801_v38 = vmul.f32 %v5341_v6, %v2808_v46  ;;  %v4804_v27 = vmul.f32 %v5341_v6, %v2809_v41  ;;  %v2351_v46 = vsel %vm957_vm15, %v2344_v23, %v2347_v39 }
 0x3e5   : > { %v2626_v41 = vmul.f32 %v4425_v28, %v4103_v52  ;;  %v2754_v6 = vmul.f32 %v5345_v63, %v2747_v2  ;;  %v2770_v21 = vmul.f32 %v5346_v61, %v2763_v34  ;;  %v2771_v12 = vmul.f32 %v5346_v61, %v2764_v47  ;;  %v5347_v28 = vld [vmem:[#allocation63_spill] sm:$0xff]  ;;  %v5348_v34 = vld [vmem:[#allocation108_spill] sm:$0xff]  ;;  %v5349_v63 = vld [vmem:[#allocation109_spill] sm:$0xff] }
 0x3e6   : > { %v2329_v19 = vsel %vm820_vm10, %v2322_v37, %v2325_v62  ;;  %v2370_v23 = vsel %vm993_vm14, %v2369_v50, %v2366_v24  ;;  %v2373_v39 = vsel %vm993_vm14, %v2366_v24, %v2369_v50  ;;  %v2786_v31 = vmul.f32 %v5347_v28, %v2779_v7 }
 0x3e7   : > { %v2388_v60 = vpop.permute.xlu0 %2387  ;;  %v2787_v49 = vmul.f32 %v5347_v28, %v2780_v58  ;;  %v2352_v20 = vmul.f32 %v2351_v46, %v4153_v29  ;;  %v2353_v2 = vmul.f32 %v2348_v25, %v4156_v14  ;;  %v2795_v47 = vmul.f32 %v4159_v11, %v5348_v34 }
 0x3e8   : > { %v2391_v8 = vpop.permute.xlu1 %2390  ;;  %v2796_v62 = vmul.f32 %v4162_v48, %v5349_v63  ;;  %v2330_v24 = vmul.f32 %v2329_v19, %v4111_v45  ;;  %v2331_v7 = vmul.f32 %v2326_v59, %v4114_v54  ;;  %v2374_v58 = vmul.f32 %v2373_v39, %v4117_v18 }
 0x3e9   : > { %v2392_v37 = vsel %vm483_vm4, %v2391_v8, %v2388_v60  ;;  %v2395_v50 = vsel %vm483_vm4, %v2388_v60, %v2391_v8  ;;  %v2375_v46 = vmul.f32 %v2370_v23, %v4128_v40  ;;  %v2772_v25 = vadd.f32 %v2770_v21, %v2754_v6  ;;  %v5352_v6 = vld [vmem:[#allocation65_spill] sm:$0xff] }
 0x3ea   : > { %v2773_v61 = vadd.f32 %v2771_v12, %v2755_v56  ;;  %v4845_v34 = vmul.f32 %v5350_v26, %v2626_v41  ;;  %v4848_v63 = vmul.f32 %v5350_v26, %v2627_v53  ;;  %v2359_v33 = vmul.f32 %v5351_v10, %v2352_v20  ;;  %v5353_v41 = vld [vmem:[#allocation51_spill] sm:$0xff]  ;;  %v5354_v53 = vld [vmem:[#allocation53_spill] sm:$0xff] }
 0x3eb   : > { %v4772_v4 = vpop.permute.xlu0 %2422  ;;  %v2360_v60 = vmul.f32 %v5351_v10, %v2353_v2  ;;  %v2396_v19 = vmul.f32 %v2395_v50, %v4159_v11  ;;  %v2397_v8 = vmul.f32 %v2392_v37, %v4162_v48  ;;  %v2788_v39 = vadd.f32 %v2786_v31, %v2772_v25  ;;  %v5355_v50 = vld [vmem:[#allocation52_spill] sm:$0xff] }
 0x3ec   : > { %v4774_v3 = vpop.permute.xlu1 %2424  ;;  %v2789_v23 = vadd.f32 %v2787_v49, %v2773_v61  ;;  %v2802_v56 = vmul.f32 %v5352_v6, %v2795_v47  ;;  %v2803_v21 = vmul.f32 %v5352_v6, %v2796_v62  ;;  %v2337_v12 = vmul.f32 %v5353_v41, %v2330_v24 }
 0x3ed   : > { %v2338_v26 = vmul.f32 %v5353_v41, %v2331_v7  ;;  %v2381_v1 = vmul.f32 %v5354_v53, %v2374_v58  ;;  %v2382_v20 = vmul.f32 %v5354_v53, %v2375_v46  ;;  %v2824_v10 = vmul.f32 %v4131_v30, %v4272_v5  ;;  %v5356_v53 = vld [vmem:[#allocation56_spill] sm:$0xff] }
 0x3ee   : > { %v2825_v2 = vmul.f32 %v4134_v15, %v4267_v0  ;;  %v2361_v62 = vadd.f32 %v2359_v33, %v2337_v12  ;;  %v2403_v24 = vmul.f32 %v5355_v50, %v2396_v19  ;;  %v2404_v7 = vmul.f32 %v5355_v50, %v2397_v8 }
 0x3ef   : > { %v4776_v22 = vpop.permute.xlu0 %2446  ;;  %v2362_v37 = vadd.f32 %v2360_v60, %v2338_v26  ;;  %v2426_v60 = vsel %vm554_vm3, %v4772_v4, %v4774_v3  ;;  %v2430_v19 = vsel %vm554_vm3, %v4774_v3, %v4772_v4  ;;  %v2804_v6 = vadd.f32 %v2802_v56, %v2788_v39 }
 0x3f0   : > { %v4778_v51 = vpop.permute.xlu1 %2444  ;;  %v2805_v41 = vadd.f32 %v2803_v21, %v2789_v23  ;;  %v5358_v23 = vld [vmem:[#allocation57_spill] sm:$0xff] }
 0x3f1   : > { %v2384_v33 = vadd.f32 %v2382_v20, %v2362_v37 }
 0x3f3   : > { %v4780_v17 = vpop.permute.xlu0 %2541  ;;  %v2406_v26 = vadd.f32 %v2404_v7, %v2384_v33 }
 0x3f4   : > { %v4790_v44 = vpop.permute.xlu1 %2538 }
 0x3f5   : > { %v2543_v46 = vsel %vm820_vm10, %v4780_v17, %v4790_v44  ;;  %v2546_v0 = vsel %vm820_vm10, %v4790_v44, %v4780_v17  ;;  %v2419_v50 = vadd.f32 %v4814_v42, %v2406_v26 }
 0x3f7   : > { %v2564_v36 = vpop.permute.xlu0 %2563 }
 0x3f8   : > { %v2561_v32 = vpop.permute.xlu1 %2560 }
 0x3f9   : > { %v2565_v31 = vsel %vm957_vm15, %v2564_v36, %v2561_v32  ;;  %v2568_v49 = vsel %vm957_vm15, %v2561_v32, %v2564_v36  ;;  %v2383_v32 = vadd.f32 %v2381_v1, %v2361_v62  ;;  %v2547_v1 = vmul.f32 %v2546_v0, %v4111_v45  ;;  %v5357_v45 = vld [vmem:[#allocation71_spill] sm:$0xff] }
 0x3fa   : > { %v2569_v25 = vmul.f32 %v2568_v49, %v4153_v29  ;;  %v2570_v61 = vmul.f32 %v2565_v31, %v4156_v14  ;;  %v4895_v20 = vmul.f32 %v5357_v45, %v2824_v10  ;;  %v5359_v31 = vld [vmem:[#allocation59_spill] sm:$0xff]  ;;  %v4908_v10 = vmul.f32 %v4197_v35, %v4324_v55 }
 0x3fb   : > { %v2583_v52 = vpop.permute.xlu0 %2582  ;;  %v2405_v12 = vadd.f32 %v2403_v24, %v2383_v32  ;;  %v2554_v56 = vmul.f32 %v5358_v23, %v2547_v1  ;;  %v2448_v55 = vsel %vm1121_vm1, %v4778_v51, %v4776_v22 }
 0x3fc   : > { %v2586_v9 = vpop.permute.xlu1 %2585  ;;  %v2576_v4 = vmul.f32 %v5356_v53, %v2569_v25  ;;  %v2577_v3 = vmul.f32 %v5356_v53, %v2570_v61 }
 0x3fd   : > { %v2587_v5 = vsel %vm993_vm14, %v2586_v9, %v2583_v52  ;;  %v2590_v36 = vsel %vm993_vm14, %v2583_v52, %v2586_v9  ;;  %v2548_v52 = vmul.f32 %v2543_v46, %v4114_v54  ;;  %v2432_v54 = vmul.f32 %v2430_v19, %v4134_v15  ;;  %v5361_v46 = vld [vmem:[#allocation60_spill] sm:$0xff] }
 0x3fe   : > { %v2591_v29 = vmul.f32 %v2590_v36, %v4117_v18  ;;  %v2592_v14 = vmul.f32 %v2587_v5, %v4128_v40  ;;  %v4898_v18 = vmul.f32 %v5357_v45, %v2825_v2  ;;  %v2431_v40 = vmul.f32 %v2426_v60, %v4131_v30  ;;  %v5360_v2 = vld [vmem:[#allocation110_spill] sm:$0xff] }
 0x3ff   : > { %v2605_v28 = vpop.permute.xlu0 %2604  ;;  %v2555_v21 = vmul.f32 %v5358_v23, %v2548_v52  ;;  %v4912_v62 = vmul.f32 %v4200_v43, %v5360_v2  ;;  %v2418_v37 = vadd.f32 %v4811_v57, %v2405_v12  ;;  %v2578_v24 = vadd.f32 %v2576_v4, %v2554_v56  ;;  %v5362_v36 = vld [vmem:[#allocation54_spill] sm:$0xff]  ;;  %v5364_v56 = vld [vmem:[#allocation67_spill] sm:$0xff] }
 0x400   : > { %v2608_v59 = vpop.permute.xlu1 %2607  ;;  %v2598_v49 = vmul.f32 %v5359_v31, %v2591_v29  ;;  %v2438_v32 = vmul.f32 %v5362_v36, %v2431_v40  ;;  %v2439_v33 = vmul.f32 %v5362_v36, %v2432_v54  ;;  %v2452_v57 = vsel %vm1121_vm1, %v4776_v22, %v4778_v51  ;;  %v5366_v2 = vld [vmem:[#allocation107_spill] sm:$0xff] }
 0x401   : > { %v2609_v17 = vsel %vm483_vm4, %v2608_v59, %v2605_v28  ;;  %v2612_v44 = vsel %vm483_vm4, %v2605_v28, %v2608_v59  ;;  %v2579_v7 = vadd.f32 %v2577_v3, %v2555_v21  ;;  %v4931_v52 = vadd.f32 %v4801_v38, %v2804_v6 }
 0x402   : > { %v2613_v28 = vmul.f32 %v2612_v44, %v4159_v11  ;;  %v2614_v59 = vmul.f32 %v2609_v17, %v4162_v48  ;;  %v2599_v11 = vmul.f32 %v5359_v31, %v2592_v14  ;;  %v2600_v42 = vadd.f32 %v2598_v49, %v2578_v24 }
 0x403   : > { %v2640_v47 = vpop.permute.xlu0 %2639  ;;  %v4934_v29 = vadd.f32 %v4804_v27, %v2805_v41  ;;  %v2453_v22 = vmul.f32 %v2448_v55, %v4197_v35  ;;  %v2454_v51 = vmul.f32 %v2452_v57, %v4200_v43  ;;  %v2440_v38 = vadd.f32 %v2438_v32, %v2418_v37 }
 0x404   : > { %v2642_v58 = vpop.permute.xlu1 %2641  ;;  %v2620_v0 = vmul.f32 %v5361_v46, %v2613_v28  ;;  %v2621_v5 = vmul.f32 %v5361_v46, %v2614_v59  ;;  %v2601_v61 = vadd.f32 %v2599_v11, %v2579_v7  ;;  %v2441_v6 = vadd.f32 %v2439_v33, %v2419_v50  ;;  %v5363_v28 = vld [vmem:[#allocation64_spill] sm:$0xff]  ;;  %v5365_v11 = vld [vmem:[#allocation106_spill] sm:$0xff]  ;;  %v5367_v7 = vld [vmem:[#allocation69_spill] sm:$0xff] }
 0x405   : > { %v2643_v60 = vsel %vm554_vm3, %v2640_v47, %v2642_v58  ;;  %v2647_v19 = vsel %vm554_vm3, %v2642_v58, %v2640_v47  ;;  %v2460_v59 = vmul.f32 %v5363_v28, %v2453_v22  ;;  %v2461_v45 = vmul.f32 %v5363_v28, %v2454_v51  ;;  %v3092_v22 = vld [vmem:[%s5028_s7 + $0xc] sm:$0x3]  ;;  %v5371_v51 = vld [vmem:[#allocation112_spill] sm:$0xff] }
 0x406   : > { %v2622_v14 = vadd.f32 %v2620_v0, %v2600_v42  ;;  %v2623_v12 = vadd.f32 %v2621_v5, %v2601_v61  ;;  %v2648_v26 = vmul.f32 %v2643_v60, %v4131_v30  ;;  %v2649_v47 = vmul.f32 %v2647_v19, %v4134_v15  ;;  %v5368_v0 = vld [vmem:[#allocation68_spill] sm:$0xff]  ;;  %v5369_v61 = vld [vmem:[#allocation70_spill] sm:$0xff] }
 0x407   : > { %v2467_v8 = vpop.permute.xlu0 %2466  ;;  %v2462_v55 = vadd.f32 %v2460_v59, %v2440_v38  ;;  %v2463_v57 = vadd.f32 %v2461_v45, %v2441_v6  ;;  %v5373_v38 = vld [vmem:[#allocation75_spill] sm:$0xff] }
 0x408   : > { %v2469_v9 = vpop.permute.xlu1 %2468  ;;  %v2636_v23 = vadd.f32 %v4848_v63, %v2623_v12  ;;  %v2655_v21 = vmul.f32 %v5364_v56, %v2648_v26  ;;  %v2656_v31 = vmul.f32 %v5364_v56, %v2649_v47  ;;  %v5372_v12 = vld [vmem:[#allocation111_spill] sm:$0xff] }
 0x409   : > { %v2470_v44 = vsel %vm1157_vm2, %v2467_v8, %v2469_v9  ;;  %v2474_v1 = vsel %vm1157_vm2, %v2469_v9, %v2467_v8  ;;  %v2857_v26 = vmul.f32 %v4142_v13, %v5372_v12 }
 0x40a   : > { %v2475_v27 = vmul.f32 %v2470_v44, %v4139_v16  ;;  %v2476_v41 = vmul.f32 %v2474_v1, %v4142_v13  ;;  %v2658_v42 = vadd.f32 %v2656_v31, %v2636_v23 }
 0x40b   : > { %v2664_v39 = vpop.permute.xlu0 %2663 }
 0x40c   : > { %v2662_v48 = vpop.permute.xlu1 %2661 }
 0x40d   : > { %v2665_v58 = vsel %vm1121_vm1, %v2662_v48, %v2664_v39  ;;  %v2669_v8 = vsel %vm1121_vm1, %v2664_v39, %v2662_v48  ;;  %v2635_v39 = vadd.f32 %v4845_v34, %v2622_v14  ;;  %v2483_v34 = vmul.f32 %v5367_v7, %v2476_v41  ;;  %v5374_v41 = vld [vmem:[#allocation72_spill] sm:$0xff] }
 0x40e   : > { %v2670_v40 = vmul.f32 %v2665_v58, %v4197_v35  ;;  %v2671_v54 = vmul.f32 %v2669_v8, %v4200_v43  ;;  %v2482_v43 = vmul.f32 %v5367_v7, %v2475_v27  ;;  %v2856_v14 = vmul.f32 %v4139_v16, %v5371_v51 }
 0x40f   : > { %v2491_v25 = vpop.permute.xlu0 %2490  ;;  %v2485_v58 = vadd.f32 %v2483_v34, %v2463_v57  ;;  %v5380_v57 = vld [vmem:[#allocation9_spill] sm:$0xff] }
 0x410   : > { %v2489_v17 = vpop.permute.xlu1 %2488  ;;  %v2677_v5 = vmul.f32 %v5368_v0, %v2670_v40  ;;  %v2678_v36 = vmul.f32 %v5368_v0, %v2671_v54  ;;  %v2484_v47 = vadd.f32 %v2482_v43, %v2462_v55  ;;  %v2833_v54 = vadd.f32 %v4895_v20, %v4931_v52  ;;  %v5378_v20 = vld [vmem:[#allocation114_spill] sm:$0xff] }
 0x411   : > { %v2492_v4 = vsel %vm1193_vm5, %v2489_v17, %v2491_v25  ;;  %v2496_v3 = vsel %vm1193_vm5, %v2491_v25, %v2489_v17  ;;  %v2657_v25 = vadd.f32 %v2655_v21, %v2635_v39  ;;  %v5370_v17 = vld [vmem:[#allocation73_spill] sm:$0xff]  ;;  %v5377_v39 = vld [vmem:[#allocation74_spill] sm:$0xff]  ;;  %v2872_v52 = vmul.f32 %v5365_v11, %v5378_v20 }
 0x412   : > { %v2497_v48 = vmul.f32 %v2492_v4, %v5365_v11  ;;  %v2498_v37 = vmul.f32 %v2496_v3, %v5366_v2  ;;  %v2848_v4 = vmul.f32 %v5374_v41, %v4912_v62  ;;  %v5375_v3 = vld [vmem:[#allocation3_spill] sm:$0xff]  ;;  %v2863_v62 = vmul.f32 %v5377_v39, %v2856_v14 }
 0x413   : > { %v2686_v9 = vpop.permute.xlu0 %2685  ;;  %v2679_v8 = vadd.f32 %v2677_v5, %v2657_v25  ;;  %v2864_v23 = vmul.f32 %v5377_v39, %v2857_v26  ;;  %v5381_v25 = vld [vmem:[#allocation7_spill] sm:$0xff] }
 0x414   : > { %v2684_v53 = vpop.permute.xlu1 %2683  ;;  %v2504_v60 = vmul.f32 %v5369_v61, %v2497_v48  ;;  %v2505_v19 = vmul.f32 %v5369_v61, %v2498_v37  ;;  %v3112_v48 = vld [vmem:[%s5028_s7 + $0x10] sm:$0x3] }
 0x415   : > { %v2687_v30 = vsel %vm1157_vm2, %v2684_v53, %v2686_v9  ;;  %v2691_v15 = vsel %vm1157_vm2, %v2686_v9, %v2684_v53  ;;  %v2680_v9 = vadd.f32 %v2678_v36, %v2658_v42  ;;  %v2847_v53 = vmul.f32 %v5374_v41, %v4908_v10 }
 0x416   : > { %v2692_v50 = vmul.f32 %v2687_v30, %v4139_v16  ;;  %v2693_v24 = vmul.f32 %v2691_v15, %v4142_v13  ;;  %v2514_v30 = vrot.slane %v3092_v22, %v5375_v3  ;;  %v5376_v16 = vld [vmem:[#allocation4_spill] sm:$0xff]  ;;  %v3102_v13 = vld [vmem:[%s5028_s7 + $0xe] sm:$0x3]  ;;  %v2506_v28 = vadd.f32 %v2504_v60, %v2484_v47 }
 0x417   : > { %v2708_v49 = vpop.permute.xlu0 %2707  ;;  %v2518_v15 = vrot.slane %v3092_v22, %v5376_v16  ;;  %v2507_v59 = vadd.f32 %v2505_v19, %v2485_v58  ;;  %v2834_v10 = vadd.f32 %v4898_v18, %v4934_v29  ;;  %v2731_v31 = vrot.slane %v3102_v13, %v5375_v3  ;;  %v5379_v18 = vld [vmem:[#allocation113_spill] sm:$0xff] }
 0x418   : > { %v2706_v35 = vpop.permute.xlu1 %2705  ;;  %v2699_v44 = vmul.f32 %v5370_v17, %v2692_v50  ;;  %v2700_v1 = vmul.f32 %v5370_v17, %v2693_v24  ;;  %v2849_v37 = vadd.f32 %v2847_v53, %v2833_v54  ;;  %v2873_v29 = vmul.f32 %v5366_v2, %v5379_v18 }
 0x419   : > { %v2709_v63 = vsel %vm1193_vm5, %v2706_v35, %v2708_v49  ;;  %v2713_v46 = vsel %vm1193_vm5, %v2708_v49, %v2706_v35  ;;  %v2735_v49 = vrot.slane %v3102_v13, %v5376_v16  ;;  %v2850_v50 = vadd.f32 %v2848_v4, %v2834_v10  ;;  %v5382_v4 = vld [vmem:[#allocation5_spill] sm:$0xff] }
 0x41a   : > { %v2714_v32 = vmul.f32 %v2709_v63, %v5365_v11  ;;  %v2715_v33 = vmul.f32 %v2713_v46, %v5366_v2  ;;  %v2701_v45 = vadd.f32 %v2699_v44, %v2679_v8  ;;  %v2702_v40 = vadd.f32 %v2700_v1, %v2680_v9 }
 0x41b   : > { %v2521_v24 = vmul.f32 %v2514_v30, %v2506_v28  ;;  %v2522_v35 = vmul.f32 %v2518_v15, %v2507_v59  ;;  %v2865_v43 = vadd.f32 %v2863_v62, %v2849_v37  ;;  %v2866_v34 = vadd.f32 %v2864_v23, %v2850_v50 }
 0x41c   : > { %v2721_v6 = vmul.f32 %v5373_v38, %v2714_v32  ;;  %v2722_v27 = vmul.f32 %v5373_v38, %v2715_v33  ;;  %v2889_v63 = vrot.slane %v3112_v48, %v5375_v3  ;;  %v2893_v46 = vrot.slane %v3112_v48, %v5376_v16  ;;  %v5384_v16 = vld [vmem:[#allocation6_spill] sm:$0xff] }
 0x41d   : > { %v2523_v11 = vadd.f32 %v2521_v24, %v5380_v57  ;;  %v2524_v42 = vadd.f32 %v2522_v35, %v5381_v25  ;;  %v5383_v3 = vmax.f32 %v5382_v4, 0.0  ;;  %v5385_v15 = vmax.f32 %v5384_v16, 0.0 }
 0x41e   : > { %v2723_v56 = vadd.f32 %v2721_v6, %v2701_v45  ;;  %v2724_v21 = vadd.f32 %v2722_v27, %v2702_v40 }
 0x420   : > { %v2738_v36 = vmul.f32 %v2731_v31, %v2723_v56  ;;  %v2739_v32 = vmul.f32 %v2735_v49, %v2724_v21 }
 0x422   : > { %v2740_v2 = vadd.f32 %v2738_v36, %v2523_v11  ;;  %v2741_v61 = vadd.f32 %v2739_v32, %v2524_v42 }
 0x424   : > { %v2904_v1 = vpop.permute.xlu0 %2903 }
 0x425   : > { %v2877_v7 = vpop.permute.xlu1 %2876 }
 0x426   : > { %v2879_v0 = vmul.f32 %v2877_v7, %v2872_v52  ;;  %v2880_v5 = vmul.f32 %v2877_v7, %v2873_v29 }
 0x428   : > { %v2881_v33 = vadd.f32 %v2879_v0, %v2865_v43  ;;  %v2882_v55 = vadd.f32 %v2880_v5, %v2866_v34 }
 0x42a   : > { %v2896_v60 = vmul.f32 %v2889_v63, %v2881_v33  ;;  %v2897_v19 = vmul.f32 %v2893_v46, %v2882_v55 }
 0x42c   : > { %v2898_v17 = vadd.f32 %v2896_v60, %v2740_v2  ;;  %v2899_v44 = vadd.f32 %v2897_v19, %v2741_v61 }
 0x42e   : > { %v2906_v22 = vadd.f32 %v2904_v1, %v2898_v17  ;;  %v2907_v51 = vadd.f32 %v2904_v1, %v2899_v44 }
 0x430   : > { %v2908_v14 = vmax.f32 %v2906_v22, 0.0  ;;  %v2909_v12 = vmax.f32 %v2907_v51, 0.0 }
 0x432   : > { %v3113_v26 = vmul.f32 -1.442695, %v2908_v14  ;;  %v3114_v47 = vmul.f32 -1.442695, %v2909_v12 }
 0x434   : > { %3151 = vpow2.f32 %v3113_v26 }
 0x435   : > { %3153 = vpow2.f32 %v3114_v47 }
 0x441   : > { %v3152_v58 = vpop.eup %3151 }
 0x442   : > { %v3154_v8 = vpop.eup %3153  ;;  %v2916_v9 = vadd.f32 1.0, %v3152_v58 }
 0x443   : > { %v2917_v38 = vadd.f32 1.0, %v3154_v8 }
 0x444   : > { %3155 = vrcp.f32 %v2916_v9 }
 0x445   : > { %3157 = vrcp.f32 %v2917_v38 }
 0x451   : > { %v3156_v6 = vpop.eup %3155 }
 0x452   : > { %v3158_v27 = vpop.eup %3157  ;;  %v2922_v41 = vadd.f32 1.0, %v3156_v6 }
 0x453   : > { %v2923_v53 = vadd.f32 1.0, %v3158_v27 }
 0x454   : > { %v2924_v30 = vmul.f32 %v2922_v41, %v5383_v3 }
 0x455   : > { %v2925_v13 = vmul.f32 %v2923_v53, %v5385_v15 }
 0x457   : > { %v2928_v28 = vcombine.low %v2924_v30, %v2925_v13 }
 0x459   : > { %2930 = vst [vmem:[%s332_s18] sm:$0xff] %v2928_v28 }
 0x45a PF: > { %s19_s30 = sadd.s32 1, %s3165_s30  }
 0x45b   : > { %p16_p4 = scmp.ge.s32.totalorder %s19_s30, 4  }
 0x45d   :  { %18 = sbr.rel (!%p16_p4) target bundleno = 1 (0x1), region = 182 }

</bundles_post_ra>
